<compile_context>
chip_gen: v6e
topology: v6e:2x2x1
jax: 0.10.0
libtpu: 0.0.40
codegen_flags: <defaults>
</compile_context>

<pallas_src>
import functools

import jax
import jax.numpy as jnp
from jax.experimental import pallas as pl
from jax.experimental.pallas import tpu as pltpu


# --------------------------------------------------------------------------
# Model configuration (matches the PyTorch module's Params usage)
# --------------------------------------------------------------------------
class Params:
    in_channels = 4            # bool channels (2) + float channels (2)
    conv_kernels = 8
    conv_kernel_size = 3
    conv_layers = 2
    global_map_scaling = 2
    local_map_size = 8
    hidden_layer_size = 32
    hidden_layer_num = 2


NUM_ACTIONS = 4
BOOL_CH = 2
FLOAT_CH = 2
H = W = 16
BATCH = 2
STATES_DIM = 4


# --------------------------------------------------------------------------
# Kernel 1: fused two-layer Conv('same')+ReLU stack, one branch per grid step
# --------------------------------------------------------------------------
def _conv_stack_kernel(xp_ref, w1_ref, b1_ref, w2_ref, b2_ref, o_ref, xpad2_ref):
    # xp_ref   : (n, h+2p, w+2p, c_in)   zero-padded branch input (VMEM)
    # w1_ref   : (k, k, c_in,  c_mid)    b1_ref: (1, c_mid)
    # w2_ref   : (k, k, c_mid, c_out)    b2_ref: (1, c_out)
    # o_ref    : (n*h*w, c_out)          flattened NHWC activations
    # xpad2_ref: VMEM scratch (n, h+2p, w+2p, c_mid) for layer-2 'same' padding
    n, hp, wp, c_in = xp_ref.shape
    k = w1_ref.shape[0]
    c_mid = w1_ref.shape[-1]
    c_out = w2_ref.shape[-1]
    pad = k // 2
    h, w = hp - 2 * pad, wp - 2 * pad
    m = n * h * w

    # ---- conv layer 1 (+bias, ReLU): 9 shifted-window matmuls on the MXU ----
    acc = jnp.zeros((m, c_mid), jnp.float32)
    for kh in range(k):
        for kw in range(k):
            win = xp_ref[:, kh:kh + h, kw:kw + w, :]            # (n, h, w, c_in)
            acc = acc + jnp.dot(win.reshape(m, c_in),
                                w1_ref[kh, kw, :, :],
                                preferred_element_type=jnp.float32)
    act1 = jnp.maximum(acc + b1_ref[...], 0.0)                  # (m, c_mid)

    # ---- zero-pad layer-1 activations in VMEM ('same' padding for layer 2) ----
    xpad2_ref[...] = jnp.zeros_like(xpad2_ref)
    xpad2_ref[:, pad:pad + h, pad:pad + w, :] = act1.reshape(n, h, w, c_mid)

    # ---- conv layer 2 (+bias, ReLU) ----
    acc2 = jnp.zeros((m, c_out), jnp.float32)
    for kh in range(k):
        for kw in range(k):
            win = xpad2_ref[:, kh:kh + h, kw:kw + w, :]         # (n, h, w, c_mid)
            acc2 = acc2 + jnp.dot(win.reshape(m, c_mid),
                                  w2_ref[kh, kw, :, :],
                                  preferred_element_type=jnp.float32)
    o_ref[...] = jnp.maximum(acc2 + b2_ref[...], 0.0).astype(o_ref.dtype)


def conv_stack_pallas(conv_in_pad, w1, b1, w2, b2):
    """conv_in_pad: (2, n, h+2p, w+2p, c_in); w/b stacked over the branch axis."""
    nb, n, hp, wp, c_in = conv_in_pad.shape
    k = w1.shape[1]
    c_mid = w1.shape[-1]
    c_out = w2.shape[-1]
    pad = k // 2
    h, w = hp - 2 * pad, wp - 2 * pad
    m = n * h * w

    flops = nb * 2 * m * k * k * (c_in * c_mid + c_mid * c_out)
    bytes_accessed = 4 * (conv_in_pad.size + w1.size + b1.size + w2.size
                          + b2.size + nb * m * c_out)

    return pl.pallas_call(
        _conv_stack_kernel,
        out_shape=jax.ShapeDtypeStruct((nb, m, c_out), jnp.float32),
        grid_spec=pltpu.PrefetchScalarGridSpec(
            num_scalar_prefetch=0,
            grid=(nb,),
            in_specs=[
                pl.BlockSpec((None, n, hp, wp, c_in), lambda b: (b, 0, 0, 0, 0)),
                pl.BlockSpec((None, k, k, c_in, c_mid), lambda b: (b, 0, 0, 0, 0)),
                pl.BlockSpec((None, 1, c_mid), lambda b: (b, 0, 0)),
                pl.BlockSpec((None, k, k, c_mid, c_out), lambda b: (b, 0, 0, 0, 0)),
                pl.BlockSpec((None, 1, c_out), lambda b: (b, 0, 0)),
            ],
            out_specs=pl.BlockSpec((None, m, c_out), lambda b: (b, 0, 0)),
            scratch_shapes=[pltpu.VMEM((n, hp, wp, c_mid), jnp.float32)],
        ),
        compiler_params=pltpu.CompilerParams(
            dimension_semantics=("parallel",)),
        cost_estimate=pl.CostEstimate(flops=flops, transcendentals=0,
                                      bytes_accessed=bytes_accessed),
    )(conv_in_pad, w1, b1, w2, b2)


# --------------------------------------------------------------------------
# Kernel 2: fused MLP  (Linear+ReLU, Linear+ReLU, Linear)  — one launch
# --------------------------------------------------------------------------
def _mlp_kernel(x_ref, w1_ref, b1_ref, w2_ref, b2_ref, wo_ref, bo_ref, o_ref):
    h1 = jnp.dot(x_ref[...], w1_ref[...], preferred_element_type=jnp.float32)
    h1 = jnp.maximum(h1 + b1_ref[...], 0.0)
    h2 = jnp.dot(h1, w2_ref[...], preferred_element_type=jnp.float32)
    h2 = jnp.maximum(h2 + b2_ref[...], 0.0)
    out = jnp.dot(h2, wo_ref[...], preferred_element_type=jnp.float32) + bo_ref[...]
    o_ref[...] = out.astype(o_ref.dtype)


def mlp_pallas(x, w1, b1, w2, b2, wo, bo):
    m = x.shape[0]
    n_out = wo.shape[-1]
    flops = 2 * m * (w1.shape[0] * w1.shape[1] + w2.shape[0] * w2.shape[1]
                     + wo.shape[0] * wo.shape[1])
    bytes_accessed = 4 * (x.size + w1.size + b1.size + w2.size + b2.size
                          + wo.size + bo.size + m * n_out)
    # No grid: every operand is a single full-array VMEM block.
    return pl.pallas_call(
        _mlp_kernel,
        out_shape=jax.ShapeDtypeStruct((m, n_out), jnp.float32),
        cost_estimate=pl.CostEstimate(flops=flops, transcendentals=0,
                                      bytes_accessed=bytes_accessed),
    )(x, w1, b1, w2, b2, wo, bo)


# --------------------------------------------------------------------------
# Parameter init (deterministic) + NCHW->NHWC flatten fold into W_hidden[0]
# --------------------------------------------------------------------------
def init_params(key, p: Params, map_size, states_dim, num_actions):
    # Kernels are specialized to the module's configuration (2 conv layers,
    # 2 hidden layers), matching the spec's Params.
    assert p.conv_layers == 2 and p.hidden_layer_num == 2
    cin, ck, K = p.in_channels, p.conv_kernels, p.conv_kernel_size
    gh = map_size // p.global_map_scaling
    lh = p.local_map_size
    feat_g = gh * gh * ck
    feat_l = lh * lh * ck
    in_features = feat_g + feat_l + states_dim          # lazily sized in PyTorch

    keys = jax.random.split(key, 7)
    it = iter(keys)

    def lin(k_, fi, fo, scale=0.05):
        k1, k2 = jax.random.split(k_)
        return (jax.random.normal(k1, (fi, fo), jnp.float32) * scale,
                jax.random.normal(k2, (fo,), jnp.float32) * 0.01)

    def conv(k_, ci, co, scale=0.1):
        k1, k2 = jax.random.split(k_)
        return (jax.random.normal(k1, (K, K, ci, co), jnp.float32) * scale,
                jax.random.normal(k2, (co,), jnp.float32) * 0.01)

    gw1, gb1 = conv(next(it), cin, ck)
    gw2, gb2 = conv(next(it), ck, ck)
    lw1, lb1 = conv(next(it), cin, ck)
    lw2, lb2 = conv(next(it), ck, ck)

    w1, b1 = lin(next(it), in_features, p.hidden_layer_size)
    w2, b2 = lin(next(it), p.hidden_layer_size, p.hidden_layer_size)
    wo, bo = lin(next(it), p.hidden_layer_size, num_actions)

    # Fold PyTorch's NCHW (c, h, w) flatten row order of the first hidden layer
    # into NHWC (h, w, c) order, so the forward pass never transposes.
    def nchw_rows_to_nhwc(wb, C, HH, WW):
        return (wb.reshape(C, HH * WW, wb.shape[-1])
                  .transpose(1, 0, 2).reshape(C * HH * WW, wb.shape[-1]))

    w1 = jnp.concatenate([
        nchw_rows_to_nhwc(w1[:feat_g], ck, gh, gh),
        nchw_rows_to_nhwc(w1[feat_g:feat_g + feat_l], ck, lh, lh),
        w1[feat_g + feat_l:],
    ], axis=0)

    return {
        # conv weights stacked along the branch axis: [global, local]
        "conv_w1": jnp.stack([gw1, lw1], axis=0),            # (2, K, K, cin, ck)
        "conv_b1": jnp.stack([gb1, lb1], axis=0).reshape(2, 1, ck),
        "conv_w2": jnp.stack([gw2, lw2], axis=0),            # (2, K, K, ck, ck)
        "conv_b2": jnp.stack([gb2, lb2], axis=0).reshape(2, 1, ck),
        "w1": w1, "b1": b1.reshape(1, -1),
        "w2": w2, "b2": b2.reshape(1, -1),
        "wo": wo, "bo": bo.reshape(1, -1),
    }


# --------------------------------------------------------------------------
# Forward pass (mirrors Relative_Scalars_Model.forward)
# --------------------------------------------------------------------------
def relative_scalars_forward(params, boolean_map, float_map, states_proc, *, p):
    n = boolean_map.shape[0]
    s = p.global_map_scaling
    k = p.conv_kernel_size
    pad = k // 2

    # --- Total_Map_Model: cast bool -> f32, channel concat (NCHW) -> NHWC ---
    total_map = jnp.concatenate(
        [boolean_map.astype(jnp.float32), float_map], axis=1)      # (n, C, H, W)
    x = jnp.transpose(total_map, (0, 2, 3, 1))                     # (n, H, W, C)
    _, hh, ww, _ = x.shape

    # --- Global branch input: AvgPool2d(scaling) ---
    g_in = x.reshape(n, hh // s, s, ww // s, s, x.shape[-1]).mean(axis=(2, 4))

    # --- Local branch input: CenterCrop(local_map_size) (torchvision rounding) ---
    crop = int(round(hh * (float(p.local_map_size) / float(hh))))
    top = int(round((hh - crop) / 2.0))
    left = int(round((ww - crop) / 2.0))
    l_in = x[:, top:top + crop, left:left + crop, :]

    gh, gw = g_in.shape[1], g_in.shape[2]
    assert (gh, gw) == (l_in.shape[1], l_in.shape[2]), \
        "global/local branches are fused into one kernel; spatial sizes must match"

    # --- stack branches, zero-pad once, run the fused conv stack kernel ---
    conv_in = jnp.stack([g_in, l_in], axis=0)                      # (2, n, 8, 8, C)
    conv_in = jnp.pad(conv_in, ((0, 0), (0, 0), (pad, pad), (pad, pad), (0, 0)))
    feats = conv_stack_pallas(conv_in, params["conv_w1"], params["conv_b1"],
                              params["conv_w2"], params["conv_b2"])  # (2, n*64, 8)

    # --- flatten (NHWC order; W1 rows were permuted at init to preserve
    #     the PyTorch NCHW-flatten semantics) + concat with state scalars ---
    feat_dim = gh * gw * params["conv_w2"].shape[-1]
    g_flat = feats[0].reshape(n, feat_dim)
    l_flat = feats[1].reshape(n, feat_dim)
    layer = jnp.concatenate([g_flat, l_flat, states_proc], axis=1)  # (n, 1028)

    # --- fused hidden MLP + output layer in a single Pallas call ---
    return mlp_pallas(layer, params["w1"], params["b1"], params["w2"],
                      params["b2"], params["wo"], params["bo"])


# --------------------------------------------------------------------------
if __name__ == "__main__":
    p = Params()

    key = jax.random.PRNGKey(0)
    k_bool, k_float, k_state, k_param = jax.random.split(key, 4)

    boolean_map = jax.random.bernoulli(k_bool, 0.5, (BATCH, BOOL_CH, H, W))
    float_map = jax.random.normal(k_float, (BATCH, FLOAT_CH, H, W), jnp.float32)
    states_proc = jax.random.normal(k_state, (BATCH, STATES_DIM), jnp.float32)

    params = init_params(k_param, p, H, STATES_DIM, NUM_ACTIONS)

    fwd = jax.jit(functools.partial(relative_scalars_forward, p=p))
    out = fwd(params, boolean_map, float_map, states_proc)
    out = jax.block_until_ready(out)

    assert out.shape == (BATCH, NUM_ACTIONS), out.shape
    assert out.dtype == jnp.float32
    assert bool(jnp.all(jnp.isfinite(out)))
    print("KERNEL_OK")
</pallas_src>

<mosaic_0001>
module attributes {stable_mosaic.version = 11 : i64} {
  func.func @_conv_stack_kernel(%arg0: i32, %arg1: memref<1x2x10x10x4xf32, #tpu.memory_space<vmem>>, %arg2: memref<1x3x3x4x8xf32, #tpu.memory_space<vmem>>, %arg3: memref<1x1x8xf32, #tpu.memory_space<vmem>>, %arg4: memref<1x3x3x8x8xf32, #tpu.memory_space<vmem>>, %arg5: memref<1x1x8xf32, #tpu.memory_space<vmem>>, %arg6: memref<1x128x8xf32, #tpu.memory_space<vmem>>, %arg7: memref<2x10x10x8xf32, #tpu.memory_space<vmem>>) attributes {dimension_semantics = [#tpu.dimension_semantics<parallel>], iteration_bounds = array<i64: 2>, scalar_prefetch = 0 : i64, scratch_operands = 1 : i64, tpu.core_type = #tpu.core_type<tc>, window_params = [{transform_indices = @transform_0, window_bounds = array<i64: 1, 2, 10, 10, 4>}, {transform_indices = @transform_1, window_bounds = array<i64: 1, 3, 3, 4, 8>}, {transform_indices = @transform_2, window_bounds = array<i64: 1, 1, 8>}, {transform_indices = @transform_3, window_bounds = array<i64: 1, 3, 3, 8, 8>}, {transform_indices = @transform_4, window_bounds = array<i64: 1, 1, 8>}, {transform_indices = @transform_5, window_bounds = array<i64: 1, 128, 8>}]} {
    %cst = arith.constant 0.000000e+00 : f32
    %0 = vector.broadcast %cst : f32 to vector<128x8xf32>
    %c0 = arith.constant 0 : index
    %c0_0 = arith.constant 0 : index
    %c0_1 = arith.constant 0 : index
    %c0_2 = arith.constant 0 : index
    %c0_3 = arith.constant 0 : index
    %1 = vector.load %arg1[%c0, %c0_0, %c0_1, %c0_2, %c0_3] : memref<1x2x10x10x4xf32, #tpu.memory_space<vmem>>, vector<1x2x8x8x4xf32>
    %2 = vector.shape_cast %1 : vector<1x2x8x8x4xf32> to vector<2x8x8x4xf32>
    %3 = vector.shape_cast %2 : vector<2x8x8x4xf32> to vector<128x4xf32>
    %c0_4 = arith.constant 0 : index
    %c0_5 = arith.constant 0 : index
    %c0_6 = arith.constant 0 : index
    %c0_7 = arith.constant 0 : index
    %c0_8 = arith.constant 0 : index
    %4 = vector.load %arg2[%c0_4, %c0_5, %c0_6, %c0_7, %c0_8] : memref<1x3x3x4x8xf32, #tpu.memory_space<vmem>>, vector<1x1x1x4x8xf32>
    %5 = vector.shape_cast %4 : vector<1x1x1x4x8xf32> to vector<4x8xf32>
    %cst_9 = arith.constant dense<0.000000e+00> : vector<128x8xf32>
    %6 = tpu.matmul %3, %5, %cst_9 {dimension_numbers = #tpu.dot_dimension_numbers<[1], [0], [0], [1], [0, 0, 1, 1], [], []>} : vector<128x4xf32>, vector<4x8xf32>, vector<128x8xf32> -> vector<128x8xf32>
    %7 = arith.addf %0, %6 : vector<128x8xf32>
    %c0_10 = arith.constant 0 : index
    %c0_11 = arith.constant 0 : index
    %c0_12 = arith.constant 0 : index
    %c1 = arith.constant 1 : index
    %c0_13 = arith.constant 0 : index
    %8 = vector.load %arg1[%c0_10, %c0_11, %c0_12, %c1, %c0_13] : memref<1x2x10x10x4xf32, #tpu.memory_space<vmem>>, vector<1x2x8x8x4xf32>
    %9 = vector.shape_cast %8 : vector<1x2x8x8x4xf32> to vector<2x8x8x4xf32>
    %10 = vector.shape_cast %9 : vector<2x8x8x4xf32> to vector<128x4xf32>
    %c0_14 = arith.constant 0 : index
    %c0_15 = arith.constant 0 : index
    %c1_16 = arith.constant 1 : index
    %c0_17 = arith.constant 0 : index
    %c0_18 = arith.constant 0 : index
    %11 = vector.load %arg2[%c0_14, %c0_15, %c1_16, %c0_17, %c0_18] : memref<1x3x3x4x8xf32, #tpu.memory_space<vmem>>, vector<1x1x1x4x8xf32>
    %12 = vector.shape_cast %11 : vector<1x1x1x4x8xf32> to vector<4x8xf32>
    %cst_19 = arith.constant dense<0.000000e+00> : vector<128x8xf32>
    %13 = tpu.matmul %10, %12, %cst_19 {dimension_numbers = #tpu.dot_dimension_numbers<[1], [0], [0], [1], [0, 0, 1, 1], [], []>} : vector<128x4xf32>, vector<4x8xf32>, vector<128x8xf32> -> vector<128x8xf32>
    %14 = arith.addf %7, %13 : vector<128x8xf32>
    %c0_20 = arith.constant 0 : index
    %c0_21 = arith.constant 0 : index
    %c0_22 = arith.constant 0 : index
    %c2 = arith.constant 2 : index
    %c0_23 = arith.constant 0 : index
    %15 = vector.load %arg1[%c0_20, %c0_21, %c0_22, %c2, %c0_23] : memref<1x2x10x10x4xf32, #tpu.memory_space<vmem>>, vector<1x2x8x8x4xf32>
    %16 = vector.shape_cast %15 : vector<1x2x8x8x4xf32> to vector<2x8x8x4xf32>
    %17 = vector.shape_cast %16 : vector<2x8x8x4xf32> to vector<128x4xf32>
    %c0_24 = arith.constant 0 : index
    %c0_25 = arith.constant 0 : index
    %c2_26 = arith.constant 2 : index
    %c0_27 = arith.constant 0 : index
    %c0_28 = arith.constant 0 : index
    %18 = vector.load %arg2[%c0_24, %c0_25, %c2_26, %c0_27, %c0_28] : memref<1x3x3x4x8xf32, #tpu.memory_space<vmem>>, vector<1x1x1x4x8xf32>
    %19 = vector.shape_cast %18 : vector<1x1x1x4x8xf32> to vector<4x8xf32>
    %cst_29 = arith.constant dense<0.000000e+00> : vector<128x8xf32>
    %20 = tpu.matmul %17, %19, %cst_29 {dimension_numbers = #tpu.dot_dimension_numbers<[1], [0], [0], [1], [0, 0, 1, 1], [], []>} : vector<128x4xf32>, vector<4x8xf32>, vector<128x8xf32> -> vector<128x8xf32>
    %21 = arith.addf %14, %20 : vector<128x8xf32>
    %c0_30 = arith.constant 0 : index
    %c0_31 = arith.constant 0 : index
    %c1_32 = arith.constant 1 : index
    %c0_33 = arith.constant 0 : index
    %c0_34 = arith.constant 0 : index
    %22 = vector.load %arg1[%c0_30, %c0_31, %c1_32, %c0_33, %c0_34] : memref<1x2x10x10x4xf32, #tpu.memory_space<vmem>>, vector<1x2x8x8x4xf32>
    %23 = vector.shape_cast %22 : vector<1x2x8x8x4xf32> to vector<2x8x8x4xf32>
    %24 = vector.shape_cast %23 : vector<2x8x8x4xf32> to vector<128x4xf32>
    %c0_35 = arith.constant 0 : index
    %c1_36 = arith.constant 1 : index
    %c0_37 = arith.constant 0 : index
    %c0_38 = arith.constant 0 : index
    %c0_39 = arith.constant 0 : index
    %25 = vector.load %arg2[%c0_35, %c1_36, %c0_37, %c0_38, %c0_39] : memref<1x3x3x4x8xf32, #tpu.memory_space<vmem>>, vector<1x1x1x4x8xf32>
    %26 = vector.shape_cast %25 : vector<1x1x1x4x8xf32> to vector<4x8xf32>
    %cst_40 = arith.constant dense<0.000000e+00> : vector<128x8xf32>
    %27 = tpu.matmul %24, %26, %cst_40 {dimension_numbers = #tpu.dot_dimension_numbers<[1], [0], [0], [1], [0, 0, 1, 1], [], []>} : vector<128x4xf32>, vector<4x8xf32>, vector<128x8xf32> -> vector<128x8xf32>
    %28 = arith.addf %21, %27 : vector<128x8xf32>
    %c0_41 = arith.constant 0 : index
    %c0_42 = arith.constant 0 : index
    %c1_43 = arith.constant 1 : index
    %c1_44 = arith.constant 1 : index
    %c0_45 = arith.constant 0 : index
    %29 = vector.load %arg1[%c0_41, %c0_42, %c1_43, %c1_44, %c0_45] : memref<1x2x10x10x4xf32, #tpu.memory_space<vmem>>, vector<1x2x8x8x4xf32>
    %30 = vector.shape_cast %29 : vector<1x2x8x8x4xf32> to vector<2x8x8x4xf32>
    %31 = vector.shape_cast %30 : vector<2x8x8x4xf32> to vector<128x4xf32>
    %c0_46 = arith.constant 0 : index
    %c1_47 = arith.constant 1 : index
    %c1_48 = arith.constant 1 : index
    %c0_49 = arith.constant 0 : index
    %c0_50 = arith.constant 0 : index
    %32 = vector.load %arg2[%c0_46, %c1_47, %c1_48, %c0_49, %c0_50] : memref<1x3x3x4x8xf32, #tpu.memory_space<vmem>>, vector<1x1x1x4x8xf32>
    %33 = vector.shape_cast %32 : vector<1x1x1x4x8xf32> to vector<4x8xf32>
    %cst_51 = arith.constant dense<0.000000e+00> : vector<128x8xf32>
    %34 = tpu.matmul %31, %33, %cst_51 {dimension_numbers = #tpu.dot_dimension_numbers<[1], [0], [0], [1], [0, 0, 1, 1], [], []>} : vector<128x4xf32>, vector<4x8xf32>, vector<128x8xf32> -> vector<128x8xf32>
    %35 = arith.addf %28, %34 : vector<128x8xf32>
    %c0_52 = arith.constant 0 : index
    %c0_53 = arith.constant 0 : index
    %c1_54 = arith.constant 1 : index
    %c2_55 = arith.constant 2 : index
    %c0_56 = arith.constant 0 : index
    %36 = vector.load %arg1[%c0_52, %c0_53, %c1_54, %c2_55, %c0_56] : memref<1x2x10x10x4xf32, #tpu.memory_space<vmem>>, vector<1x2x8x8x4xf32>
    %37 = vector.shape_cast %36 : vector<1x2x8x8x4xf32> to vector<2x8x8x4xf32>
    %38 = vector.shape_cast %37 : vector<2x8x8x4xf32> to vector<128x4xf32>
    %c0_57 = arith.constant 0 : index
    %c1_58 = arith.constant 1 : index
    %c2_59 = arith.constant 2 : index
    %c0_60 = arith.constant 0 : index
    %c0_61 = arith.constant 0 : index
    %39 = vector.load %arg2[%c0_57, %c1_58, %c2_59, %c0_60, %c0_61] : memref<1x3x3x4x8xf32, #tpu.memory_space<vmem>>, vector<1x1x1x4x8xf32>
    %40 = vector.shape_cast %39 : vector<1x1x1x4x8xf32> to vector<4x8xf32>
    %cst_62 = arith.constant dense<0.000000e+00> : vector<128x8xf32>
    %41 = tpu.matmul %38, %40, %cst_62 {dimension_numbers = #tpu.dot_dimension_numbers<[1], [0], [0], [1], [0, 0, 1, 1], [], []>} : vector<128x4xf32>, vector<4x8xf32>, vector<128x8xf32> -> vector<128x8xf32>
    %42 = arith.addf %35, %41 : vector<128x8xf32>
    %c0_63 = arith.constant 0 : index
    %c0_64 = arith.constant 0 : index
    %c2_65 = arith.constant 2 : index
    %c0_66 = arith.constant 0 : index
    %c0_67 = arith.constant 0 : index
    %43 = vector.load %arg1[%c0_63, %c0_64, %c2_65, %c0_66, %c0_67] : memref<1x2x10x10x4xf32, #tpu.memory_space<vmem>>, vector<1x2x8x8x4xf32>
    %44 = vector.shape_cast %43 : vector<1x2x8x8x4xf32> to vector<2x8x8x4xf32>
    %45 = vector.shape_cast %44 : vector<2x8x8x4xf32> to vector<128x4xf32>
    %c0_68 = arith.constant 0 : index
    %c2_69 = arith.constant 2 : index
    %c0_70 = arith.constant 0 : index
    %c0_71 = arith.constant 0 : index
    %c0_72 = arith.constant 0 : index
    %46 = vector.load %arg2[%c0_68, %c2_69, %c0_70, %c0_71, %c0_72] : memref<1x3x3x4x8xf32, #tpu.memory_space<vmem>>, vector<1x1x1x4x8xf32>
    %47 = vector.shape_cast %46 : vector<1x1x1x4x8xf32> to vector<4x8xf32>
    %cst_73 = arith.constant dense<0.000000e+00> : vector<128x8xf32>
    %48 = tpu.matmul %45, %47, %cst_73 {dimension_numbers = #tpu.dot_dimension_numbers<[1], [0], [0], [1], [0, 0, 1, 1], [], []>} : vector<128x4xf32>, vector<4x8xf32>, vector<128x8xf32> -> vector<128x8xf32>
    %49 = arith.addf %42, %48 : vector<128x8xf32>
    %c0_74 = arith.constant 0 : index
    %c0_75 = arith.constant 0 : index
    %c2_76 = arith.constant 2 : index
    %c1_77 = arith.constant 1 : index
    %c0_78 = arith.constant 0 : index
    %50 = vector.load %arg1[%c0_74, %c0_75, %c2_76, %c1_77, %c0_78] : memref<1x2x10x10x4xf32, #tpu.memory_space<vmem>>, vector<1x2x8x8x4xf32>
    %51 = vector.shape_cast %50 : vector<1x2x8x8x4xf32> to vector<2x8x8x4xf32>
    %52 = vector.shape_cast %51 : vector<2x8x8x4xf32> to vector<128x4xf32>
    %c0_79 = arith.constant 0 : index
    %c2_80 = arith.constant 2 : index
    %c1_81 = arith.constant 1 : index
    %c0_82 = arith.constant 0 : index
    %c0_83 = arith.constant 0 : index
    %53 = vector.load %arg2[%c0_79, %c2_80, %c1_81, %c0_82, %c0_83] : memref<1x3x3x4x8xf32, #tpu.memory_space<vmem>>, vector<1x1x1x4x8xf32>
    %54 = vector.shape_cast %53 : vector<1x1x1x4x8xf32> to vector<4x8xf32>
    %cst_84 = arith.constant dense<0.000000e+00> : vector<128x8xf32>
    %55 = tpu.matmul %52, %54, %cst_84 {dimension_numbers = #tpu.dot_dimension_numbers<[1], [0], [0], [1], [0, 0, 1, 1], [], []>} : vector<128x4xf32>, vector<4x8xf32>, vector<128x8xf32> -> vector<128x8xf32>
    %56 = arith.addf %49, %55 : vector<128x8xf32>
    %c0_85 = arith.constant 0 : index
    %c0_86 = arith.constant 0 : index
    %c2_87 = arith.constant 2 : index
    %c2_88 = arith.constant 2 : index
    %c0_89 = arith.constant 0 : index
    %57 = vector.load %arg1[%c0_85, %c0_86, %c2_87, %c2_88, %c0_89] : memref<1x2x10x10x4xf32, #tpu.memory_space<vmem>>, vector<1x2x8x8x4xf32>
    %58 = vector.shape_cast %57 : vector<1x2x8x8x4xf32> to vector<2x8x8x4xf32>
    %59 = vector.shape_cast %58 : vector<2x8x8x4xf32> to vector<128x4xf32>
    %c0_90 = arith.constant 0 : index
    %c2_91 = arith.constant 2 : index
    %c2_92 = arith.constant 2 : index
    %c0_93 = arith.constant 0 : index
    %c0_94 = arith.constant 0 : index
    %60 = vector.load %arg2[%c0_90, %c2_91, %c2_92, %c0_93, %c0_94] : memref<1x3x3x4x8xf32, #tpu.memory_space<vmem>>, vector<1x1x1x4x8xf32>
    %61 = vector.shape_cast %60 : vector<1x1x1x4x8xf32> to vector<4x8xf32>
    %cst_95 = arith.constant dense<0.000000e+00> : vector<128x8xf32>
    %62 = tpu.matmul %59, %61, %cst_95 {dimension_numbers = #tpu.dot_dimension_numbers<[1], [0], [0], [1], [0, 0, 1, 1], [], []>} : vector<128x4xf32>, vector<4x8xf32>, vector<128x8xf32> -> vector<128x8xf32>
    %63 = arith.addf %56, %62 : vector<128x8xf32>
    %c0_96 = arith.constant 0 : index
    %c0_97 = arith.constant 0 : index
    %c0_98 = arith.constant 0 : index
    %64 = vector.load %arg3[%c0_96, %c0_97, %c0_98] : memref<1x1x8xf32, #tpu.memory_space<vmem>>, vector<1x1x8xf32>
    %65 = vector.shape_cast %64 : vector<1x1x8xf32> to vector<1x8xf32>
    %66 = vector.broadcast %65 : vector<1x8xf32> to vector<128x8xf32>
    %67 = arith.addf %63, %66 : vector<128x8xf32>
    %cst_99 = arith.constant 0.000000e+00 : f32
    %68 = vector.broadcast %cst_99 : f32 to vector<128x8xf32>
    %69 = arith.maximumf %67, %68 : vector<128x8xf32>
    %cst_100 = arith.constant 0.000000e+00 : f32
    %70 = vector.broadcast %cst_100 : f32 to vector<2x10x10x8xf32>
    %c0_101 = arith.constant 0 : index
    %c0_102 = arith.constant 0 : index
    %c0_103 = arith.constant 0 : index
    %c0_104 = arith.constant 0 : index
    %71 = vector.load %arg7[%c0_101, %c0_102, %c0_103, %c0_104] : memref<2x10x10x8xf32, #tpu.memory_space<vmem>>, vector<2x10x10x8xf32>
    tpu.vector_store %arg7[%c0_101, %c0_102, %c0_103, %c0_104], %70 {strides = array<i32>} : memref<2x10x10x8xf32, #tpu.memory_space<vmem>>, vector<2x10x10x8xf32>,
    %72 = vector.shape_cast %69 : vector<128x8xf32> to vector<2x8x8x8xf32>
    %c0_105 = arith.constant 0 : index
    %c1_106 = arith.constant 1 : index
    %c1_107 = arith.constant 1 : index
    %c0_108 = arith.constant 0 : index
    %73 = vector.load %arg7[%c0_105, %c1_106, %c1_107, %c0_108] : memref<2x10x10x8xf32, #tpu.memory_space<vmem>>, vector<2x8x8x8xf32>
    tpu.vector_store %arg7[%c0_105, %c1_106, %c1_107, %c0_108], %72 {strides = array<i32>} : memref<2x10x10x8xf32, #tpu.memory_space<vmem>>, vector<2x8x8x8xf32>,
    %cst_109 = arith.constant 0.000000e+00 : f32
    %74 = vector.broadcast %cst_109 : f32 to vector<128x8xf32>
    %c0_110 = arith.constant 0 : index
    %c0_111 = arith.constant 0 : index
    %c0_112 = arith.constant 0 : index
    %c0_113 = arith.constant 0 : index
    %75 = vector.load %arg7[%c0_110, %c0_111, %c0_112, %c0_113] : memref<2x10x10x8xf32, #tpu.memory_space<vmem>>, vector<2x8x8x8xf32>
    %76 = vector.shape_cast %75 : vector<2x8x8x8xf32> to vector<128x8xf32>
    %c0_114 = arith.constant 0 : index
    %c0_115 = arith.constant 0 : index
    %c0_116 = arith.constant 0 : index
    %c0_117 = arith.constant 0 : index
    %c0_118 = arith.constant 0 : index
    %77 = vector.load %arg4[%c0_114, %c0_115, %c0_116, %c0_117, %c0_118] : memref<1x3x3x8x8xf32, #tpu.memory_space<vmem>>, vector<1x1x1x8x8xf32>
    %78 = vector.shape_cast %77 : vector<1x1x1x8x8xf32> to vector<8x8xf32>
    %cst_119 = arith.constant dense<0.000000e+00> : vector<128x8xf32>
    %79 = tpu.matmul %76, %78, %cst_119 {dimension_numbers = #tpu.dot_dimension_numbers<[1], [0], [0], [1], [0, 0, 1, 1], [], []>} : vector<128x8xf32>, vector<8x8xf32>, vector<128x8xf32> -> vector<128x8xf32>
    %80 = arith.addf %74, %79 : vector<128x8xf32>
    %c0_120 = arith.constant 0 : index
    %c0_121 = arith.constant 0 : index
    %c1_122 = arith.constant 1 : index
    %c0_123 = arith.constant 0 : index
    %81 = vector.load %arg7[%c0_120, %c0_121, %c1_122, %c0_123] : memref<2x10x10x8xf32, #tpu.memory_space<vmem>>, vector<2x8x8x8xf32>
    %82 = vector.shape_cast %81 : vector<2x8x8x8xf32> to vector<128x8xf32>
    %c0_124 = arith.constant 0 : index
    %c0_125 = arith.constant 0 : index
    %c1_126 = arith.constant 1 : index
    %c0_127 = arith.constant 0 : index
    %c0_128 = arith.constant 0 : index
    %83 = vector.load %arg4[%c0_124, %c0_125, %c1_126, %c0_127, %c0_128] : memref<1x3x3x8x8xf32, #tpu.memory_space<vmem>>, vector<1x1x1x8x8xf32>
    %84 = vector.shape_cast %83 : vector<1x1x1x8x8xf32> to vector<8x8xf32>
    %cst_129 = arith.constant dense<0.000000e+00> : vector<128x8xf32>
    %85 = tpu.matmul %82, %84, %cst_129 {dimension_numbers = #tpu.dot_dimension_numbers<[1], [0], [0], [1], [0, 0, 1, 1], [], []>} : vector<128x8xf32>, vector<8x8xf32>, vector<128x8xf32> -> vector<128x8xf32>
    %86 = arith.addf %80, %85 : vector<128x8xf32>
    %c0_130 = arith.constant 0 : index
    %c0_131 = arith.constant 0 : index
    %c2_132 = arith.constant 2 : index
    %c0_133 = arith.constant 0 : index
    %87 = vector.load %arg7[%c0_130, %c0_131, %c2_132, %c0_133] : memref<2x10x10x8xf32, #tpu.memory_space<vmem>>, vector<2x8x8x8xf32>
    %88 = vector.shape_cast %87 : vector<2x8x8x8xf32> to vector<128x8xf32>
    %c0_134 = arith.constant 0 : index
    %c0_135 = arith.constant 0 : index
    %c2_136 = arith.constant 2 : index
    %c0_137 = arith.constant 0 : index
    %c0_138 = arith.constant 0 : index
    %89 = vector.load %arg4[%c0_134, %c0_135, %c2_136, %c0_137, %c0_138] : memref<1x3x3x8x8xf32, #tpu.memory_space<vmem>>, vector<1x1x1x8x8xf32>
    %90 = vector.shape_cast %89 : vector<1x1x1x8x8xf32> to vector<8x8xf32>
    %cst_139 = arith.constant dense<0.000000e+00> : vector<128x8xf32>
    %91 = tpu.matmul %88, %90, %cst_139 {dimension_numbers = #tpu.dot_dimension_numbers<[1], [0], [0], [1], [0, 0, 1, 1], [], []>} : vector<128x8xf32>, vector<8x8xf32>, vector<128x8xf32> -> vector<128x8xf32>
    %92 = arith.addf %86, %91 : vector<128x8xf32>
    %c0_140 = arith.constant 0 : index
    %c1_141 = arith.constant 1 : index
    %c0_142 = arith.constant 0 : index
    %c0_143 = arith.constant 0 : index
    %93 = vector.load %arg7[%c0_140, %c1_141, %c0_142, %c0_143] : memref<2x10x10x8xf32, #tpu.memory_space<vmem>>, vector<2x8x8x8xf32>
    %94 = vector.shape_cast %93 : vector<2x8x8x8xf32> to vector<128x8xf32>
    %c0_144 = arith.constant 0 : index
    %c1_145 = arith.constant 1 : index
    %c0_146 = arith.constant 0 : index
    %c0_147 = arith.constant 0 : index
    %c0_148 = arith.constant 0 : index
    %95 = vector.load %arg4[%c0_144, %c1_145, %c0_146, %c0_147, %c0_148] : memref<1x3x3x8x8xf32, #tpu.memory_space<vmem>>, vector<1x1x1x8x8xf32>
    %96 = vector.shape_cast %95 : vector<1x1x1x8x8xf32> to vector<8x8xf32>
    %cst_149 = arith.constant dense<0.000000e+00> : vector<128x8xf32>
    %97 = tpu.matmul %94, %96, %cst_149 {dimension_numbers = #tpu.dot_dimension_numbers<[1], [0], [0], [1], [0, 0, 1, 1], [], []>} : vector<128x8xf32>, vector<8x8xf32>, vector<128x8xf32> -> vector<128x8xf32>
    %98 = arith.addf %92, %97 : vector<128x8xf32>
    %c0_150 = arith.constant 0 : index
    %c1_151 = arith.constant 1 : index
    %c1_152 = arith.constant 1 : index
    %c0_153 = arith.constant 0 : index
    %99 = vector.load %arg7[%c0_150, %c1_151, %c1_152, %c0_153] : memref<2x10x10x8xf32, #tpu.memory_space<vmem>>, vector<2x8x8x8xf32>
    %100 = vector.shape_cast %99 : vector<2x8x8x8xf32> to vector<128x8xf32>
    %c0_154 = arith.constant 0 : index
    %c1_155 = arith.constant 1 : index
    %c1_156 = arith.constant 1 : index
    %c0_157 = arith.constant 0 : index
    %c0_158 = arith.constant 0 : index
    %101 = vector.load %arg4[%c0_154, %c1_155, %c1_156, %c0_157, %c0_158] : memref<1x3x3x8x8xf32, #tpu.memory_space<vmem>>, vector<1x1x1x8x8xf32>
    %102 = vector.shape_cast %101 : vector<1x1x1x8x8xf32> to vector<8x8xf32>
    %cst_159 = arith.constant dense<0.000000e+00> : vector<128x8xf32>
    %103 = tpu.matmul %100, %102, %cst_159 {dimension_numbers = #tpu.dot_dimension_numbers<[1], [0], [0], [1], [0, 0, 1, 1], [], []>} : vector<128x8xf32>, vector<8x8xf32>, vector<128x8xf32> -> vector<128x8xf32>
    %104 = arith.addf %98, %103 : vector<128x8xf32>
    %c0_160 = arith.constant 0 : index
    %c1_161 = arith.constant 1 : index
    %c2_162 = arith.constant 2 : index
    %c0_163 = arith.constant 0 : index
    %105 = vector.load %arg7[%c0_160, %c1_161, %c2_162, %c0_163] : memref<2x10x10x8xf32, #tpu.memory_space<vmem>>, vector<2x8x8x8xf32>
    %106 = vector.shape_cast %105 : vector<2x8x8x8xf32> to vector<128x8xf32>
    %c0_164 = arith.constant 0 : index
    %c1_165 = arith.constant 1 : index
    %c2_166 = arith.constant 2 : index
    %c0_167 = arith.constant 0 : index
    %c0_168 = arith.constant 0 : index
    %107 = vector.load %arg4[%c0_164, %c1_165, %c2_166, %c0_167, %c0_168] : memref<1x3x3x8x8xf32, #tpu.memory_space<vmem>>, vector<1x1x1x8x8xf32>
    %108 = vector.shape_cast %107 : vector<1x1x1x8x8xf32> to vector<8x8xf32>
    %cst_169 = arith.constant dense<0.000000e+00> : vector<128x8xf32>
    %109 = tpu.matmul %106, %108, %cst_169 {dimension_numbers = #tpu.dot_dimension_numbers<[1], [0], [0], [1], [0, 0, 1, 1], [], []>} : vector<128x8xf32>, vector<8x8xf32>, vector<128x8xf32> -> vector<128x8xf32>
    %110 = arith.addf %104, %109 : vector<128x8xf32>
    %c0_170 = arith.constant 0 : index
    %c2_171 = arith.constant 2 : index
    %c0_172 = arith.constant 0 : index
    %c0_173 = arith.constant 0 : index
    %111 = vector.load %arg7[%c0_170, %c2_171, %c0_172, %c0_173] : memref<2x10x10x8xf32, #tpu.memory_space<vmem>>, vector<2x8x8x8xf32>
    %112 = vector.shape_cast %111 : vector<2x8x8x8xf32> to vector<128x8xf32>
    %c0_174 = arith.constant 0 : index
    %c2_175 = arith.constant 2 : index
    %c0_176 = arith.constant 0 : index
    %c0_177 = arith.constant 0 : index
    %c0_178 = arith.constant 0 : index
    %113 = vector.load %arg4[%c0_174, %c2_175, %c0_176, %c0_177, %c0_178] : memref<1x3x3x8x8xf32, #tpu.memory_space<vmem>>, vector<1x1x1x8x8xf32>
    %114 = vector.shape_cast %113 : vector<1x1x1x8x8xf32> to vector<8x8xf32>
    %cst_179 = arith.constant dense<0.000000e+00> : vector<128x8xf32>
    %115 = tpu.matmul %112, %114, %cst_179 {dimension_numbers = #tpu.dot_dimension_numbers<[1], [0], [0], [1], [0, 0, 1, 1], [], []>} : vector<128x8xf32>, vector<8x8xf32>, vector<128x8xf32> -> vector<128x8xf32>
    %116 = arith.addf %110, %115 : vector<128x8xf32>
    %c0_180 = arith.constant 0 : index
    %c2_181 = arith.constant 2 : index
    %c1_182 = arith.constant 1 : index
    %c0_183 = arith.constant 0 : index
    %117 = vector.load %arg7[%c0_180, %c2_181, %c1_182, %c0_183] : memref<2x10x10x8xf32, #tpu.memory_space<vmem>>, vector<2x8x8x8xf32>
    %118 = vector.shape_cast %117 : vector<2x8x8x8xf32> to vector<128x8xf32>
    %c0_184 = arith.constant 0 : index
    %c2_185 = arith.constant 2 : index
    %c1_186 = arith.constant 1 : index
    %c0_187 = arith.constant 0 : index
    %c0_188 = arith.constant 0 : index
    %119 = vector.load %arg4[%c0_184, %c2_185, %c1_186, %c0_187, %c0_188] : memref<1x3x3x8x8xf32, #tpu.memory_space<vmem>>, vector<1x1x1x8x8xf32>
    %120 = vector.shape_cast %119 : vector<1x1x1x8x8xf32> to vector<8x8xf32>
    %cst_189 = arith.constant dense<0.000000e+00> : vector<128x8xf32>
    %121 = tpu.matmul %118, %120, %cst_189 {dimension_numbers = #tpu.dot_dimension_numbers<[1], [0], [0], [1], [0, 0, 1, 1], [], []>} : vector<128x8xf32>, vector<8x8xf32>, vector<128x8xf32> -> vector<128x8xf32>
    %122 = arith.addf %116, %121 : vector<128x8xf32>
    %c0_190 = arith.constant 0 : index
    %c2_191 = arith.constant 2 : index
    %c2_192 = arith.constant 2 : index
    %c0_193 = arith.constant 0 : index
    %123 = vector.load %arg7[%c0_190, %c2_191, %c2_192, %c0_193] : memref<2x10x10x8xf32, #tpu.memory_space<vmem>>, vector<2x8x8x8xf32>
    %124 = vector.shape_cast %123 : vector<2x8x8x8xf32> to vector<128x8xf32>
    %c0_194 = arith.constant 0 : index
    %c2_195 = arith.constant 2 : index
    %c2_196 = arith.constant 2 : index
    %c0_197 = arith.constant 0 : index
    %c0_198 = arith.constant 0 : index
    %125 = vector.load %arg4[%c0_194, %c2_195, %c2_196, %c0_197, %c0_198] : memref<1x3x3x8x8xf32, #tpu.memory_space<vmem>>, vector<1x1x1x8x8xf32>
    %126 = vector.shape_cast %125 : vector<1x1x1x8x8xf32> to vector<8x8xf32>
    %cst_199 = arith.constant dense<0.000000e+00> : vector<128x8xf32>
    %127 = tpu.matmul %124, %126, %cst_199 {dimension_numbers = #tpu.dot_dimension_numbers<[1], [0], [0], [1], [0, 0, 1, 1], [], []>} : vector<128x8xf32>, vector<8x8xf32>, vector<128x8xf32> -> vector<128x8xf32>
    %128 = arith.addf %122, %127 : vector<128x8xf32>
    %c0_200 = arith.constant 0 : index
    %c0_201 = arith.constant 0 : index
    %c0_202 = arith.constant 0 : index
    %129 = vector.load %arg5[%c0_200, %c0_201, %c0_202] : memref<1x1x8xf32, #tpu.memory_space<vmem>>, vector<1x1x8xf32>
    %130 = vector.shape_cast %129 : vector<1x1x8xf32> to vector<1x8xf32>
    %131 = vector.broadcast %130 : vector<1x8xf32> to vector<128x8xf32>
    %132 = arith.addf %128, %131 : vector<128x8xf32>
    %cst_203 = arith.constant 0.000000e+00 : f32
    %133 = vector.broadcast %cst_203 : f32 to vector<128x8xf32>
    %134 = arith.maximumf %132, %133 : vector<128x8xf32>
    %c0_204 = arith.constant 0 : index
    %c0_205 = arith.constant 0 : index
    %c0_206 = arith.constant 0 : index
    %135 = vector.load %arg6[%c0_204, %c0_205, %c0_206] : memref<1x128x8xf32, #tpu.memory_space<vmem>>, vector<1x128x8xf32>
    %136 = vector.shape_cast %135 : vector<1x128x8xf32> to vector<128x8xf32>
    %137 = vector.shape_cast %134 : vector<128x8xf32> to vector<1x128x8xf32>
    tpu.vector_store %arg6[%c0_204, %c0_205, %c0_206], %137 {strides = array<i32>} : memref<1x128x8xf32, #tpu.memory_space<vmem>>, vector<1x128x8xf32>,
    return
  }
  func.func @transform_0(%arg0: i32) -> (i32, i32, i32, i32, i32) {
    %c0_i32 = arith.constant 0 : i32
    %c0_i32_0 = arith.constant 0 : i32
    %c0_i32_1 = arith.constant 0 : i32
    %c0_i32_2 = arith.constant 0 : i32
    %c0_i32_3 = arith.constant 0 : i32
    return %arg0, %c0_i32, %c0_i32_0, %c0_i32_1, %c0_i32_2 : i32, i32, i32, i32, i32
  }
  func.func @transform_1(%arg0: i32) -> (i32, i32, i32, i32, i32) {
    %c0_i32 = arith.constant 0 : i32
    %c0_i32_0 = arith.constant 0 : i32
    %c0_i32_1 = arith.constant 0 : i32
    %c0_i32_2 = arith.constant 0 : i32
    %c0_i32_3 = arith.constant 0 : i32
    return %arg0, %c0_i32, %c0_i32_0, %c0_i32_1, %c0_i32_2 : i32, i32, i32, i32, i32
  }
  func.func @transform_2(%arg0: i32) -> (i32, i32, i32) {
    %c0_i32 = arith.constant 0 : i32
    %c0_i32_0 = arith.constant 0 : i32
    %c0_i32_1 = arith.constant 0 : i32
    return %arg0, %c0_i32, %c0_i32_0 : i32, i32, i32
  }
  func.func @transform_3(%arg0: i32) -> (i32, i32, i32, i32, i32) {
    %c0_i32 = arith.constant 0 : i32
    %c0_i32_0 = arith.constant 0 : i32
    %c0_i32_1 = arith.constant 0 : i32
    %c0_i32_2 = arith.constant 0 : i32
    %c0_i32_3 = arith.constant 0 : i32
    return %arg0, %c0_i32, %c0_i32_0, %c0_i32_1, %c0_i32_2 : i32, i32, i32, i32, i32
  }
  func.func @transform_4(%arg0: i32) -> (i32, i32, i32) {
    %c0_i32 = arith.constant 0 : i32
    %c0_i32_0 = arith.constant 0 : i32
    %c0_i32_1 = arith.constant 0 : i32
    return %arg0, %c0_i32, %c0_i32_0 : i32, i32, i32
  }
  func.func @transform_5(%arg0: i32) -> (i32, i32, i32) {
    %c0_i32 = arith.constant 0 : i32
    %c0_i32_0 = arith.constant 0 : i32
    %c0_i32_1 = arith.constant 0 : i32
    return %arg0, %c0_i32, %c0_i32_0 : i32, i32, i32
  }
}

module attributes {stable_mosaic.version = 11 : i64} {
  func.func @_mlp_kernel(%arg0: memref<2x1028xf32, #tpu.memory_space<vmem>>, %arg1: memref<1028x32xf32, #tpu.memory_space<vmem>>, %arg2: memref<1x32xf32, #tpu.memory_space<vmem>>, %arg3: memref<32x32xf32, #tpu.memory_space<vmem>>, %arg4: memref<1x32xf32, #tpu.memory_space<vmem>>, %arg5: memref<32x4xf32, #tpu.memory_space<vmem>>, %arg6: memref<1x4xf32, #tpu.memory_space<vmem>>, %arg7: memref<2x4xf32, #tpu.memory_space<vmem>>) attributes {dimension_semantics = [], scalar_prefetch = 0 : i64, scratch_operands = 0 : i64, tpu.core_type = #tpu.core_type<tc>} {
    %c0 = arith.constant 0 : index
    %c0_0 = arith.constant 0 : index
    %0 = vector.load %arg0[%c0, %c0_0] : memref<2x1028xf32, #tpu.memory_space<vmem>>, vector<2x1028xf32>
    %c0_1 = arith.constant 0 : index
    %c0_2 = arith.constant 0 : index
    %1 = vector.load %arg1[%c0_1, %c0_2] : memref<1028x32xf32, #tpu.memory_space<vmem>>, vector<1028x32xf32>
    %cst = arith.constant dense<0.000000e+00> : vector<2x32xf32>
    %2 = tpu.matmul %0, %1, %cst {dimension_numbers = #tpu.dot_dimension_numbers<[1], [0], [0], [1], [0, 0, 1, 1], [], []>} : vector<2x1028xf32>, vector<1028x32xf32>, vector<2x32xf32> -> vector<2x32xf32>
    %c0_3 = arith.constant 0 : index
    %c0_4 = arith.constant 0 : index
    %3 = vector.load %arg2[%c0_3, %c0_4] : memref<1x32xf32, #tpu.memory_space<vmem>>, vector<1x32xf32>
    %4 = vector.broadcast %3 : vector<1x32xf32> to vector<2x32xf32>
    %5 = arith.addf %2, %4 : vector<2x32xf32>
    %cst_5 = arith.constant 0.000000e+00 : f32
    %6 = vector.broadcast %cst_5 : f32 to vector<2x32xf32>
    %7 = arith.maximumf %5, %6 : vector<2x32xf32>
    %c0_6 = arith.constant 0 : index
    %c0_7 = arith.constant 0 : index
    %8 = vector.load %arg3[%c0_6, %c0_7] : memref<32x32xf32, #tpu.memory_space<vmem>>, vector<32x32xf32>
    %cst_8 = arith.constant dense<0.000000e+00> : vector<2x32xf32>
    %9 = tpu.matmul %7, %8, %cst_8 {dimension_numbers = #tpu.dot_dimension_numbers<[1], [0], [0], [1], [0, 0, 1, 1], [], []>} : vector<2x32xf32>, vector<32x32xf32>, vector<2x32xf32> -> vector<2x32xf32>
    %c0_9 = arith.constant 0 : index
    %c0_10 = arith.constant 0 : index
    %10 = vector.load %arg4[%c0_9, %c0_10] : memref<1x32xf32, #tpu.memory_space<vmem>>, vector<1x32xf32>
    %11 = vector.broadcast %10 : vector<1x32xf32> to vector<2x32xf32>
    %12 = arith.addf %9, %11 : vector<2x32xf32>
    %cst_11 = arith.constant 0.000000e+00 : f32
    %13 = vector.broadcast %cst_11 : f32 to vector<2x32xf32>
    %14 = arith.maximumf %12, %13 : vector<2x32xf32>
    %c0_12 = arith.constant 0 : index
    %c0_13 = arith.constant 0 : index
    %15 = vector.load %arg5[%c0_12, %c0_13] : memref<32x4xf32, #tpu.memory_space<vmem>>, vector<32x4xf32>
    %cst_14 = arith.constant dense<0.000000e+00> : vector<2x4xf32>
    %16 = tpu.matmul %14, %15, %cst_14 {dimension_numbers = #tpu.dot_dimension_numbers<[1], [0], [0], [1], [0, 0, 1, 1], [], []>} : vector<2x32xf32>, vector<32x4xf32>, vector<2x4xf32> -> vector<2x4xf32>
    %c0_15 = arith.constant 0 : index
    %c0_16 = arith.constant 0 : index
    %17 = vector.load %arg6[%c0_15, %c0_16] : memref<1x4xf32, #tpu.memory_space<vmem>>, vector<1x4xf32>
    %18 = vector.broadcast %17 : vector<1x4xf32> to vector<2x4xf32>
    %19 = arith.addf %16, %18 : vector<2x4xf32>
    %c0_17 = arith.constant 0 : index
    %c0_18 = arith.constant 0 : index
    %20 = vector.load %arg7[%c0_17, %c0_18] : memref<2x4xf32, #tpu.memory_space<vmem>>, vector<2x4xf32>
    tpu.vector_store %arg7[%c0_17, %c0_18], %19 {strides = array<i32>} : memref<2x4xf32, #tpu.memory_space<vmem>>, vector<2x4xf32>,
    return
  }
}

</mosaic_0001>

<bundles_post_ra>
// kernel: squeeze.2
= control target key start
LH: loop header
LB: loop body
LE: loop exit
PB: predicated region body
PF: predicated region fallthrough
CT: control target
= control target key end

     0   :  { %s23_s8 = smov 6  ;;  %vm25_vm0 = vcmask 1042433   ;;  %s28_s9 = smov 24  ;;  %vm30_vm1 = vcmask 1044483   ;;  %vm35_vm2 = vcmask 1046533   ;;  %vm39_vm3 = vcmask 1047559   ;;  %s942_s0 = inlined_call_operand.vmem [shape: f32[1,128,8], index: 0, kind: input, shape index: {}]   ;;  %s943_s1 = inlined_call_operand.vmem [shape: f32[2,512], index: 1, kind: output, shape index: {}]  }
   0x1   :  { %v515_v0 = vld [vmem:[%s942_s0 + $0xf] sm:$0x1]   ;;  %s33_s14 = smov 96  ;;  %v519_v5 = vld [vmem:[%s942_s0 + $0x78] sm:$0x80]   ;;  %s85_s21 = smov 6 }
   0x2   :  { %v516_v1 = vld [vmem:[%s942_s0 + $0x7f] ss:$-48 sm:%s23_s8]   ;;  %v525_v7 = vld [vmem:[%s942_s0 + $0xd] sm:$0x1]   ;;  %s90_s22 = smov 24  ;;  %s95_s29 = smov 96 }
   0x3   :  { %v517_v2 = vld [vmem:[%s942_s0 + $0xef] ss:$-48 sm:%s28_s9]   ;;  %v26_v3 = vsel %vm25_vm0, %v516_v1, %v515_v0  ;;  %v529_v8 = vld [vmem:[%s942_s0 + $0x76] sm:$0x80]   ;;  %v520_v15 = vld [vmem:[%s942_s0 + $0xe] sm:$0x1]  }
   0x4   :  { %v518_v4 = vld [vmem:[%s942_s0 + $0x15f] ss:$-48 sm:%s33_s14]   ;;  %v31_v6 = vsel %vm30_vm1, %v517_v2, %v26_v3  ;;  %v526_v10 = vld [vmem:[%s942_s0 + $0x7d] ss:$-48 sm:%s85_s21]   ;;  %s54_s5 = smov 6  ;;  %s59_s6 = smov 24 }
   0x5   :  { %v36_v9 = vsel %vm35_vm2, %v518_v4, %v31_v6  ;;  %v527_v11 = vld [vmem:[%s942_s0 + $0xed] ss:$-48 sm:%s90_s22]   ;;  %v88_v13 = vsel %vm25_vm0, %v526_v10, %v525_v7  ;;  %s608_s7 = smov 120   ;;  %v521_v17 = vld [vmem:[%s942_s0 + $0x7e] ss:$-48 sm:%s54_s5]   ;;  %s64_s10 = smov 96 }
   0x6   :  { %v40_v12 = vsel %vm39_vm3, %v519_v5, %v36_v9  ;;  %v528_v14 = vld [vmem:[%s942_s0 + $0x15d] ss:$-48 sm:%s95_s29]   ;;  %v93_v16 = vsel %vm30_vm1, %v527_v11, %v88_v13  ;;  %v524_v18 = vld [vmem:[%s942_s0 + $0x77] sm:$0x80]   ;;  %v57_v20 = vsel %vm25_vm0, %v521_v17, %v520_v15  ;;  %s116_s17 = smov 6  ;;  %s121_s18 = smov 24 }
   0x7   :  { %41 = vrot.lane.b32.xlu0 %v40_v12, %s608_s7  ;;  %v98_v19 = vsel %vm35_vm2, %v528_v14, %v93_v16  ;;  %v522_v21 = vld [vmem:[%s942_s0 + $0xee] ss:$-48 sm:%s59_s6]   ;;  %v530_v25 = vld [vmem:[%s942_s0 + $0xc] sm:$0x1]   ;;  %s126_s23 = smov 96  ;;  %s609_s24 = smov 104  }
   0x8   :  { %v523_v22 = vld [vmem:[%s942_s0 + $0x15e] ss:$-48 sm:%s64_s10]   ;;  %v102_v23 = vsel %vm39_vm3, %v529_v8, %v98_v19  ;;  %v62_v24 = vsel %vm30_vm1, %v522_v21, %v57_v20  ;;  %v531_v26 = vld [vmem:[%s942_s0 + $0x7c] ss:$-48 sm:%s116_s17]   ;;  %s147_s29 = smov 6  ;;  %s152_s30 = smov 24 }
   0x9   :  { %103 = vrot.lane.b32.xlu1 %v102_v23, %s609_s24  ;;  %v67_v27 = vsel %vm35_vm2, %v523_v22, %v62_v24  ;;  %v119_v28 = vsel %vm25_vm0, %v531_v26, %v530_v25  ;;  %v532_v29 = vld [vmem:[%s942_s0 + $0xec] ss:$-48 sm:%s121_s18]   ;;  %v535_v34 = vld [vmem:[%s942_s0 + $0xb] sm:$0x1]   ;;  %s157_s6 = smov 96  ;;  %s610_s7 = smov 112  }
   0xa   :  { %v534_v30 = vld [vmem:[%s942_s0 + $0x75] sm:$0x80]   ;;  %v71_v31 = vsel %vm39_vm3, %v524_v18, %v67_v27  ;;  %v124_v32 = vsel %vm30_vm1, %v532_v29, %v119_v28  ;;  %v536_v36 = vld [vmem:[%s942_s0 + $0x7b] ss:$-48 sm:%s147_s29]   ;;  %s178_s12 = smov 6  ;;  %s183_s13 = smov 24 }
   0xb   :  { %v533_v33 = vld [vmem:[%s942_s0 + $0x15c] ss:$-48 sm:%s126_s23]   ;;  %72 = vrot.lane.b32.xlu0 %v71_v31, %s610_s7  ;;  %v539_v37 = vld [vmem:[%s942_s0 + $0x74] sm:$0x80]   ;;  %v150_v39 = vsel %vm25_vm0, %v536_v36, %v535_v34  ;;  %s188_s18 = smov 96  ;;  %s611_s19 = smov 96  }
   0xc   :  { %v129_v35 = vsel %vm35_vm2, %v533_v33, %v124_v32  ;;  %v537_v40 = vld [vmem:[%s942_s0 + $0xeb] ss:$-48 sm:%s152_s30]   ;;  %v540_v43 = vld [vmem:[%s942_s0 + $0xa] sm:$0x1]   ;;  %s209_s24 = smov 6  ;;  %s214_s25 = smov 24 }
   0xd   :  { %v133_v38 = vsel %vm39_vm3, %v534_v30, %v129_v35  ;;  %v538_v41 = vld [vmem:[%s942_s0 + $0x15b] ss:$-48 sm:%s157_s6]   ;;  %v155_v42 = vsel %vm30_vm1, %v537_v40, %v150_v39  ;;  %v541_v44 = vld [vmem:[%s942_s0 + $0x7a] ss:$-48 sm:%s178_s12]   ;;  %s219_s30 = smov 96  ;;  %s612_s8 = smov 88  }
   0xe   :  { %134 = vrot.lane.b32.xlu1 %v133_v38, %s611_s19  ;;  %v160_v45 = vsel %vm35_vm2, %v538_v41, %v155_v42  ;;  %v181_v46 = vsel %vm25_vm0, %v541_v44, %v540_v43  ;;  %v542_v47 = vld [vmem:[%s942_s0 + $0xea] ss:$-48 sm:%s183_s13]   ;;  %v545_v52 = vld [vmem:[%s942_s0 + $0x9] sm:$0x1]   ;;  %s240_s13 = smov 6  ;;  %s245_s14 = smov 24 }
   0xf   :  { %v543_v48 = vld [vmem:[%s942_s0 + $0x15a] ss:$-48 sm:%s188_s18]   ;;  %v164_v49 = vsel %vm39_vm3, %v539_v37, %v160_v45  ;;  %v186_v50 = vsel %vm30_vm1, %v542_v47, %v181_v46  ;;  %v546_v53 = vld [vmem:[%s942_s0 + $0x79] ss:$-48 sm:%s209_s24]   ;;  %s250_s19 = smov 96  ;;  %s613_s20 = smov 80  }
  0x10   :  { %v544_v51 = vld [vmem:[%s942_s0 + $0x73] sm:$0x80]   ;;  %165 = vrot.lane.b32.xlu0 %v164_v49, %s612_s8  ;;  %v191_v54 = vsel %vm35_vm2, %v543_v48, %v186_v50  ;;  %v212_v55 = vsel %vm25_vm0, %v546_v53, %v545_v52  ;;  %v547_v56 = vld [vmem:[%s942_s0 + $0xe9] ss:$-48 sm:%s214_s25]   ;;  %s271_s25 = smov 6  ;;  %s276_s26 = smov 24 }
  0x11   :  { %v549_v57 = vld [vmem:[%s942_s0 + $0x72] sm:$0x80]   ;;  %v195_v58 = vsel %vm39_vm3, %v544_v51, %v191_v54  ;;  %v217_v59 = vsel %vm30_vm1, %v547_v56, %v212_v55  ;;  %v550_v61 = vld [vmem:[%s942_s0 + $0x8] sm:$0x1]   ;;  %v554_v0 = vld [vmem:[%s942_s0 + $0x71] sm:$0x80]  }
  0x12   :  { %v548_v60 = vld [vmem:[%s942_s0 + $0x159] ss:$-48 sm:%s219_s30]   ;;  %196 = vrot.lane.b32.xlu1 %v195_v58, %s613_s20  ;;  %s281_s2 = smov 96  ;;  %s614_s3 = smov 72   ;;  %v555_v6 = vld [vmem:[%s942_s0 + $0x7] sm:$0x1]  }
  0x13   :  { %v222_v62 = vsel %vm35_vm2, %v548_v60, %v217_v59  ;;  %v551_v63 = vld [vmem:[%s942_s0 + $0x78] ss:$-48 sm:%s240_s13]   ;;  %v556_v7 = vld [vmem:[%s942_s0 + $0x77] ss:$-48 sm:%s271_s25]   ;;  %s302_s8 = smov 6  ;;  %s307_s9 = smov 24 }
  0x14   :  { %v226_v1 = vsel %vm39_vm3, %v549_v57, %v222_v62  ;;  %v243_v2 = vsel %vm25_vm0, %v551_v63, %v550_v61  ;;  %v552_v3 = vld [vmem:[%s942_s0 + $0xe8] ss:$-48 sm:%s245_s14]   ;;  %v274_v9 = vsel %vm25_vm0, %v556_v7, %v555_v6  ;;  %v557_v10 = vld [vmem:[%s942_s0 + $0xe7] ss:$-48 sm:%s276_s26]   ;;  %s312_s14 = smov 96  ;;  %s615_s21 = smov 64  }
  0x15   :  { %v553_v4 = vld [vmem:[%s942_s0 + $0x158] ss:$-48 sm:%s250_s19]   ;;  %227 = vrot.lane.b32.xlu0 %v226_v1, %s614_s3  ;;  %v248_v5 = vsel %vm30_vm1, %v552_v3, %v243_v2  ;;  %v279_v13 = vsel %vm30_vm1, %v557_v10, %v274_v9  ;;  %v559_v14 = vld [vmem:[%s942_s0 + $0x70] sm:$0x80]   ;;  %s333_s26 = smov 6  ;;  %s338_s27 = smov 24 }
  0x16   :  { %v253_v8 = vsel %vm35_vm2, %v553_v4, %v248_v5  ;;  %v558_v11 = vld [vmem:[%s942_s0 + $0x157] ss:$-48 sm:%s281_s2]   ;;  %v560_v15 = vld [vmem:[%s942_s0 + $0x6] sm:$0x1]   ;;  %v564_v20 = vld [vmem:[%s942_s0 + $0x6f] sm:$0x80]  }
  0x17   :  { %v257_v12 = vsel %vm39_vm3, %v554_v0, %v253_v8  ;;  %v561_v16 = vld [vmem:[%s942_s0 + $0x76] ss:$-48 sm:%s302_s8]   ;;  %v284_v17 = vsel %vm35_vm2, %v558_v11, %v279_v13  ;;  %v565_v24 = vld [vmem:[%s942_s0 + $0x5] sm:$0x1]   ;;  %s343_s3 = smov 96  ;;  %s616_s4 = smov 56  }
  0x18   :  { %258 = vrot.lane.b32.xlu1 %v257_v12, %s615_s21  ;;  %v305_v18 = vsel %vm25_vm0, %v561_v16, %v560_v15  ;;  %v562_v19 = vld [vmem:[%s942_s0 + $0xe6] ss:$-48 sm:%s307_s9]   ;;  %v288_v21 = vsel %vm39_vm3, %v559_v14, %v284_v17  ;;  %v569_v27 = vld [vmem:[%s942_s0 + $0x6e] sm:$0x80]   ;;  %s364_s9 = smov 6  ;;  %s369_s10 = smov 24 }
  0x19   :  { %v310_v22 = vsel %vm30_vm1, %v562_v19, %v305_v18  ;;  %v563_v23 = vld [vmem:[%s942_s0 + $0x156] ss:$-48 sm:%s312_s14]   ;;  %289 = vrot.lane.b32.xlu0 %v288_v21, %s616_s4  ;;  %s374_s15 = smov 96  ;;  %s617_s16 = smov 48   ;;  %v570_v33 = vld [vmem:[%s942_s0 + $0x4] sm:$0x1]  }
  0x1a   :  { %v315_v25 = vsel %vm35_vm2, %v563_v23, %v310_v22  ;;  %v566_v26 = vld [vmem:[%s942_s0 + $0x75] ss:$-48 sm:%s333_s26]   ;;  %v571_v34 = vld [vmem:[%s942_s0 + $0x74] ss:$-48 sm:%s364_s9]   ;;  %s395_s21 = smov 6  ;;  %s400_s22 = smov 24 }
  0x1b   :  { %v319_v28 = vsel %vm39_vm3, %v564_v20, %v315_v25  ;;  %v336_v29 = vsel %vm25_vm0, %v566_v26, %v565_v24  ;;  %v567_v30 = vld [vmem:[%s942_s0 + $0xe5] ss:$-48 sm:%s338_s27]   ;;  %v367_v36 = vsel %vm25_vm0, %v571_v34, %v570_v33  ;;  %v572_v37 = vld [vmem:[%s942_s0 + $0xe4] ss:$-48 sm:%s369_s10]   ;;  %s405_s27 = smov 96  ;;  %s618_s5 = smov 40  }
  0x1c   :  { %v568_v31 = vld [vmem:[%s942_s0 + $0x155] ss:$-48 sm:%s343_s3]   ;;  %320 = vrot.lane.b32.xlu1 %v319_v28, %s617_s16  ;;  %v341_v32 = vsel %vm30_vm1, %v567_v30, %v336_v29  ;;  %v372_v40 = vsel %vm30_vm1, %v572_v37, %v367_v36  ;;  %v574_v41 = vld [vmem:[%s942_s0 + $0x6d] sm:$0x80]   ;;  %s426_s10 = smov 6  ;;  %s431_s11 = smov 24 }
  0x1d   :  { %v346_v35 = vsel %vm35_vm2, %v568_v31, %v341_v32  ;;  %v573_v38 = vld [vmem:[%s942_s0 + $0x154] ss:$-48 sm:%s374_s15]   ;;  %v575_v42 = vld [vmem:[%s942_s0 + $0x3] sm:$0x1]   ;;  %v579_v47 = vld [vmem:[%s942_s0 + $0x6c] sm:$0x80]  }
  0x1e   :  { %v350_v39 = vsel %vm39_vm3, %v569_v27, %v346_v35  ;;  %v576_v43 = vld [vmem:[%s942_s0 + $0x73] ss:$-48 sm:%s395_s21]   ;;  %v377_v44 = vsel %vm35_vm2, %v573_v38, %v372_v40  ;;  %v580_v51 = vld [vmem:[%s942_s0 + $0x2] sm:$0x1]   ;;  %s436_s16 = smov 96  ;;  %s619_s17 = smov 32  }
  0x1f   :  { %351 = vrot.lane.b32.xlu0 %v350_v39, %s618_s5  ;;  %v398_v45 = vsel %vm25_vm0, %v576_v43, %v575_v42  ;;  %v577_v46 = vld [vmem:[%s942_s0 + $0xe3] ss:$-48 sm:%s400_s22]   ;;  %v381_v48 = vsel %vm39_vm3, %v574_v41, %v377_v44  ;;  %v584_v54 = vld [vmem:[%s942_s0 + $0x6b] sm:$0x80]   ;;  %s457_s22 = smov 6  ;;  %s462_s23 = smov 24 }
  0x20   :  { %v403_v49 = vsel %vm30_vm1, %v577_v46, %v398_v45  ;;  %v578_v50 = vld [vmem:[%s942_s0 + $0x153] ss:$-48 sm:%s405_s27]   ;;  %382 = vrot.lane.b32.xlu1 %v381_v48, %s619_s17  ;;  %s467_s28 = smov 96  ;;  %s620_s29 = smov 24   ;;  %v585_v60 = vld [vmem:[%s942_s0 + $0x1] sm:$0x1]  }
  0x21   :  { %v408_v52 = vsel %vm35_vm2, %v578_v50, %v403_v49  ;;  %v581_v53 = vld [vmem:[%s942_s0 + $0x72] ss:$-48 sm:%s426_s10]   ;;  %v586_v61 = vld [vmem:[%s942_s0 + $0x71] ss:$-48 sm:%s457_s22]   ;;  %s2_s5 = smov 3  ;;  %s4_s10 = smov 12 }
  0x22   :  { %v412_v55 = vsel %vm39_vm3, %v579_v47, %v408_v52  ;;  %v429_v56 = vsel %vm25_vm0, %v581_v53, %v580_v51  ;;  %v582_v57 = vld [vmem:[%s942_s0 + $0xe2] ss:$-48 sm:%s431_s11]   ;;  %v460_v63 = vsel %vm25_vm0, %v586_v61, %v585_v60  ;;  %v587_v0 = vld [vmem:[%s942_s0 + $0xe1] ss:$-48 sm:%s462_s23]   ;;  %vm6_vm4 = vcmask 1043458   ;;  %s8_s15 = smov 48 }
  0x23   :  { %v583_v58 = vld [vmem:[%s942_s0 + $0x152] ss:$-48 sm:%s436_s16]   ;;  %413 = vrot.lane.b32.xlu0 %v412_v55, %s620_s29  ;;  %v434_v59 = vsel %vm30_vm1, %v582_v57, %v429_v56  ;;  %v465_v3 = vsel %vm30_vm1, %v587_v0, %v460_v63  ;;  %v589_v4 = vld [vmem:[%s942_s0 + $0x6a] sm:$0x80]   ;;  %vm10_vm5 = vcmask 1045508   ;;  %s621_s16 = smov 16  }
  0x24   :  { %v439_v62 = vsel %vm35_vm2, %v583_v58, %v434_v59  ;;  %v588_v1 = vld [vmem:[%s942_s0 + $0x151] ss:$-48 sm:%s467_s28]   ;;  %v3_v5 = vld [vmem:[%s942_s0] ss:$16 sm:%s2_s5]   ;;  %s12_s19 = smov 192  ;;  %vm14_vm6 = vcmask 1047558  }
  0x25   :  { %v443_v2 = vsel %vm39_vm3, %v584_v54, %v439_v62  ;;  %v470_v6 = vsel %vm35_vm2, %v588_v1, %v465_v3  ;;  %v5_v7 = vld [vmem:[%s942_s0] ss:$16 sm:%s4_s10]   ;;  %vm16_vm7 = vcmask 64512   ;;  %vm43_vm8 = vcmask 1048512  }
  0x26   :  { %444 = vrot.lane.b32.xlu1 %v443_v2, %s621_s16  ;;  %v474_v8 = vsel %vm39_vm3, %v589_v4, %v470_v6  ;;  %v7_v9 = vsel %vm6_vm4, %v5_v7, %v3_v5  ;;  %v9_v10 = vld [vmem:[%s942_s0] ss:$16 sm:%s8_s15]   ;;  %vm74_vm9 = vcmask 982912   ;;  %vm105_vm10 = vcmask 917312  }
  0x27   :  { %v13_v11 = vld [vmem:[%s942_s0] ss:$16 sm:%s12_s19]   ;;  %s622_s0 = smov 8   ;;  %v11_v12 = vsel %vm10_vm5, %v9_v10, %v7_v9  ;;  %vm136_vm11 = vcmask 851712   ;;  %vm167_vm12 = vcmask 786112   ;;  %vm198_vm13 = vcmask 720512  }
  0x28   :  { %475 = vrot.lane.b32.xlu0 %v474_v8, %s622_s0  ;;  %v15_v13 = vsel %vm14_vm6, %v13_v11, %v11_v12  ;;  %vm229_vm14 = vcmask 654912   ;;  %vm260_vm15 = vcmask 589312   ;;  %vm291_vm0 = vcmask 523712  }
  0x29   :  { %17 = vst.msk [vmem:[#allocation0] ss:$8 sm:$0xf] %vm16_vm7, %v15_v13   ;;  %19 = vst.msk [vmem:[#allocation0 - $0x1f] ss:$8 sm:$0xf0] %vm16_vm7, %v15_v13  }
  0x2a   :  { %vm322_vm1 = vcmask 458112   ;;  %vm353_vm2 = vcmask 392512   ;;  %vm384_vm3 = vcmask 326912   ;;  %vm415_vm4 = vcmask 261312  }
  0x2b   :  { %vm446_vm5 = vcmask 195712   ;;  %vm477_vm6 = vcmask 130112  }
  0x79   :  { %v42_v14 = vpop.permute.xlu0 %41  }
  0x7a   :  { %44 = vst.msk [vmem:[#allocation0] sm:$0x3] %vm43_vm8, %v42_v14   ;;  %46 = vst.msk [vmem:[#allocation0 + $0x6] sm:$0xc] %vm43_vm8, %v42_v14  }
  0x7b   :  { %48 = vst.msk [vmem:[#allocation0 + $0xc] sm:$0x30] %vm43_vm8, %v42_v14   ;;  %50 = vst.msk [vmem:[#allocation0 + $0x12] sm:$0xc0] %vm43_vm8, %v42_v14   ;;  %v104_v15 = vpop.permute.xlu1 %103  }
  0x7d   :  { %v73_v16 = vpop.permute.xlu0 %72  }
  0x7e   :  { %75 = vst.msk [vmem:[#allocation0] sm:$0x3] %vm74_vm9, %v73_v16   ;;  %77 = vst.msk [vmem:[#allocation0 + $0x6] sm:$0xc] %vm74_vm9, %v73_v16  }
  0x7f   :  { %79 = vst.msk [vmem:[#allocation0 + $0xc] sm:$0x30] %vm74_vm9, %v73_v16   ;;  %81 = vst.msk [vmem:[#allocation0 + $0x12] sm:$0xc0] %vm74_vm9, %v73_v16  }
  0x80   :  { %106 = vst.msk [vmem:[#allocation0] sm:$0x3] %vm105_vm10, %v104_v15   ;;  %108 = vst.msk [vmem:[#allocation0 + $0x6] sm:$0xc] %vm105_vm10, %v104_v15   ;;  %v135_v17 = vpop.permute.xlu1 %134  }
  0x81   :  { %110 = vst.msk [vmem:[#allocation0 + $0xc] sm:$0x30] %vm105_vm10, %v104_v15   ;;  %112 = vst.msk [vmem:[#allocation0 + $0x12] sm:$0xc0] %vm105_vm10, %v104_v15  }
  0x82   :  { %137 = vst.msk [vmem:[#allocation0] sm:$0x3] %vm136_vm11, %v135_v17   ;;  %139 = vst.msk [vmem:[#allocation0 + $0x6] sm:$0xc] %vm136_vm11, %v135_v17   ;;  %v166_v18 = vpop.permute.xlu0 %165  }
  0x83   :  { %141 = vst.msk [vmem:[#allocation0 + $0xc] sm:$0x30] %vm136_vm11, %v135_v17   ;;  %143 = vst.msk [vmem:[#allocation0 + $0x12] sm:$0xc0] %vm136_vm11, %v135_v17  }
  0x84   :  { %168 = vst.msk [vmem:[#allocation0] sm:$0x3] %vm167_vm12, %v166_v18   ;;  %170 = vst.msk [vmem:[#allocation0 + $0x6] sm:$0xc] %vm167_vm12, %v166_v18   ;;  %v197_v19 = vpop.permute.xlu1 %196  }
  0x85   :  { %172 = vst.msk [vmem:[#allocation0 + $0xc] sm:$0x30] %vm167_vm12, %v166_v18   ;;  %174 = vst.msk [vmem:[#allocation0 + $0x12] sm:$0xc0] %vm167_vm12, %v166_v18  }
  0x86   :  { %199 = vst.msk [vmem:[#allocation0] sm:$0x3] %vm198_vm13, %v197_v19   ;;  %201 = vst.msk [vmem:[#allocation0 + $0x6] sm:$0xc] %vm198_vm13, %v197_v19  }
  0x87   :  { %203 = vst.msk [vmem:[#allocation0 + $0xc] sm:$0x30] %vm198_vm13, %v197_v19   ;;  %205 = vst.msk [vmem:[#allocation0 + $0x12] sm:$0xc0] %vm198_vm13, %v197_v19   ;;  %v228_v20 = vpop.permute.xlu0 %227  }
  0x88   :  { %230 = vst.msk [vmem:[#allocation0] sm:$0x3] %vm229_vm14, %v228_v20   ;;  %232 = vst.msk [vmem:[#allocation0 + $0x6] sm:$0xc] %vm229_vm14, %v228_v20  }
  0x89   :  { %234 = vst.msk [vmem:[#allocation0 + $0xc] sm:$0x30] %vm229_vm14, %v228_v20   ;;  %236 = vst.msk [vmem:[#allocation0 + $0x12] sm:$0xc0] %vm229_vm14, %v228_v20  }
  0x8a   :  { %v259_v21 = vpop.permute.xlu1 %258  }
  0x8b   :  { %261 = vst.msk [vmem:[#allocation0] sm:$0x3] %vm260_vm15, %v259_v21   ;;  %263 = vst.msk [vmem:[#allocation0 + $0x6] sm:$0xc] %vm260_vm15, %v259_v21   ;;  %v290_v22 = vpop.permute.xlu0 %289  }
  0x8c   :  { %265 = vst.msk [vmem:[#allocation0 + $0xc] sm:$0x30] %vm260_vm15, %v259_v21   ;;  %267 = vst.msk [vmem:[#allocation0 + $0x12] sm:$0xc0] %vm260_vm15, %v259_v21  }
  0x8d   :  { %292 = vst.msk [vmem:[#allocation0] sm:$0x3] %vm291_vm0, %v290_v22   ;;  %294 = vst.msk [vmem:[#allocation0 + $0x6] sm:$0xc] %vm291_vm0, %v290_v22  }
  0x8e   :  { %296 = vst.msk [vmem:[#allocation0 + $0xc] sm:$0x30] %vm291_vm0, %v290_v22   ;;  %298 = vst.msk [vmem:[#allocation0 + $0x12] sm:$0xc0] %vm291_vm0, %v290_v22   ;;  %v321_v23 = vpop.permute.xlu1 %320  }
  0x8f   :  { %323 = vst.msk [vmem:[#allocation0] sm:$0x3] %vm322_vm1, %v321_v23   ;;  %325 = vst.msk [vmem:[#allocation0 + $0x6] sm:$0xc] %vm322_vm1, %v321_v23  }
  0x90   :  { %327 = vst.msk [vmem:[#allocation0 + $0xc] sm:$0x30] %vm322_vm1, %v321_v23   ;;  %329 = vst.msk [vmem:[#allocation0 + $0x12] sm:$0xc0] %vm322_vm1, %v321_v23  }
  0x91   :  { %v352_v24 = vpop.permute.xlu0 %351  }
  0x92   :  { %354 = vst.msk [vmem:[#allocation0] sm:$0x3] %vm353_vm2, %v352_v24   ;;  %356 = vst.msk [vmem:[#allocation0 + $0x6] sm:$0xc] %vm353_vm2, %v352_v24   ;;  %v383_v25 = vpop.permute.xlu1 %382  }
  0x93   :  { %358 = vst.msk [vmem:[#allocation0 + $0xc] sm:$0x30] %vm353_vm2, %v352_v24   ;;  %360 = vst.msk [vmem:[#allocation0 + $0x12] sm:$0xc0] %vm353_vm2, %v352_v24  }
  0x94   :  { %385 = vst.msk [vmem:[#allocation0] sm:$0x3] %vm384_vm3, %v383_v25   ;;  %387 = vst.msk [vmem:[#allocation0 + $0x6] sm:$0xc] %vm384_vm3, %v383_v25  }
  0x95   :  { %389 = vst.msk [vmem:[#allocation0 + $0xc] sm:$0x30] %vm384_vm3, %v383_v25   ;;  %391 = vst.msk [vmem:[#allocation0 + $0x12] sm:$0xc0] %vm384_vm3, %v383_v25   ;;  %v414_v26 = vpop.permute.xlu0 %413  }
  0x96   :  { %416 = vst.msk [vmem:[#allocation0] sm:$0x3] %vm415_vm4, %v414_v26   ;;  %418 = vst.msk [vmem:[#allocation0 + $0x6] sm:$0xc] %vm415_vm4, %v414_v26  }
  0x97   :  { %420 = vst.msk [vmem:[#allocation0 + $0xc] sm:$0x30] %vm415_vm4, %v414_v26   ;;  %422 = vst.msk [vmem:[#allocation0 + $0x12] sm:$0xc0] %vm415_vm4, %v414_v26  }
  0x98   :  { %v445_v27 = vpop.permute.xlu1 %444  }
  0x99   :  { %447 = vst.msk [vmem:[#allocation0] sm:$0x3] %vm446_vm5, %v445_v27   ;;  %449 = vst.msk [vmem:[#allocation0 + $0x6] sm:$0xc] %vm446_vm5, %v445_v27  }
  0x9a   :  { %451 = vst.msk [vmem:[#allocation0 + $0xc] sm:$0x30] %vm446_vm5, %v445_v27   ;;  %453 = vst.msk [vmem:[#allocation0 + $0x12] sm:$0xc0] %vm446_vm5, %v445_v27   ;;  %v476_v28 = vpop.permute.xlu0 %475  }
  0x9b   :  { %478 = vst.msk [vmem:[#allocation0] sm:$0x3] %vm477_vm6, %v476_v28   ;;  %480 = vst.msk [vmem:[#allocation0 + $0x6] sm:$0xc] %vm477_vm6, %v476_v28  }
  0x9c   :  { %482 = vst.msk [vmem:[#allocation0 + $0xc] sm:$0x30] %vm477_vm6, %v476_v28   ;;  %484 = vst.msk [vmem:[#allocation0 + $0x12] sm:$0xc0] %vm477_vm6, %v476_v28  }
  0xa2   :  { %v489_v29 = vld [vmem:[#allocation0] sm:$0x3]  ;;  %v494_v30 = vld [vmem:[#allocation0 + $0x8] sm:$0x3] }
  0xa3   :  { %v500_v31 = vld [vmem:[#allocation0 + $0x10] sm:$0x3]  ;;  %492 = vst [vmem:[%s943_s1] sm:$0x3] %v489_v29  ;;  %590 = vst [vmem:[%s943_s1 + $0x2] sm:$0x3] %v494_v30 }
  0xa4   :  { %591 = vst [vmem:[%s943_s1 + $0x4] sm:$0x3] %v500_v31  ;;  %v507_v32 = vld [vmem:[#allocation0 + $0x18] sm:$0x3] }
  0xa5   :  { %592 = vst [vmem:[%s943_s1 + $0x6] sm:$0x3] %v507_v32 }

// kernel: relative_scalars_forward.3
= control target key start
LH: loop header
LB: loop body
LE: loop exit
PB: predicated region body
PF: predicated region fallthrough
CT: control target
= control target key end

     0   :  { %v977_v30 = vmov 1983009808   ;;  %v173_v32 = vlaneseq  ;;  %s1461_s0 = inlined_call_operand.vmem [shape: f32[2,1028], index: 0, kind: input, shape index: {}]   ;;  %s1462_s1 = inlined_call_operand.vmem [shape: f32[1028,32], index: 1, kind: input, shape index: {}]   ;;  %s1463_s2 = inlined_call_operand.vmem [shape: f32[1,32], index: 2, kind: input, shape index: {}]   ;;  %s1464_s3 = inlined_call_operand.vmem [shape: f32[32,32], index: 3, kind: input, shape index: {}]   ;;  %s1465_s4 = inlined_call_operand.vmem [shape: f32[1,32], index: 4, kind: input, shape index: {}]   ;;  %s1466_s5 = inlined_call_operand.vmem [shape: f32[32,4], index: 5, kind: input, shape index: {}]   ;;  %s1467_s6 = inlined_call_operand.vmem [shape: f32[1,4], index: 6, kind: input, shape index: {}]   ;;  %s1468_s7 = inlined_call_operand.hbm [shape: f32[2,4], index: 7, kind: output, shape index: {}]  }
   0x1   :  { %v61_v0 = vld [vmem:[%s1462_s1 + $0xf8] sm:$0xff]  ;;  %v60_v4 = vld [vmem:[%s1462_s1 + $0xf0] sm:$0xff]  ;;  %v59_v8 = vld [vmem:[%s1462_s1 + $0xe8] sm:$0xff]  ;;  %v171_v31 = vunpack.c.l.s4 %v977_v30 }
   0x2   :  { %v93_v1 = vld [vmem:[%s1462_s1 + $0x1f8] sm:$0xff]  ;;  %770 = vmatprep.subr.mxu0 %v61_v0  ;;  %v92_v5 = vld [vmem:[%s1462_s1 + $0x1f0] sm:$0xff]  ;;  %v91_v9 = vld [vmem:[%s1462_s1 + $0x1e8] sm:$0xff]  ;;  %v174_v42 = vshrl.u32 %v173_v32, 7 }
   0x3   :  { %v45_v2 = vld [vmem:[%s1462_s1 + $0x78] sm:$0xff]  ;;  %805 = vmatprep.subr.mxu1 %v93_v1  ;;  %v44_v6 = vld [vmem:[%s1462_s1 + $0x70] sm:$0xff]  ;;  %v43_v10 = vld [vmem:[%s1462_s1 + $0x68] sm:$0xff]  ;;  %v172_v41 = vunpack.c.0.s8 %v171_v31 }
   0x4   :  { %v77_v3 = vld [vmem:[%s1462_s1 + $0x178] sm:$0xff]  ;;  %771 = vmatpush3.msra.mxu0 %v45_v2  ;;  %v76_v7 = vld [vmem:[%s1462_s1 + $0x170] sm:$0xff]  ;;  %v75_v11 = vld [vmem:[%s1462_s1 + $0x168] sm:$0xff] }
   0x5   :  { %806 = vmatpush3.msra.mxu1 %v77_v3  ;;  %772 = vmatprep.subr.mxu0 %v60_v4  ;;  %v58_v12 = vld [vmem:[%s1462_s1 + $0xe0] sm:$0xff]  ;;  %v57_v16 = vld [vmem:[%s1462_s1 + $0xd8] sm:$0xff]  ;;  %v56_v20 = vld [vmem:[%s1462_s1 + $0xd0] sm:$0xff]  ;;  %v1159_v51 = vsub.s32 %v172_v41, %v174_v42 }
   0x6   :  { %807 = vmatprep.subr.mxu1 %v92_v5  ;;  %773 = vmatpush3.msra.mxu0 %v44_v6  ;;  %v90_v13 = vld [vmem:[%s1462_s1 + $0x1e0] sm:$0xff]  ;;  %v89_v17 = vld [vmem:[%s1462_s1 + $0x1d8] sm:$0xff]  ;;  %v88_v21 = vld [vmem:[%s1462_s1 + $0x1d0] sm:$0xff] }
   0x7   :  { %808 = vmatpush3.msra.mxu1 %v76_v7  ;;  %774 = vmatprep.subr.mxu0 %v59_v8  ;;  %v42_v14 = vld [vmem:[%s1462_s1 + $0x60] sm:$0xff]  ;;  %v41_v18 = vld [vmem:[%s1462_s1 + $0x58] sm:$0xff]  ;;  %v40_v22 = vld [vmem:[%s1462_s1 + $0x50] sm:$0xff] }
   0x8   :  { %809 = vmatprep.subr.mxu1 %v91_v9  ;;  %v74_v15 = vld [vmem:[%s1462_s1 + $0x160] sm:$0xff]  ;;  %775 = vmatpush3.msra.mxu0 %v43_v10  ;;  %v73_v19 = vld [vmem:[%s1462_s1 + $0x158] sm:$0xff]  ;;  %v72_v23 = vld [vmem:[%s1462_s1 + $0x150] sm:$0xff] }
   0x9   :  { %810 = vmatpush3.msra.mxu1 %v75_v11  ;;  %776 = vmatprep.subr.mxu0 %v58_v12  ;;  %v55_v24 = vld [vmem:[%s1462_s1 + $0xc8] sm:$0xff]  ;;  %v54_v28 = vld [vmem:[%s1462_s1 + $0xc0] sm:$0xff]  ;;  %v53_v35 = vld [vmem:[%s1462_s1 + $0xb8] sm:$0xff] }
   0xa   :  { %811 = vmatprep.subr.mxu1 %v90_v13  ;;  %777 = vmatpush3.msra.mxu0 %v42_v14  ;;  %v87_v25 = vld [vmem:[%s1462_s1 + $0x1c8] sm:$0xff]  ;;  %v86_v29 = vld [vmem:[%s1462_s1 + $0x1c0] sm:$0xff]  ;;  %v85_v36 = vld [vmem:[%s1462_s1 + $0x1b8] sm:$0xff] }
   0xb   :  { %812 = vmatpush3.msra.mxu1 %v74_v15  ;;  %778 = vmatprep.subr.mxu0 %v57_v16  ;;  %v39_v26 = vld [vmem:[%s1462_s1 + $0x48] sm:$0xff]  ;;  %v38_v33 = vld [vmem:[%s1462_s1 + $0x40] sm:$0xff]  ;;  %v37_v37 = vld [vmem:[%s1462_s1 + $0x38] sm:$0xff] }
   0xc   :  { %813 = vmatprep.subr.mxu1 %v89_v17  ;;  %779 = vmatpush3.msra.mxu0 %v41_v18  ;;  %v71_v27 = vld [vmem:[%s1462_s1 + $0x148] sm:$0xff]  ;;  %v70_v34 = vld [vmem:[%s1462_s1 + $0x140] sm:$0xff]  ;;  %v69_v38 = vld [vmem:[%s1462_s1 + $0x138] sm:$0xff] }
   0xd   :  { %814 = vmatpush3.msra.mxu1 %v73_v19  ;;  %780 = vmatprep.subr.mxu0 %v56_v20  ;;  %v52_v39 = vld [vmem:[%s1462_s1 + $0xb0] sm:$0xff]  ;;  %v51_v45 = vld [vmem:[%s1462_s1 + $0xa8] sm:$0xff]  ;;  %v50_v49 = vld [vmem:[%s1462_s1 + $0xa0] sm:$0xff] }
   0xe   :  { %815 = vmatprep.subr.mxu1 %v88_v21  ;;  %781 = vmatpush3.msra.mxu0 %v40_v22  ;;  %v84_v40 = vld [vmem:[%s1462_s1 + $0x1b0] sm:$0xff]  ;;  %v83_v46 = vld [vmem:[%s1462_s1 + $0x1a8] sm:$0xff]  ;;  %v82_v50 = vld [vmem:[%s1462_s1 + $0x1a0] sm:$0xff] }
   0xf   :  { %816 = vmatpush3.msra.mxu1 %v72_v23  ;;  %782 = vmatprep.subr.mxu0 %v55_v24  ;;  %v36_v43 = vld [vmem:[%s1462_s1 + $0x30] sm:$0xff]  ;;  %v35_v47 = vld [vmem:[%s1462_s1 + $0x28] sm:$0xff]  ;;  %v34_v52 = vld [vmem:[%s1462_s1 + $0x20] sm:$0xff] }
  0x10   :  { %817 = vmatprep.subr.mxu1 %v87_v25  ;;  %783 = vmatpush3.msra.mxu0 %v39_v26  ;;  %v68_v44 = vld [vmem:[%s1462_s1 + $0x130] sm:$0xff]  ;;  %v67_v48 = vld [vmem:[%s1462_s1 + $0x128] sm:$0xff]  ;;  %v66_v53 = vld [vmem:[%s1462_s1 + $0x120] sm:$0xff] }
  0x11   :  { %818 = vmatpush3.msra.mxu1 %v71_v27  ;;  %784 = vmatprep.subr.mxu0 %v54_v28  ;;  %v27_v54 = vld [vmem:[%s1461_s0] sm:$0xff]  ;;  %v49_v55 = vld [vmem:[%s1462_s1 + $0x98] sm:$0xff]  ;;  %v48_v60 = vld [vmem:[%s1462_s1 + $0x90] sm:$0xff] }
  0x12   :  { %819 = vmatprep.subr.mxu1 %v86_v29  ;;  %785 = vmatpush3.msra.mxu0 %v38_v33  ;;  %v81_v56 = vld [vmem:[%s1462_s1 + $0x198] sm:$0xff]  ;;  %v169_v57 = vcombine.high %v27_v54, %v27_v54  ;;  %v80_v61 = vld [vmem:[%s1462_s1 + $0x190] sm:$0xff]  ;;  %v176_v62 = vrot.slane %v27_v54, %v1159_v51  ;;  %v47_v1 = vld [vmem:[%s1462_s1 + $0x88] sm:$0xff] }
  0x13   :  { %820 = vmatpush3.msra.mxu1 %v70_v34  ;;  %786 = vmatprep.subr.mxu0 %v53_v35  ;;  %v33_v58 = vld [vmem:[%s1462_s1 + $0x18] sm:$0xff]  ;;  %v32_v63 = vld [vmem:[%s1462_s1 + $0x10] sm:$0xff]  ;;  %v79_v2 = vld [vmem:[%s1462_s1 + $0x188] sm:$0xff] }
  0x14   :  { %821 = vmatprep.subr.mxu1 %v85_v36  ;;  %787 = vmatpush3.msra.mxu0 %v37_v37  ;;  %v65_v59 = vld [vmem:[%s1462_s1 + $0x118] sm:$0xff]  ;;  %v64_v0 = vld [vmem:[%s1462_s1 + $0x110] sm:$0xff]  ;;  %v183_v3 = vrot.slane %v169_v57, %v1159_v51  ;;  %v31_v4 = vld [vmem:[%s1462_s1 + $0x8] sm:$0xff]  ;;  %v184_v8 = vcombine.high %v176_v62, %v176_v62 }
  0x15   :  { %822 = vmatpush3.msra.mxu1 %v69_v38  ;;  %788 = vmatprep.subr.mxu0 %v52_v39  ;;  %v63_v5 = vld [vmem:[%s1462_s1 + $0x108] sm:$0xff]  ;;  %v46_v6 = vld [vmem:[%s1462_s1 + $0x80] sm:$0xff]  ;;  %v125_v12 = vld [vmem:[%s1462_s1 + $0x2f8] sm:$0xff] }
  0x16   :  { %823 = vmatprep.subr.mxu1 %v84_v40  ;;  %789 = vmatpush3.msra.mxu0 %v36_v43  ;;  %v78_v7 = vld [vmem:[%s1462_s1 + $0x180] sm:$0xff]  ;;  %v185_v11 = vcombine.high %v183_v3, %v183_v3  ;;  %v157_v13 = vld [vmem:[%s1462_s1 + $0x3f8] sm:$0xff]  ;;  %v124_v16 = vld [vmem:[%s1462_s1 + $0x2f0] sm:$0xff] }
  0x17   :  { %824 = vmatpush3.msra.mxu1 %v68_v44  ;;  %790 = vmatprep.subr.mxu0 %v51_v45  ;;  %v30_v9 = vld [vmem:[%s1462_s1] sm:$0xff]  ;;  %v109_v14 = vld [vmem:[%s1462_s1 + $0x278] sm:$0xff]  ;;  %v156_v17 = vld [vmem:[%s1462_s1 + $0x3f0] sm:$0xff] }
  0x18   :  { %825 = vmatprep.subr.mxu1 %v83_v46  ;;  %791 = vmatpush3.msra.mxu0 %v35_v47  ;;  %v62_v10 = vld [vmem:[%s1462_s1 + $0x100] sm:$0xff]  ;;  %v141_v15 = vld [vmem:[%s1462_s1 + $0x378] sm:$0xff]  ;;  %v108_v18 = vld [vmem:[%s1462_s1 + $0x270] sm:$0xff] }
  0x19   :  { %826 = vmatpush3.msra.mxu1 %v67_v48  ;;  %792 = vmatprep.subr.mxu0 %v50_v49  ;;  %v140_v19 = vld [vmem:[%s1462_s1 + $0x370] sm:$0xff]  ;;  %v123_v20 = vld [vmem:[%s1462_s1 + $0x2e8] sm:$0xff]  ;;  %v122_v24 = vld [vmem:[%s1462_s1 + $0x2e0] sm:$0xff] }
  0x1a   :  { %827 = vmatprep.subr.mxu1 %v82_v50  ;;  %793 = vmatpush3.msra.mxu0 %v34_v52  ;;  %v155_v21 = vld [vmem:[%s1462_s1 + $0x3e8] sm:$0xff]  ;;  %v154_v25 = vld [vmem:[%s1462_s1 + $0x3e0] sm:$0xff]  ;;  %v121_v28 = vld [vmem:[%s1462_s1 + $0x2d8] sm:$0xff] }
  0x1b   :  { %828 = vmatpush3.msra.mxu1 %v66_v53  ;;  %794 = vmatprep.subr.mxu0 %v49_v55  ;;  %v107_v22 = vld [vmem:[%s1462_s1 + $0x268] sm:$0xff]  ;;  %v106_v26 = vld [vmem:[%s1462_s1 + $0x260] sm:$0xff]  ;;  %v153_v29 = vld [vmem:[%s1462_s1 + $0x3d8] sm:$0xff] }
  0x1c   :  { %829 = vmatprep.subr.mxu1 %v81_v56  ;;  %795 = vmatpush3.msra.mxu0 %v33_v58  ;;  %v139_v23 = vld [vmem:[%s1462_s1 + $0x368] sm:$0xff]  ;;  %v138_v27 = vld [vmem:[%s1462_s1 + $0x360] sm:$0xff]  ;;  %v105_v30 = vld [vmem:[%s1462_s1 + $0x258] sm:$0xff] }
  0x1d   :  { %830 = vmatpush3.msra.mxu1 %v65_v59  ;;  %796 = vmatprep.subr.mxu0 %v48_v60  ;;  %v137_v31 = vld [vmem:[%s1462_s1 + $0x358] sm:$0xff]  ;;  %v120_v32 = vld [vmem:[%s1462_s1 + $0x2d0] sm:$0xff] }
  0x1e   :  { %831 = vmatprep.subr.mxu1 %v80_v61  ;;  %797 = vmatpush3.msra.mxu0 %v32_v63  ;;  %v152_v33 = vld [vmem:[%s1462_s1 + $0x3d0] sm:$0xff] }
  0x1f   :  { %832 = vmatpush3.msra.mxu1 %v64_v0  ;;  %798 = vmatprep.subr.mxu0 %v47_v1  ;;  %v104_v34 = vld [vmem:[%s1462_s1 + $0x250] sm:$0xff] }
  0x20   :  { %833 = vmatprep.subr.mxu1 %v79_v2  ;;  %799 = vmatpush3.msra.mxu0 %v31_v4  ;;  %v136_v35 = vld [vmem:[%s1462_s1 + $0x350] sm:$0xff] }
  0x21   :  { %834 = vmatpush3.msra.mxu1 %v63_v5  ;;  %800 = vmatprep.subr.mxu0 %v46_v6 }
  0x22   :  { %835 = vmatprep.subr.mxu1 %v78_v7  ;;  %801 = vmatpush3.msra.mxu0 %v30_v9 }
  0x23   :  { %289 = vmatprep.mubr.f32.mxu0 %v184_v8  ;;  %836 = vmatpush3.msra.mxu1 %v62_v10 }
  0x24   :  { %290 = vmatmul.mubr.f32.vlgmr.msra.gmra.mxu0 %v176_v62  ;;  %359 = vmatprep.mubr.f32.mxu1 %v185_v11 }
  0x25   :  { %840 = vmatprep.subr.mxu0 %v125_v12  ;;  %875 = vmatprep.subr.mxu1 %v157_v13 }
  0x26   :  { %360 = vmatmul.mubr.f32.vlgmr.msra.gmra.mxu1 %v183_v3  ;;  %841 = vmatpush3.msra.mxu0 %v109_v14 }
  0x27   :  { %876 = vmatpush3.msra.mxu1 %v141_v15  ;;  %842 = vmatprep.subr.mxu0 %v124_v16 }
  0x28   :  { %877 = vmatprep.subr.mxu1 %v156_v17  ;;  %843 = vmatpush3.msra.mxu0 %v108_v18 }
  0x29   :  { %878 = vmatpush3.msra.mxu1 %v140_v19  ;;  %844 = vmatprep.subr.mxu0 %v123_v20 }
  0x2a   :  { %879 = vmatprep.subr.mxu1 %v155_v21  ;;  %845 = vmatpush3.msra.mxu0 %v107_v22 }
  0x2b   :  { %880 = vmatpush3.msra.mxu1 %v139_v23  ;;  %846 = vmatprep.subr.mxu0 %v122_v24 }
  0x2c   :  { %881 = vmatprep.subr.mxu1 %v154_v25  ;;  %847 = vmatpush3.msra.mxu0 %v106_v26 }
  0x2d   :  { %882 = vmatpush3.msra.mxu1 %v138_v27  ;;  %848 = vmatprep.subr.mxu0 %v121_v28 }
  0x2e   :  { %883 = vmatprep.subr.mxu1 %v153_v29 }
  0x2f   :  { %12 = vsyncpa [#allocation3], 0  ;;  %849 = vmatpush3.msra.mxu0 %v105_v30  ;;  %884 = vmatpush3.msra.mxu1 %v137_v31  ;;  %v119_v36 = vld [vmem:[%s1462_s1 + $0x2c8] sm:$0xff]  ;;  %v118_v40 = vld [vmem:[%s1462_s1 + $0x2c0] sm:$0xff]  ;;  %vm221_vm0 = vcmask 1043456   ;;  %v978_v19 = vmov 0.0  }
  0x30   :  { %v151_v37 = vld [vmem:[%s1462_s1 + $0x3c8] sm:$0xff]  ;;  %850 = vmatprep.subr.mxu0 %v120_v32  ;;  %885 = vmatprep.subr.mxu1 %v152_v33  ;;  %v150_v41 = vld [vmem:[%s1462_s1 + $0x3c0] sm:$0xff]  ;;  %v117_v44 = vld [vmem:[%s1462_s1 + $0x2b8] sm:$0xff]  ;;  %vm979_vm1 = vmmov 0   ;;  %vm218_vm2 = vcmask 31744   ;;  %vm587_vm3 = vcmask 261120  }
  0x31   :  { %v103_v38 = vld [vmem:[%s1462_s1 + $0x248] sm:$0xff]  ;;  %851 = vmatpush3.msra.mxu0 %v104_v34  ;;  %886 = vmatpush3.msra.mxu1 %v136_v35  ;;  %v102_v42 = vld [vmem:[%s1462_s1 + $0x240] sm:$0xff]  ;;  %v149_v45 = vld [vmem:[%s1462_s1 + $0x3b8] sm:$0xff]  ;;  %s980_s30 = smov [#allocation2]   ;;  %vm746_vm4 = vcmask 25600  }
  0x32   :  { %v135_v39 = vld [vmem:[%s1462_s1 + $0x348] sm:$0xff]  ;;  %852 = vmatprep.subr.mxu0 %v119_v36  ;;  %887 = vmatprep.subr.mxu1 %v151_v37  ;;  %v134_v43 = vld [vmem:[%s1462_s1 + $0x340] sm:$0xff]  ;;  %v101_v46 = vld [vmem:[%s1462_s1 + $0x238] sm:$0xff]  ;;  %s754_s8 = sshll.u32 %s980_s30, 4  ;;  %s755_s8 = int_to_ptr.vmem [resolvable:$true] %s754_s8 }
  0x33   :  { %853 = vmatpush3.msra.mxu0 %v103_v38  ;;  %888 = vmatpush3.msra.mxu1 %v135_v39  ;;  %v133_v47 = vld [vmem:[%s1462_s1 + $0x338] sm:$0xff]  ;;  %v116_v48 = vld [vmem:[%s1462_s1 + $0x2b0] sm:$0xff]  ;;  %v115_v53 = vld [vmem:[%s1462_s1 + $0x2a8] sm:$0xff]  ;;  %p960_p1 = scmp.lt.s32.totalorder %s755_s8, %s755_s8 }
  0x34   :  { %854 = vmatprep.subr.mxu0 %v118_v40  ;;  %889 = vmatprep.subr.mxu1 %v150_v41  ;;  %v148_v49 = vld [vmem:[%s1462_s1 + $0x3b0] sm:$0xff]  ;;  %v147_v54 = vld [vmem:[%s1462_s1 + $0x3a8] sm:$0xff]  ;;  %v114_v58 = vld [vmem:[%s1462_s1 + $0x2a0] sm:$0xff] }
  0x35   :  { %855 = vmatpush3.msra.mxu0 %v102_v42  ;;  %890 = vmatpush3.msra.mxu1 %v134_v43  ;;  %v100_v50 = vld [vmem:[%s1462_s1 + $0x230] sm:$0xff]  ;;  %v28_v55 = vld [vmem:[%s1461_s0 + $0x8] sm:$0xff]  ;;  %v146_v59 = vld [vmem:[%s1462_s1 + $0x3a0] sm:$0xff] }
  0x36   :  { %856 = vmatprep.subr.mxu0 %v117_v44  ;;  %891 = vmatprep.subr.mxu1 %v149_v45  ;;  %v132_v52 = vld [vmem:[%s1462_s1 + $0x330] sm:$0xff]  ;;  %v99_v56 = vld [vmem:[%s1462_s1 + $0x228] sm:$0xff]  ;;  %v98_v60 = vld [vmem:[%s1462_s1 + $0x220] sm:$0xff]  ;;  %v186_v62 = vcombine.high %v28_v55, %v28_v55  ;;  %v193_v5 = vrot.slane %v28_v55, %v1159_v51 }
  0x37   :  { %857 = vmatpush3.msra.mxu0 %v101_v46  ;;  %892 = vmatpush3.msra.mxu1 %v133_v47  ;;  %v131_v57 = vld [vmem:[%s1462_s1 + $0x328] sm:$0xff]  ;;  %v130_v61 = vld [vmem:[%s1462_s1 + $0x320] sm:$0xff]  ;;  %v113_v63 = vld [vmem:[%s1462_s1 + $0x298] sm:$0xff] }
  0x38   :  { %858 = vmatprep.subr.mxu0 %v116_v48  ;;  %893 = vmatprep.subr.mxu1 %v148_v49  ;;  %v145_v0 = vld [vmem:[%s1462_s1 + $0x398] sm:$0xff]  ;;  %v112_v3 = vld [vmem:[%s1462_s1 + $0x290] sm:$0xff]  ;;  %v200_v8 = vrot.slane %v186_v62, %v1159_v51  ;;  %v111_v9 = vld [vmem:[%s1462_s1 + $0x288] sm:$0xff]  ;;  %v201_v14 = vcombine.high %v193_v5, %v193_v5 }
  0x39   :  { %859 = vmatpush3.msra.mxu0 %v100_v50  ;;  %894 = vmatpush3.msra.mxu1 %v132_v52  ;;  %v97_v1 = vld [vmem:[%s1462_s1 + $0x218] sm:$0xff]  ;;  %v144_v4 = vld [vmem:[%s1462_s1 + $0x390] sm:$0xff]  ;;  %v143_v10 = vld [vmem:[%s1462_s1 + $0x388] sm:$0xff] }
  0x3a   :  { %860 = vmatprep.subr.mxu0 %v115_v53  ;;  %895 = vmatprep.subr.mxu1 %v147_v54  ;;  %v129_v2 = vld [vmem:[%s1462_s1 + $0x318] sm:$0xff]  ;;  %v96_v6 = vld [vmem:[%s1462_s1 + $0x210] sm:$0xff]  ;;  %v95_v11 = vld [vmem:[%s1462_s1 + $0x208] sm:$0xff]  ;;  %v202_v16 = vcombine.high %v200_v8, %v200_v8 }
  0x3b   :  { %861 = vmatpush3.msra.mxu0 %v99_v56  ;;  %896 = vmatpush3.msra.mxu1 %v131_v57  ;;  %v128_v7 = vld [vmem:[%s1462_s1 + $0x310] sm:$0xff]  ;;  %v127_v51 = vld [vmem:[%s1462_s1 + $0x308] sm:$0xff]  ;;  %v110_v12 = vld [vmem:[%s1462_s1 + $0x280] sm:$0xff] }
  0x3c   :  { %862 = vmatprep.subr.mxu0 %v114_v58  ;;  %897 = vmatprep.subr.mxu1 %v146_v59  ;;  %v142_v13 = vld [vmem:[%s1462_s1 + $0x380] sm:$0xff]  ;;  %v763_v20 = vld.sshfl [vmem:[%s1461_s0 + $0x10] sm:$0x3 pattern:$0x76325410]  ;;  %v579_v21 = vld [vmem:[%s1464_s3 + $0x18] sm:$0xff] }
  0x3d   :  { %863 = vmatpush3.msra.mxu0 %v98_v60  ;;  %898 = vmatpush3.msra.mxu1 %v130_v61  ;;  %v94_v15 = vld [vmem:[%s1462_s1 + $0x200] sm:$0xff]  ;;  %v578_v22 = vld [vmem:[%s1464_s3 + $0x10] sm:$0xff]  ;;  %v577_v23 = vld [vmem:[%s1464_s3 + $0x8] sm:$0xff] }
  0x3e   :  { %864 = vmatprep.subr.mxu0 %v113_v63  ;;  %899 = vmatprep.subr.mxu1 %v145_v0  ;;  %v126_v17 = vld [vmem:[%s1462_s1 + $0x300] sm:$0xff]  ;;  %v665_v25 = vld [vmem:[%s1466_s5 + $0x18] sm:$0xff]  ;;  %v664_v47 = vld [vmem:[%s1466_s5 + $0x10] sm:$0xff] }
  0x3f   :  { %865 = vmatpush3.msra.mxu0 %v97_v1  ;;  %900 = vmatpush3.msra.mxu1 %v129_v2  ;;  %v158_v18 = vld [vmem:[%s1462_s1 + $0x400] sm:$0xf]  ;;  %v663_v48 = vld [vmem:[%s1466_s5 + $0x8] sm:$0xff] }
  0x40   :  { %866 = vmatprep.subr.mxu0 %v112_v3  ;;  %901 = vmatprep.subr.mxu1 %v144_v4  ;;  %v576_v24 = vld [vmem:[%s1464_s3] sm:$0xff] }
  0x41   :  { %867 = vmatpush3.msra.mxu0 %v96_v6  ;;  %902 = vmatpush3.msra.mxu1 %v128_v7  ;;  %v762_v30 = vld [vmem:[%s1463_s2] ss:$0 sm:$0xff] }
  0x42   :  { %868 = vmatprep.subr.mxu0 %v111_v9  ;;  %903 = vmatprep.subr.mxu1 %v143_v10  ;;  %v662_v49 = vld [vmem:[%s1466_s5] sm:$0xff]  ;;  %s955_s5 = scalar_lea.vmem %s755_s8, 32 }
  0x43   :  { %869 = vmatpush3.msra.mxu0 %v95_v11  ;;  %904 = vmatpush3.msra.mxu1 %v127_v51  ;;  %v766_v50 = vld [vmem:[%s1465_s4] ss:$0 sm:$0xff]  ;;  %p956_p0 = scmp.ne.s32.totalorder %s755_s8, %s955_s5  ;;  %p961_p2 = scmp.lt.s32.totalorder %s955_s5, %s955_s5 }
  0x44   :  { %870 = vmatprep.subr.mxu0 %v110_v12  ;;  %905 = vmatprep.subr.mxu1 %v142_v13  ;;  %v768_v56 = vld [vmem:[%s1467_s6] ss:$0 sm:$0xff] }
  0x45   :  { %871 = vmatpush3.msra.mxu0 %v94_v15  ;;  %429 = vmatprep.mubr.f32.mxu0 %v201_v14  ;;  %p962_p3 = por %p961_p2, %p960_p1 }
  0x46   :  { %906 = vmatpush3.msra.mxu1 %v126_v17  ;;  %499 = vmatprep.mubr.f32.mxu1 %v202_v16 }
  0x47   :  { %430 = vmatmul.mubr.f32.vlgmr.msra.gmra.mxu0 %v193_v5  ;;  %500 = vmatmul.mubr.f32.vlgmr.msra.gmra.mxu1 %v200_v8  ;;  %p963_p4 = pnand %p962_p3, %p956_p0 }
  0x48   :  { %922 = vmatprep.subr.mxu0 %v978_v19  ;;  %924 = vmatprep.mubr.msk.f32.mxu0 %vm979_vm1, %v978_v19 }
  0x49   :  { %923 = vmatpush3.msk.msra.mxu0 %vm221_vm0, %v158_v18  ;;  %927 = vmatprep.subr.mxu1 %v978_v19 }
  0x4a   :  { %935 = vmatprep.mubr.msk.f32.mxu1 %vm979_vm1, %v978_v19  ;;  %938 = vmatprep.subr.mxu0 %v978_v19 }
  0x4b   :  { %925 = vmatmul.mubr.msk.f32.vlgmr.msra.gmra.mxu0 %vm218_vm2, %v763_v20  ;;  %928 = vmatpush3.msra.mxu1 %v579_v21 }
  0x4c   :  { %946 = vmatprep.mubr.msk.f32.mxu0 %vm979_vm1, %v978_v19  ;;  %929 = vmatprep.subr.mxu1 %v978_v19 }
  0x4d   :  { %930 = vmatpush3.msra.mxu1 %v578_v22  ;;  %939 = vmatpush3.msra.mxu0 %v665_v25 }
  0x4e   :  { %931 = vmatprep.subr.mxu1 %v978_v19  ;;  %940 = vmatprep.subr.mxu0 %v978_v19 }
  0x4f   :  { %932 = vmatpush3.msra.mxu1 %v577_v23  ;;  %941 = vmatpush3.msra.mxu0 %v664_v47 }
  0x50   :  { %933 = vmatprep.subr.mxu1 %v978_v19  ;;  %942 = vmatprep.subr.mxu0 %v978_v19 }
  0x51   :  { %934 = vmatpush3.msra.mxu1 %v576_v24  ;;  %943 = vmatpush3.msra.mxu0 %v663_v48 }
  0x52   :  { %944 = vmatprep.subr.mxu0 %v978_v19 }
  0x53   :  { %945 = vmatpush3.msra.mxu0 %v662_v49 }
  0xe4   :  { %v802_v26 = vpop.f32.mrf.mxu0 }
  0xe6   :  { %v837_v27 = vpop.f32.mrf.mxu1  ;;  %v803_v28 = vpop.f32.mrf.mxu0 }
  0xe7   :  { %v804_v29 = vadd.f32 %v803_v28, %v802_v26 }
  0xe8   :  { %v838_v31 = vpop.f32.mrf.mxu1 }
  0xe9   :  { %v292_v32 = vadd.f32 %v804_v29, %v762_v30  ;;  %v839_v33 = vadd.f32 %v838_v31, %v837_v27 }
  0xeb   :  { %v362_v38 = vadd.f32 %v839_v33, %v292_v32 }
 0x107   :  { %v872_v34 = vpop.f32.mrf.mxu0  ;;  %v907_v35 = vpop.f32.mrf.mxu1 }
 0x109   :  { %v873_v36 = vpop.f32.mrf.mxu0  ;;  %v908_v37 = vpop.f32.mrf.mxu1 }
 0x10a   :  { %v874_v39 = vadd.f32 %v873_v36, %v872_v34  ;;  %v909_v42 = vadd.f32 %v908_v37, %v907_v35 }
 0x10b   :  { %v571_v40 = vpop.f32.mrf.mxu0 }
 0x10c   :  { %v432_v41 = vadd.f32 %v874_v39, %v362_v38 }
 0x10d   :  { %v926_v43 = vpop.f32.mrf.mxu0 }
 0x10e   :  { %v502_v44 = vadd.f32 %v909_v42, %v432_v41 }
 0x110   :  { %v572_v45 = vadd.f32 %v571_v40, %v502_v44 }
 0x112   :  { %v575_v46 = vmax.f32 %v572_v45, 0.0 }
 0x114   :  { %936 = vmatmul.mubr.msk.f32.vlgmr.msra.gmra.mxu1 %vm587_vm3, %v575_v46 }
 0x1d4   :  { %v657_v52 = vpop.f32.mrf.mxu1 }
 0x1d5   :  { %v658_v53 = vadd.f32 %v766_v50, %v657_v52 }
 0x1d6   :  { %v937_v54 = vpop.f32.mrf.mxu1 }
 0x1d7   :  { %v661_v55 = vmax.f32 %v658_v53, 0.0 }
 0x1d9   :  { %947 = vmatmul.mubr.msk.f32.vlgmr.msra.gmra.mxu0 %vm587_vm3, %v661_v55 }
 0x299   :  { %v742_v57 = vpop.f32.mrf.mxu0 }
 0x29a   :  { %v743_v58 = vadd.f32 %v768_v56, %v742_v57 }
 0x29b   :  { %v948_v59 = vpop.f32.mrf.mxu0 }
 0x29c   :  { %747 = vst.msk [vmem:[#allocation2] sm:$0x3] %vm746_vm4, %v743_v58 }
 0x29d   :  { %966 = shalt.err (!%p963_p4)
}
 0x29e   :  { %757 = dma.vmem_to_hbm [thread:$0]  %s755_s8, 32, %s1468_s7, [#allocation3]  }
 0x29f   :  { %975 = dma.done.wait [#allocation3], 32  }
 0x2a0   :  { %976 = vsyncadd [#allocation3], 4294967264 }
 0x2a1   :  { %761 = vsyncpa [#allocation3], 1 }

// kernel: relative_scalars_forward.2
= control target key start
LH: loop header
LB: loop body
LE: loop exit
PB: predicated region body
PF: predicated region fallthrough
CT: control target
= control target key end

     0   :  { %s5844_s18 = smov 0   ;;  %s7357_s0 = inlined_call_operand.vmem [shape: f32[2,2,10,10,4], index: 0, kind: input, shape index: {}]   ;;  %s7358_s1 = inlined_call_operand.vmem [shape: f32[2,3,3,4,8], index: 1, kind: input, shape index: {}]   ;;  %s7359_s2 = inlined_call_operand.vmem [shape: f32[2,1,8], index: 2, kind: input, shape index: {}]   ;;  %s7360_s3 = inlined_call_operand.vmem [shape: f32[2,3,3,8,8], index: 3, kind: input, shape index: {}]   ;;  %s7361_s4 = inlined_call_operand.vmem [shape: f32[2,1,8], index: 4, kind: input, shape index: {}]   ;;  %s7362_s5 = inlined_call_operand.vmem [shape: f32[2,128,8], index: 5, kind: output, shape index: {}]  }
   0x1 LB: > { %s4595_s19 = sadd.s32 4294967295, %s5811_s18   ;;  %p4599_p0 = scmp.ge.s32.totalorder %s5811_s18, 1  ;;  %s5811_s18 = sphi %s5844_s18, %s15_s18  }
   0x2   : > { %p223_p1 = scmp.lt.s32.totalorder %s5811_s18, 3 }
   0x4   : > { %p224_p2 = pnand %p4599_p0, %p223_p1 }
   0x6   : > { %227 = sbr.rel (%p224_p2) target bundleno = 717 (0x2cd), region = 40 }
   0xb   : > { %p267_p3 = scmp.lt.s32.totalorder %s4595_s19, 1  ;;  %vm328_vm0 = vcmask 31744   ;;  %vm377_vm1 = vcmask 1043456   ;;  %vm2373_vm2 = vcmask 64512   ;;  %vm2375_vm3 = vcmask 58368  }
   0xd   : > { %s7502_s19 = smov (!%p267_p3, %s4595_s19), 1 }
   0xe   : > { %s5793_s20 = smul.u32 320, %s7502_s19  ;;  %s279_s9 = scalar_lea.vmem %s7359_s2, %s7502_s19 }
   0xf   : > { %s5794_s21 = smul.u32 36, %s7502_s19  ;;  %s287_s12 = scalar_lea.vmem %s7361_s4, %s7502_s19 }
  0x10   : > { %s5859_s24 = scalar_lea.vmem %s7357_s0, %s5793_s20  ;;  %s5795_s28 = smul.u32 72, %s7502_s19 }
  0x11   : > { %s5864_s27 = scalar_lea.vmem %s7358_s1, %s5794_s21  ;;  %v310_v0 = vld [vmem:[%s5859_s24 + $0x1] sm:$0xff]  ;;  %v5869_v2 = vld [vmem:[%s5859_s24 + $0x11] sm:$0xff]  ;;  %s5018_s13 = sshll.u32 %s7502_s19, 7 }
  0x12   : > { %v293_v1 = vld [vmem:[%s5859_s24] sm:$0xff]  ;;  %5327 = vmatprep.mubr.msk.f32.mxu0 %vm328_vm0, %v310_v0  ;;  %v5876_v5 = vld [vmem:[%s5859_s24 + $0x10] sm:$0xff]  ;;  %v4640_v6 = vld [vmem:[%s5864_s27 + $0x8] sm:$0xf]  ;;  %s6309_s6 = scalar_lea.vmem %s7360_s3, %s5795_s28  ;;  %s7258_s16 = scalar_lea.vmem %s7362_s5, %s5018_s13 }
  0x13   : > { %v4605_v3 = vld [vmem:[%s5864_s27 + $0x4] sm:$0xf]  ;;  %v309_v4 = vld [vmem:[%s5864_s27] sm:$0xf]  ;;  %5353 = vmatprep.mubr.msk.f32.mxu1 %vm328_vm0, %v293_v1  ;;  %v5897_v9 = vld [vmem:[%s5859_s24 + $0x31] sm:$0xff] }
  0x14   : > { %5325 = vmatprep.subr.msk.mxu0 %vm377_vm1, %v4605_v3  ;;  %5351 = vmatprep.subr.msk.mxu1 %vm377_vm1, %v309_v4  ;;  %v5882_v7 = vld [vmem:[%s5859_s24 + $0x21] sm:$0xff]  ;;  %v5900_v10 = vld [vmem:[%s5859_s24 + $0x30] sm:$0xff]  ;;  %v4674_v17 = vld [vmem:[%s5864_s27 + $0xc] sm:$0xf] }
  0x15   : > { %5326 = vmatpush3.msk.msra.mxu0 %vm377_vm1, %v4605_v3  ;;  %5352 = vmatpush3.msk.msra.mxu1 %vm377_vm1, %v309_v4  ;;  %v5887_v8 = vld [vmem:[%s5859_s24 + $0x20] sm:$0xff]  ;;  %v5920_v13 = vld [vmem:[%s5859_s24 + $0x51] sm:$0xff]  ;;  %v4810_v42 = vld [vmem:[%s5864_s27 + $0x1c] sm:$0xf] }
  0x16   : > { %5328 = vmatmul.mubr.msk.f32.vlgmr.msra.gmra.mxu0 %vm328_vm0, %v5869_v2  ;;  %5354 = vmatmul.mubr.msk.f32.vlgmr.msra.gmra.mxu1 %vm328_vm0, %v5876_v5  ;;  %v5906_v11 = vld [vmem:[%s5859_s24 + $0x41] sm:$0xff]  ;;  %v5923_v14 = vld [vmem:[%s5859_s24 + $0x50] sm:$0xff]  ;;  %v4776_v41 = vld [vmem:[%s5864_s27 + $0x18] sm:$0xf] }
  0x17   : > { %5377 = vmatprep.subr.msk.mxu0 %vm377_vm1, %v4640_v6  ;;  %5330 = vmatprep.mubr.msk.f32.mxu0 %vm328_vm0, %v5882_v7  ;;  %v5909_v12 = vld [vmem:[%s5859_s24 + $0x40] sm:$0xff]  ;;  %v4708_v18 = vld [vmem:[%s5864_s27 + $0x10] sm:$0xf]  ;;  %v4742_v27 = vld [vmem:[%s5864_s27 + $0x14] sm:$0xf] }
  0x18   : > { %5378 = vmatpush3.msk.msra.mxu0 %vm377_vm1, %v4640_v6  ;;  %5356 = vmatprep.mubr.msk.f32.mxu1 %vm328_vm0, %v5887_v8  ;;  %v5926_v15 = vld [vmem:[%s5859_s24 + $0x61] sm:$0xff]  ;;  %v5942_v19 = vld [vmem:[%s5859_s24 + $0x71] sm:$0xff] }
  0x19   : > { %v5929_v16 = vld [vmem:[%s5859_s24 + $0x60] sm:$0xff]  ;;  %v5945_v20 = vld [vmem:[%s5859_s24 + $0x70] sm:$0xff]  ;;  %5403 = vmatprep.subr.msk.mxu1 %vm377_vm1, %v4674_v17  ;;  %5429 = vmatprep.subr.msk.mxu0 %vm377_vm1, %v4708_v18 }
  0x1a   : > { %5331 = vmatmul.mubr.msk.f32.gmra.mxu0 %vm328_vm0, %v5897_v9  ;;  %5357 = vmatmul.mubr.msk.f32.gmra.mxu1 %vm328_vm0, %v5900_v10  ;;  %v318_v21 = vld [vmem:[%s5859_s24 + $0xa1] sm:$0xff]  ;;  %v5959_v23 = vld [vmem:[%s5859_s24 + $0xb1] sm:$0xff] }
  0x1b   : > { %5333 = vmatprep.mubr.msk.f32.mxu0 %vm328_vm0, %v5906_v11  ;;  %5359 = vmatprep.mubr.msk.f32.mxu1 %vm328_vm0, %v5909_v12  ;;  %v301_v22 = vld [vmem:[%s5859_s24 + $0xa0] sm:$0xff]  ;;  %v5962_v24 = vld [vmem:[%s5859_s24 + $0xb0] sm:$0xff] }
  0x1c   : > { %5404 = vmatpush3.msk.msra.mxu1 %vm377_vm1, %v4674_v17  ;;  %v5965_v25 = vld [vmem:[%s5859_s24 + $0xc1] sm:$0xff]  ;;  %v5981_v28 = vld [vmem:[%s5859_s24 + $0xd1] sm:$0xff] }
  0x1d   : > { %v5968_v26 = vld [vmem:[%s5859_s24 + $0xc0] sm:$0xff]  ;;  %5455 = vmatprep.subr.msk.mxu1 %vm377_vm1, %v4742_v27  ;;  %v5984_v29 = vld [vmem:[%s5859_s24 + $0xd0] sm:$0xff] }
  0x1e   : > { %5334 = vmatmul.mubr.msk.f32.gmra.mxu0 %vm328_vm0, %v5920_v13  ;;  %5360 = vmatmul.mubr.msk.f32.gmra.mxu1 %vm328_vm0, %v5923_v14  ;;  %v5987_v30 = vld [vmem:[%s5859_s24 + $0xe1] sm:$0xff]  ;;  %v6001_v32 = vld [vmem:[%s5859_s24 + $0xf1] sm:$0xff] }
  0x1f   : > { %5336 = vmatprep.mubr.msk.f32.mxu0 %vm328_vm0, %v5926_v15  ;;  %5362 = vmatprep.mubr.msk.f32.mxu1 %vm328_vm0, %v5929_v16  ;;  %v5990_v31 = vld [vmem:[%s5859_s24 + $0xe0] sm:$0xff]  ;;  %v6004_v33 = vld [vmem:[%s5859_s24 + $0xf0] sm:$0xff] }
  0x20   : > { %v6007_v34 = vld [vmem:[%s5859_s24 + $0x101] sm:$0xff]  ;;  %v6021_v36 = vld [vmem:[%s5859_s24 + $0x111] sm:$0xff] }
  0x21   : > { %v6010_v35 = vld [vmem:[%s5859_s24 + $0x100] sm:$0xff]  ;;  %v6024_v37 = vld [vmem:[%s5859_s24 + $0x110] sm:$0xff] }
  0x22   : > { %5337 = vmatmul.mubr.msk.f32.gmra.mxu0 %vm328_vm0, %v5942_v19  ;;  %5363 = vmatmul.mubr.msk.f32.gmra.mxu1 %vm328_vm0, %v5945_v20  ;;  %v722_v38 = vld [vmem:[%s5859_s24 + $0x2] sm:$0xff]  ;;  %v723_v39 = vld [vmem:[%s5859_s24 + $0x12] sm:$0xff] }
  0x23   : > { %5339 = vmatprep.mubr.msk.f32.mxu0 %vm328_vm0, %v318_v21  ;;  %5365 = vmatprep.mubr.msk.f32.mxu1 %vm328_vm0, %v301_v22  ;;  %v6036_v40 = vld [vmem:[%s5859_s24 + $0x22] sm:$0xff]  ;;  %v6047_v43 = vld [vmem:[%s5859_s24 + $0x32] sm:$0xff] }
  0x24   : > { %v6052_v44 = vld [vmem:[%s5859_s24 + $0x42] sm:$0xff]  ;;  %v6064_v45 = vld [vmem:[%s5859_s24 + $0x52] sm:$0xff] }
  0x25   : > { %v6069_v46 = vld [vmem:[%s5859_s24 + $0x62] sm:$0xff]  ;;  %v6078_v47 = vld [vmem:[%s5859_s24 + $0x72] sm:$0xff] }
  0x26   : > { %5340 = vmatmul.mubr.msk.f32.gmra.mxu0 %vm328_vm0, %v5959_v23  ;;  %5366 = vmatmul.mubr.msk.f32.gmra.mxu1 %vm328_vm0, %v5962_v24  ;;  %v6083_v48 = vld [vmem:[%s5859_s24 + $0x80] sm:$0xff]  ;;  %v731_v50 = vld [vmem:[%s5859_s24 + $0xb2] sm:$0xff] }
  0x27   : > { %5342 = vmatprep.mubr.msk.f32.mxu0 %vm328_vm0, %v5965_v25  ;;  %5368 = vmatprep.mubr.msk.f32.mxu1 %vm328_vm0, %v5968_v26  ;;  %v730_v49 = vld [vmem:[%s5859_s24 + $0xa2] sm:$0xff]  ;;  %v6103_v52 = vld [vmem:[%s5859_s24 + $0xd2] sm:$0xff] }
  0x28   : > { %v6095_v51 = vld [vmem:[%s5859_s24 + $0xc2] sm:$0xff]  ;;  %v6117_v54 = vld [vmem:[%s5859_s24 + $0xf2] sm:$0xff] }
  0x29   : > { %v6108_v53 = vld [vmem:[%s5859_s24 + $0xe2] sm:$0xff]  ;;  %v6131_v56 = vld [vmem:[%s5859_s24 + $0x112] sm:$0xff] }
  0x2a   : > { %5343 = vmatmul.mubr.msk.f32.gmra.mxu0 %vm328_vm0, %v5981_v28  ;;  %5369 = vmatmul.mubr.msk.f32.gmra.mxu1 %vm328_vm0, %v5984_v29  ;;  %v6122_v55 = vld [vmem:[%s5859_s24 + $0x102] sm:$0xff]  ;;  %v4767_v63 = vld [vmem:[%s5859_s24 + $0x90] sm:$0xff] }
  0x2b   : > { %5345 = vmatprep.mubr.msk.f32.mxu0 %vm328_vm0, %v5987_v30  ;;  %5371 = vmatprep.mubr.msk.f32.mxu1 %vm328_vm0, %v5990_v31  ;;  %v6136_v57 = vld [vmem:[%s5859_s24 + $0x120] sm:$0xff]  ;;  %v4801_v0 = vld [vmem:[%s5859_s24 + $0x91] sm:$0xff] }
  0x2c   : > { %v4844_v58 = vld [vmem:[%s5864_s27 + $0x20] sm:$0xf]  ;;  %v4775_v1 = vld [vmem:[%s5859_s24 + $0x130] sm:$0xff] }
  0x2d   : > { %v4699_v59 = vld [vmem:[%s5859_s24 + $0x81] sm:$0xff]  ;;  %v4835_v3 = vld [vmem:[%s5859_s24 + $0x92] sm:$0xff] }
  0x2e   : > { %5346 = vmatmul.mubr.msk.f32.gmra.mxu0 %vm328_vm0, %v6001_v32  ;;  %5372 = vmatmul.mubr.msk.f32.gmra.mxu1 %vm328_vm0, %v6004_v33  ;;  %v6175_v60 = vld [vmem:[%s5859_s24 + $0x82] sm:$0xff]  ;;  %v4843_v4 = vld [vmem:[%s5859_s24 + $0x132] sm:$0xff] }
  0x2f   : > { %5348 = vmatprep.mubr.msk.f32.mxu0 %vm328_vm0, %v6007_v34  ;;  %5374 = vmatprep.mubr.msk.f32.mxu1 %vm328_vm0, %v6010_v35  ;;  %v4707_v61 = vld [vmem:[%s5859_s24 + $0x121] sm:$0xff] }
  0x30   : > { %v4741_v62 = vld [vmem:[%s5859_s24 + $0x122] sm:$0xff] }
  0x32   : > { %5349 = vmatmul.mubr.msk.f32.gmra.mxu0 %vm328_vm0, %v6021_v36  ;;  %5375 = vmatmul.mubr.msk.f32.gmra.mxu1 %vm328_vm0, %v6024_v37 }
  0x33   : > { %5379 = vmatprep.mubr.msk.f32.mxu0 %vm328_vm0, %v722_v38  ;;  %5405 = vmatprep.mubr.msk.f32.mxu1 %vm328_vm0, %v5876_v5  ;;  %v4863_v5 = vld [vmem:[%s6309_s6 + $0x8] sm:$0xff] }
  0x36   : > { %5380 = vmatmul.mubr.msk.f32.vlgmr.msra.gmra.mxu0 %vm328_vm0, %v723_v39  ;;  %5406 = vmatmul.mubr.msk.f32.vlgmr.msra.gmra.mxu1 %vm328_vm0, %v5887_v8 }
  0x37   : > { %5430 = vmatpush3.msk.msra.mxu0 %vm377_vm1, %v4708_v18  ;;  %5382 = vmatprep.mubr.msk.f32.mxu0 %vm328_vm0, %v6036_v40 }
  0x38   : > { %5408 = vmatprep.mubr.msk.f32.mxu1 %vm328_vm0, %v5900_v10  ;;  %5456 = vmatpush3.msk.msra.mxu1 %vm377_vm1, %v4742_v27  ;;  %v2448_v27 = vld [vmem:[%s6309_s6] sm:$0xff] }
  0x39   : > { %5481 = vmatprep.subr.msk.mxu0 %vm377_vm1, %v4776_v41  ;;  %5507 = vmatprep.subr.msk.mxu1 %vm377_vm1, %v4810_v42 }
  0x3a   : > { %5383 = vmatmul.mubr.msk.f32.gmra.mxu0 %vm328_vm0, %v6047_v43  ;;  %5409 = vmatmul.mubr.msk.f32.gmra.mxu1 %vm328_vm0, %v5909_v12 }
  0x3b   : > { %5385 = vmatprep.mubr.msk.f32.mxu0 %vm328_vm0, %v6052_v44  ;;  %5411 = vmatprep.mubr.msk.f32.mxu1 %vm328_vm0, %v5923_v14 }
  0x3e   : > { %5386 = vmatmul.mubr.msk.f32.gmra.mxu0 %vm328_vm0, %v6064_v45  ;;  %5412 = vmatmul.mubr.msk.f32.gmra.mxu1 %vm328_vm0, %v5929_v16 }
  0x3f   : > { %5388 = vmatprep.mubr.msk.f32.mxu0 %vm328_vm0, %v6069_v46  ;;  %5414 = vmatprep.mubr.msk.f32.mxu1 %vm328_vm0, %v5945_v20 }
  0x42   : > { %5389 = vmatmul.mubr.msk.f32.gmra.mxu0 %vm328_vm0, %v6078_v47  ;;  %5415 = vmatmul.mubr.msk.f32.gmra.mxu1 %vm328_vm0, %v6083_v48 }
  0x43   : > { %5391 = vmatprep.mubr.msk.f32.mxu0 %vm328_vm0, %v730_v49  ;;  %5417 = vmatprep.mubr.msk.f32.mxu1 %vm328_vm0, %v5962_v24 }
  0x46   : > { %5392 = vmatmul.mubr.msk.f32.gmra.mxu0 %vm328_vm0, %v731_v50  ;;  %5418 = vmatmul.mubr.msk.f32.gmra.mxu1 %vm328_vm0, %v5968_v26 }
  0x47   : > { %5394 = vmatprep.mubr.msk.f32.mxu0 %vm328_vm0, %v6095_v51  ;;  %5420 = vmatprep.mubr.msk.f32.mxu1 %vm328_vm0, %v5984_v29 }
  0x4a   : > { %5395 = vmatmul.mubr.msk.f32.gmra.mxu0 %vm328_vm0, %v6103_v52  ;;  %5421 = vmatmul.mubr.msk.f32.gmra.mxu1 %vm328_vm0, %v5990_v31 }
  0x4b   : > { %5397 = vmatprep.mubr.msk.f32.mxu0 %vm328_vm0, %v6108_v53  ;;  %5423 = vmatprep.mubr.msk.f32.mxu1 %vm328_vm0, %v6004_v33 }
  0x4e   : > { %5398 = vmatmul.mubr.msk.f32.gmra.mxu0 %vm328_vm0, %v6117_v54  ;;  %5424 = vmatmul.mubr.msk.f32.gmra.mxu1 %vm328_vm0, %v6010_v35 }
  0x4f   : > { %5400 = vmatprep.mubr.msk.f32.mxu0 %vm328_vm0, %v6122_v55  ;;  %5426 = vmatprep.mubr.msk.f32.mxu1 %vm328_vm0, %v6024_v37 }
  0x52   : > { %5401 = vmatmul.mubr.msk.f32.gmra.mxu0 %vm328_vm0, %v6131_v56  ;;  %5427 = vmatmul.mubr.msk.f32.gmra.mxu1 %vm328_vm0, %v6136_v57 }
  0x53   : > { %5431 = vmatprep.mubr.msk.f32.mxu0 %vm328_vm0, %v5869_v2  ;;  %5457 = vmatprep.mubr.msk.f32.mxu1 %vm328_vm0, %v723_v39  ;;  %v4809_v2 = vld [vmem:[%s5859_s24 + $0x131] sm:$0xff] }
  0x56   : > { %5432 = vmatmul.mubr.msk.f32.vlgmr.msra.gmra.mxu0 %vm328_vm0, %v5882_v7  ;;  %5458 = vmatmul.mubr.msk.f32.vlgmr.msra.gmra.mxu1 %vm328_vm0, %v6036_v40 }
  0x57   : > { %5482 = vmatpush3.msk.msra.mxu0 %vm377_vm1, %v4776_v41  ;;  %5434 = vmatprep.mubr.msk.f32.mxu0 %vm328_vm0, %v5897_v9 }
  0x58   : > { %5460 = vmatprep.mubr.msk.f32.mxu1 %vm328_vm0, %v6047_v43  ;;  %5508 = vmatpush3.msk.msra.mxu1 %vm377_vm1, %v4810_v42 }
  0x59   : > { %5533 = vmatprep.subr.msk.mxu0 %vm377_vm1, %v4844_v58  ;;  %5559 = vmatprep.subr.mxu1 %v4863_v5 }
  0x5a   : > { %5435 = vmatmul.mubr.msk.f32.gmra.mxu0 %vm328_vm0, %v5906_v11  ;;  %5461 = vmatmul.mubr.msk.f32.gmra.mxu1 %vm328_vm0, %v6052_v44 }
  0x5b   : > { %5437 = vmatprep.mubr.msk.f32.mxu0 %vm328_vm0, %v5920_v13  ;;  %5463 = vmatprep.mubr.msk.f32.mxu1 %vm328_vm0, %v6064_v45 }
  0x5e   : > { %5438 = vmatmul.mubr.msk.f32.gmra.mxu0 %vm328_vm0, %v5926_v15  ;;  %5464 = vmatmul.mubr.msk.f32.gmra.mxu1 %vm328_vm0, %v6069_v46 }
  0x5f   : > { %5440 = vmatprep.mubr.msk.f32.mxu0 %vm328_vm0, %v5942_v19  ;;  %5466 = vmatprep.mubr.msk.f32.mxu1 %vm328_vm0, %v6078_v47 }
  0x62   : > { %5441 = vmatmul.mubr.msk.f32.gmra.mxu0 %vm328_vm0, %v4699_v59  ;;  %5467 = vmatmul.mubr.msk.f32.gmra.mxu1 %vm328_vm0, %v6175_v60 }
  0x63   : > { %5443 = vmatprep.mubr.msk.f32.mxu0 %vm328_vm0, %v5959_v23  ;;  %5469 = vmatprep.mubr.msk.f32.mxu1 %vm328_vm0, %v731_v50 }
  0x66   : > { %5444 = vmatmul.mubr.msk.f32.gmra.mxu0 %vm328_vm0, %v5965_v25  ;;  %5470 = vmatmul.mubr.msk.f32.gmra.mxu1 %vm328_vm0, %v6095_v51 }
  0x67   : > { %5446 = vmatprep.mubr.msk.f32.mxu0 %vm328_vm0, %v5981_v28  ;;  %5472 = vmatprep.mubr.msk.f32.mxu1 %vm328_vm0, %v6103_v52 }
  0x6a   : > { %5447 = vmatmul.mubr.msk.f32.gmra.mxu0 %vm328_vm0, %v5987_v30  ;;  %5473 = vmatmul.mubr.msk.f32.gmra.mxu1 %vm328_vm0, %v6108_v53 }
  0x6b   : > { %5449 = vmatprep.mubr.msk.f32.mxu0 %vm328_vm0, %v6001_v32  ;;  %5475 = vmatprep.mubr.msk.f32.mxu1 %vm328_vm0, %v6117_v54 }
  0x6e   : > { %5450 = vmatmul.mubr.msk.f32.gmra.mxu0 %vm328_vm0, %v6007_v34  ;;  %5476 = vmatmul.mubr.msk.f32.gmra.mxu1 %vm328_vm0, %v6122_v55 }
  0x6f   : > { %5452 = vmatprep.mubr.msk.f32.mxu0 %vm328_vm0, %v6021_v36  ;;  %5478 = vmatprep.mubr.msk.f32.mxu1 %vm328_vm0, %v6131_v56 }
  0x72   : > { %5453 = vmatmul.mubr.msk.f32.gmra.mxu0 %vm328_vm0, %v4707_v61  ;;  %5479 = vmatmul.mubr.msk.f32.gmra.mxu1 %vm328_vm0, %v4741_v62 }
  0x73   : > { %5483 = vmatprep.mubr.msk.f32.mxu0 %vm328_vm0, %v5887_v8  ;;  %5509 = vmatprep.mubr.msk.f32.mxu1 %vm328_vm0, %v5882_v7 }
  0x76   : > { %5484 = vmatmul.mubr.msk.f32.vlgmr.msra.gmra.mxu0 %vm328_vm0, %v5900_v10  ;;  %5510 = vmatmul.mubr.msk.f32.vlgmr.msra.gmra.mxu1 %vm328_vm0, %v5897_v9 }
  0x77   : > { %5534 = vmatpush3.msk.msra.mxu0 %vm377_vm1, %v4844_v58  ;;  %5486 = vmatprep.mubr.msk.f32.mxu0 %vm328_vm0, %v5909_v12 }
  0x78   : > { %5512 = vmatprep.mubr.msk.f32.mxu1 %vm328_vm0, %v5906_v11  ;;  %5560 = vmatpush3.msra.mxu1 %v4863_v5 }
  0x79   : > { %5585 = vmatprep.subr.mxu0 %v2448_v27 }
  0x7a   : > { %5487 = vmatmul.mubr.msk.f32.gmra.mxu0 %vm328_vm0, %v5923_v14  ;;  %5513 = vmatmul.mubr.msk.f32.gmra.mxu1 %vm328_vm0, %v5920_v13 }
  0x7b   : > { %5489 = vmatprep.mubr.msk.f32.mxu0 %vm328_vm0, %v5929_v16  ;;  %5515 = vmatprep.mubr.msk.f32.mxu1 %vm328_vm0, %v5926_v15  ;;  %v5813_v16 = vmov 0.0  }
  0x7c   : > { %2379 = vst.msk [vmem:[#allocation2 + $0x20] sm:$0xff] %vm2373_vm2, %v5813_v16  ;;  %2374 = vst.msk [vmem:[#allocation2] sm:$0xff] %vm2373_vm2, %v5813_v16 }
  0x7d   : > { %2380 = vst.msk [vmem:[#allocation2 + $0x28] sm:$0x3] %vm2375_vm3, %v5813_v16  ;;  %2376 = vst.msk [vmem:[#allocation2 + $0x8] sm:$0x3] %vm2375_vm3, %v5813_v16 }
  0x7e   : > { %5490 = vmatmul.mubr.msk.f32.gmra.mxu0 %vm328_vm0, %v5945_v20  ;;  %5516 = vmatmul.mubr.msk.f32.gmra.mxu1 %vm328_vm0, %v5942_v19  ;;  %2377 = vst.msk [vmem:[#allocation2 + $0x10] sm:$0xff] %vm2373_vm2, %v5813_v16  ;;  %2381 = vst.msk [vmem:[#allocation2 + $0x30] sm:$0xff] %vm2373_vm2, %v5813_v16 }
  0x7f   : > { %5492 = vmatprep.mubr.msk.f32.mxu0 %vm328_vm0, %v6083_v48  ;;  %5518 = vmatprep.mubr.msk.f32.mxu1 %vm328_vm0, %v4699_v59  ;;  %2378 = vst.msk [vmem:[#allocation2 + $0x18] sm:$0x3] %vm2375_vm3, %v5813_v16  ;;  %2382 = vst.msk [vmem:[#allocation2 + $0x38] sm:$0x3] %vm2375_vm3, %v5813_v16 }
  0x80   : > { %2383 = vst.msk [vmem:[#allocation2 + $0x40] sm:$0xff] %vm2373_vm2, %v5813_v16  ;;  %2385 = vst.msk [vmem:[#allocation2 + $0x50] sm:$0xff] %vm2373_vm2, %v5813_v16 }
  0x81   : > { %2384 = vst.msk [vmem:[#allocation2 + $0x48] sm:$0x3] %vm2375_vm3, %v5813_v16  ;;  %2386 = vst.msk [vmem:[#allocation2 + $0x58] sm:$0x3] %vm2375_vm3, %v5813_v16 }
  0x82   : > { %5493 = vmatmul.mubr.msk.f32.gmra.mxu0 %vm328_vm0, %v4767_v63  ;;  %5519 = vmatmul.mubr.msk.f32.gmra.mxu1 %vm328_vm0, %v4801_v0  ;;  %2387 = vst.msk [vmem:[#allocation2 + $0x60] sm:$0xff] %vm2373_vm2, %v5813_v16  ;;  %2389 = vst.msk [vmem:[#allocation2 + $0x70] sm:$0xff] %vm2373_vm2, %v5813_v16 }
  0x83   : > { %5495 = vmatprep.mubr.msk.f32.mxu0 %vm328_vm0, %v5968_v26  ;;  %5521 = vmatprep.mubr.msk.f32.mxu1 %vm328_vm0, %v5965_v25  ;;  %2388 = vst.msk [vmem:[#allocation2 + $0x68] sm:$0x3] %vm2375_vm3, %v5813_v16  ;;  %2390 = vst.msk [vmem:[#allocation2 + $0x78] sm:$0x3] %vm2375_vm3, %v5813_v16 }
  0x84   : > { %2391 = vst.msk [vmem:[#allocation2 + $0x80] sm:$0xff] %vm2373_vm2, %v5813_v16  ;;  %2393 = vst.msk [vmem:[#allocation2 + $0x90] sm:$0xff] %vm2373_vm2, %v5813_v16 }
  0x85   : > { %2392 = vst.msk [vmem:[#allocation2 + $0x88] sm:$0x3] %vm2375_vm3, %v5813_v16  ;;  %2394 = vst.msk [vmem:[#allocation2 + $0x98] sm:$0x3] %vm2375_vm3, %v5813_v16 }
  0x86   : > { %5496 = vmatmul.mubr.msk.f32.gmra.mxu0 %vm328_vm0, %v5984_v29  ;;  %5522 = vmatmul.mubr.msk.f32.gmra.mxu1 %vm328_vm0, %v5981_v28  ;;  %2395 = vst.msk [vmem:[#allocation2 + $0xa0] sm:$0xff] %vm2373_vm2, %v5813_v16  ;;  %2397 = vst.msk [vmem:[#allocation2 + $0xb0] sm:$0xff] %vm2373_vm2, %v5813_v16  ;;  %v2449_v28 = vld [vmem:[#allocation2 + $0x1] sm:$0xff] }
  0x87   : > { %5498 = vmatprep.mubr.msk.f32.mxu0 %vm328_vm0, %v5990_v31  ;;  %5524 = vmatprep.mubr.msk.f32.mxu1 %vm328_vm0, %v5987_v30  ;;  %2396 = vst.msk [vmem:[#allocation2 + $0xa8] sm:$0x3] %vm2375_vm3, %v5813_v16  ;;  %2398 = vst.msk [vmem:[#allocation2 + $0xb8] sm:$0x3] %vm2375_vm3, %v5813_v16  ;;  %v2432_v29 = vld [vmem:[#allocation2] sm:$0xff] }
  0x88   : > { %2399 = vst.msk [vmem:[#allocation2 + $0xc0] sm:$0xff] %vm2373_vm2, %v5813_v16  ;;  %2401 = vst.msk [vmem:[#allocation2 + $0xd0] sm:$0xff] %vm2373_vm2, %v5813_v16 }
  0x89   : > { %2400 = vst.msk [vmem:[#allocation2 + $0xc8] sm:$0x3] %vm2375_vm3, %v5813_v16  ;;  %2402 = vst.msk [vmem:[#allocation2 + $0xd8] sm:$0x3] %vm2375_vm3, %v5813_v16 }
  0x8a   : > { %5499 = vmatmul.mubr.msk.f32.gmra.mxu0 %vm328_vm0, %v6004_v33  ;;  %5525 = vmatmul.mubr.msk.f32.gmra.mxu1 %vm328_vm0, %v6001_v32  ;;  %2403 = vst.msk [vmem:[#allocation2 + $0xe0] sm:$0xff] %vm2373_vm2, %v5813_v16  ;;  %2405 = vst.msk [vmem:[#allocation2 + $0xf0] sm:$0xff] %vm2373_vm2, %v5813_v16 }
  0x8b   : > { %5501 = vmatprep.mubr.msk.f32.mxu0 %vm328_vm0, %v6010_v35  ;;  %5527 = vmatprep.mubr.msk.f32.mxu1 %vm328_vm0, %v6007_v34  ;;  %2404 = vst.msk [vmem:[#allocation2 + $0xe8] sm:$0x3] %vm2375_vm3, %v5813_v16  ;;  %2406 = vst.msk [vmem:[#allocation2 + $0xf8] sm:$0x3] %vm2375_vm3, %v5813_v16 }
  0x8c   : > { %2407 = vst.msk [vmem:[#allocation2 + $0x100] sm:$0xff] %vm2373_vm2, %v5813_v16  ;;  %2409 = vst.msk [vmem:[#allocation2 + $0x110] sm:$0xff] %vm2373_vm2, %v5813_v16 }
  0x8d   : > { %2408 = vst.msk [vmem:[#allocation2 + $0x108] sm:$0x3] %vm2375_vm3, %v5813_v16  ;;  %2410 = vst.msk [vmem:[#allocation2 + $0x118] sm:$0x3] %vm2375_vm3, %v5813_v16 }
  0x8e   : > { %5502 = vmatmul.mubr.msk.f32.gmra.mxu0 %vm328_vm0, %v6024_v37  ;;  %5528 = vmatmul.mubr.msk.f32.gmra.mxu1 %vm328_vm0, %v6021_v36  ;;  %2411 = vst.msk [vmem:[#allocation2 + $0x120] sm:$0xff] %vm2373_vm2, %v5813_v16  ;;  %2413 = vst.msk [vmem:[#allocation2 + $0x130] sm:$0xff] %vm2373_vm2, %v5813_v16 }
  0x8f   : > { %5504 = vmatprep.mubr.msk.f32.mxu0 %vm328_vm0, %v6136_v57  ;;  %5530 = vmatprep.mubr.msk.f32.mxu1 %vm328_vm0, %v4707_v61  ;;  %2412 = vst.msk [vmem:[#allocation2 + $0x128] sm:$0x3] %vm2375_vm3, %v5813_v16  ;;  %2414 = vst.msk [vmem:[#allocation2 + $0x138] sm:$0x3] %vm2375_vm3, %v5813_v16 }
  0x92   : > { %5505 = vmatmul.mubr.msk.f32.gmra.mxu0 %vm328_vm0, %v4775_v1  ;;  %5531 = vmatmul.mubr.msk.f32.gmra.mxu1 %vm328_vm0, %v4809_v2 }
  0x93   : > { %5535 = vmatprep.mubr.msk.f32.mxu0 %vm328_vm0, %v6036_v40  ;;  %5561 = vmatprep.mubr.msk.f32.mxu1 %vm2373_vm2, %v2449_v28  ;;  %v6384_v40 = vld [vmem:[%s6309_s6 + $0x10] sm:$0xff] }
  0x94   : > { %7365 = vst [vmem:[#allocation3_spill] sm:$0xff] %v6384_v40  ;;  %5611 = vmatprep.subr.mxu1 %v6384_v40 }
  0x96   : > { %5536 = vmatmul.mubr.msk.f32.vlgmr.msra.gmra.mxu0 %vm328_vm0, %v6047_v43 }
  0x97   : > { %5538 = vmatprep.mubr.msk.f32.mxu0 %vm328_vm0, %v6052_v44  ;;  %5586 = vmatpush3.msra.mxu0 %v2448_v27 }
  0x9a   : > { %5539 = vmatmul.mubr.msk.f32.gmra.mxu0 %vm328_vm0, %v6064_v45 }
  0x9b   : > { %5541 = vmatprep.mubr.msk.f32.mxu0 %vm328_vm0, %v6069_v46 }
  0x9e   : > { %5542 = vmatmul.mubr.msk.f32.gmra.mxu0 %vm328_vm0, %v6078_v47 }
  0x9f   : > { %5544 = vmatprep.mubr.msk.f32.mxu0 %vm328_vm0, %v6175_v60 }
  0xa2   : > { %5545 = vmatmul.mubr.msk.f32.gmra.mxu0 %vm328_vm0, %v4835_v3 }
  0xa3   : > { %5547 = vmatprep.mubr.msk.f32.mxu0 %vm328_vm0, %v6095_v51 }
  0xa6   : > { %5548 = vmatmul.mubr.msk.f32.gmra.mxu0 %vm328_vm0, %v6103_v52 }
  0xa7   : > { %5550 = vmatprep.mubr.msk.f32.mxu0 %vm328_vm0, %v6108_v53 }
  0xaa   : > { %5551 = vmatmul.mubr.msk.f32.gmra.mxu0 %vm328_vm0, %v6117_v54 }
  0xab   : > { %5553 = vmatprep.mubr.msk.f32.mxu0 %vm328_vm0, %v6122_v55 }
  0xae   : > { %5554 = vmatmul.mubr.msk.f32.gmra.mxu0 %vm328_vm0, %v6131_v56 }
  0xaf   : > { %5556 = vmatprep.mubr.msk.f32.mxu0 %vm328_vm0, %v4741_v62 }
  0xb2   : > { %5557 = vmatmul.mubr.msk.f32.gmra.mxu0 %vm328_vm0, %v4843_v4 }
  0xb3   : > { %5587 = vmatprep.mubr.msk.f32.mxu0 %vm2373_vm2, %v2432_v29 }
  0xd6   : > { %v5329_v6 = vpop.f32.mrf.mxu0  ;;  %v5355_v7 = vpop.f32.mrf.mxu1 }
  0xd7   : > { %v6312_v8 = vadd.f32 %v5355_v7, %v5329_v6  ;;  %v6430_v7 = vld [vmem:[%s6309_s6 + $0x18] sm:$0xff] }
  0xd8   : > { %v6314_v9 = vpop.f32.mrf.mxu0  ;;  %v6316_v10 = vpop.f32.mrf.mxu1  ;;  %7366 = vst [vmem:[#allocation4_spill] sm:$0xff] %v6430_v7  ;;  %5637 = vmatprep.subr.mxu0 %v6430_v7 }
  0xda   : > { %v5332_v11 = vpop.f32.mrf.mxu0  ;;  %v5358_v12 = vpop.f32.mrf.mxu1 }
  0xdb   : > { %v6318_v13 = vadd.f32 %v5358_v12, %v5332_v11 }
  0xdc   : > { %v6320_v14 = vpop.f32.mrf.mxu0  ;;  %v6322_v15 = vpop.f32.mrf.mxu1 }
  0xde   : > { %v5335_v17 = vpop.f32.mrf.mxu0  ;;  %v5361_v18 = vpop.f32.mrf.mxu1 }
  0xdf   : > { %v669_v19 = vadd.f32 %v5361_v18, %v5335_v17 }
  0xe0   : > { %v6364_v20 = vpop.f32.mrf.mxu0  ;;  %v6366_v21 = vpop.f32.mrf.mxu1 }
  0xe2   : > { %v5338_v22 = vpop.f32.mrf.mxu0  ;;  %v5364_v23 = vpop.f32.mrf.mxu1 }
  0xe3   : > { %v679_v24 = vadd.f32 %v5364_v23, %v5338_v22 }
  0xe4   : > { %v6368_v25 = vpop.f32.mrf.mxu0  ;;  %v6370_v26 = vpop.f32.mrf.mxu1 }
  0xe6   : > { %v5341_v30 = vpop.f32.mrf.mxu0  ;;  %v5367_v31 = vpop.f32.mrf.mxu1 }
  0xe7   : > { %v689_v32 = vadd.f32 %v5367_v31, %v5341_v30 }
  0xe8   : > { %v6375_v33 = vpop.f32.mrf.mxu0  ;;  %v6377_v34 = vpop.f32.mrf.mxu1 }
  0xea   : > { %v5344_v35 = vpop.f32.mrf.mxu0  ;;  %v5370_v36 = vpop.f32.mrf.mxu1 }
  0xeb   : > { %v699_v37 = vadd.f32 %v5370_v36, %v5344_v35 }
  0xec   : > { %v6379_v38 = vpop.f32.mrf.mxu0  ;;  %v6381_v39 = vpop.f32.mrf.mxu1 }
  0xee   : > { %v5347_v41 = vpop.f32.mrf.mxu0  ;;  %v5373_v42 = vpop.f32.mrf.mxu1 }
  0xef   : > { %v709_v43 = vadd.f32 %v5373_v42, %v5347_v41 }
  0xf0   : > { %v6387_v44 = vpop.f32.mrf.mxu0  ;;  %v6389_v45 = vpop.f32.mrf.mxu1 }
  0xf2   : > { %v5350_v46 = vpop.f32.mrf.mxu0  ;;  %v5376_v47 = vpop.f32.mrf.mxu1 }
  0xf3   : > { %v719_v48 = vadd.f32 %v5376_v47, %v5350_v46 }
  0xf4   : > { %v6391_v49 = vpop.f32.mrf.mxu0  ;;  %v6393_v50 = vpop.f32.mrf.mxu1 }
  0xf6   : > { %v5381_v51 = vpop.f32.mrf.mxu0  ;;  %v6395_v52 = vpop.f32.mrf.mxu1 }
  0xf7   : > { %v6398_v53 = vadd.f32 %v5381_v51, %v6312_v8 }
  0xf8   : > { %v6400_v54 = vpop.f32.mrf.mxu0  ;;  %v6402_v55 = vpop.f32.mrf.mxu1 }
  0xfa   : > { %v5384_v56 = vpop.f32.mrf.mxu0  ;;  %v6404_v57 = vpop.f32.mrf.mxu1 }
  0xfb   : > { %v6407_v58 = vadd.f32 %v5384_v56, %v6318_v13 }
  0xfc   : > { %v6409_v59 = vpop.f32.mrf.mxu0  ;;  %v6411_v60 = vpop.f32.mrf.mxu1 }
  0xfe   : > { %v5387_v61 = vpop.f32.mrf.mxu0  ;;  %v6413_v62 = vpop.f32.mrf.mxu1 }
  0xff   : > { %v6415_v63 = vadd.f32 %v5387_v61, %v669_v19 }
 0x100   : > { %v6417_v0 = vpop.f32.mrf.mxu0  ;;  %v6419_v1 = vpop.f32.mrf.mxu1 }
 0x102   : > { %v5390_v2 = vpop.f32.mrf.mxu0  ;;  %v6421_v3 = vpop.f32.mrf.mxu1 }
 0x103   : > { %v6423_v4 = vadd.f32 %v5390_v2, %v679_v24 }
 0x104   : > { %v6425_v5 = vpop.f32.mrf.mxu0  ;;  %v6427_v6 = vpop.f32.mrf.mxu1 }
 0x106   : > { %v5393_v8 = vpop.f32.mrf.mxu0  ;;  %v6433_v11 = vpop.f32.mrf.mxu1 }
 0x107   : > { %v6435_v12 = vadd.f32 %v5393_v8, %v689_v32 }
 0x108   : > { %v6437_v13 = vpop.f32.mrf.mxu0  ;;  %v6439_v16 = vpop.f32.mrf.mxu1 }
 0x109   : > { %7367 = vst [vmem:[#allocation5_spill] sm:$0xff] %v6439_v16 }
 0x10a   : > { %v5396_v17 = vpop.f32.mrf.mxu0  ;;  %v6441_v18 = vpop.f32.mrf.mxu1 }
 0x10b   : > { %7368 = vst [vmem:[#allocation6_spill] sm:$0xff] %v6441_v18  ;;  %v6443_v19 = vadd.f32 %v5396_v17, %v699_v37 }
 0x10c   : > { %v6445_v22 = vpop.f32.mrf.mxu0  ;;  %v6447_v23 = vpop.f32.mrf.mxu1 }
 0x10d   : > { %7369 = vst [vmem:[#allocation7_spill] sm:$0xff] %v6443_v19  ;;  %7370 = vst [vmem:[#allocation8_spill] sm:$0xff] %v6447_v23 }
 0x10e   : > { %v5399_v24 = vpop.f32.mrf.mxu0  ;;  %v6449_v27 = vpop.f32.mrf.mxu1 }
 0x10f   : > { %7371 = vst [vmem:[#allocation9_spill] sm:$0xff] %v6449_v27  ;;  %v6451_v28 = vadd.f32 %v5399_v24, %v709_v43 }
 0x110   : > { %v6453_v29 = vpop.f32.mrf.mxu0  ;;  %v6455_v30 = vpop.f32.mrf.mxu1 }
 0x111   : > { %7372 = vst [vmem:[#allocation10_spill] sm:$0xff] %v6451_v28  ;;  %7373 = vst [vmem:[#allocation11_spill] sm:$0xff] %v6453_v29 }
 0x112   : > { %7374 = vst [vmem:[#allocation12_spill] sm:$0xff] %v6455_v30  ;;  %v5402_v31 = vpop.f32.mrf.mxu0  ;;  %v6457_v32 = vpop.f32.mrf.mxu1 }
 0x113   : > { %7375 = vst [vmem:[#allocation13_spill] sm:$0xff] %v6457_v32  ;;  %v6459_v35 = vadd.f32 %v5402_v31, %v719_v48 }
 0x114   : > { %v6461_v36 = vpop.f32.mrf.mxu0  ;;  %v6463_v37 = vpop.f32.mrf.mxu1 }
 0x115   : > { %7376 = vst [vmem:[#allocation14_spill] sm:$0xff] %v6459_v35  ;;  %7377 = vst [vmem:[#allocation15_spill] sm:$0xff] %v6461_v36 }
 0x116   : > { %7378 = vst [vmem:[#allocation16_spill] sm:$0xff] %v6463_v37  ;;  %v5433_v41 = vpop.f32.mrf.mxu0  ;;  %v6465_v42 = vpop.f32.mrf.mxu1 }
 0x118   : > { %v1318_v46 = vpop.f32.mrf.mxu0  ;;  %v6467_v47 = vpop.f32.mrf.mxu1 }
 0x11a   : > { %v5436_v43 = vpop.f32.mrf.mxu0  ;;  %v6469_v51 = vpop.f32.mrf.mxu1 }
 0x11c   : > { %v6471_v56 = vpop.f32.mrf.mxu0  ;;  %v6473_v61 = vpop.f32.mrf.mxu1 }
 0x11e   : > { %v6475_v2 = vpop.f32.mrf.mxu0  ;;  %v6477_v48 = vpop.f32.mrf.mxu1 }
 0x120   : > { %v6479_v8 = vpop.f32.mrf.mxu0  ;;  %v6481_v17 = vpop.f32.mrf.mxu1 }
 0x121   : > { %7379 = vst [vmem:[#allocation17_spill] sm:$0xff] %v6481_v17 }
 0x122   : > { %v6483_v24 = vpop.f32.mrf.mxu0  ;;  %v6485_v31 = vpop.f32.mrf.mxu1 }
 0x123   : > { %7380 = vst [vmem:[#allocation18_spill] sm:$0xff] %v6485_v31 }
 0x124   : > { %v6487_v7 = vpop.f32.mrf.mxu0  ;;  %v6489_v40 = vpop.f32.mrf.mxu1 }
 0x125   : > { %7381 = vst [vmem:[#allocation19_spill] sm:$0xff] %v6487_v7  ;;  %7382 = vst [vmem:[#allocation20_spill] sm:$0xff] %v6489_v40  ;;  %v644_v7 = vadd.f32 %v6316_v10, %v6314_v9 }
 0x126   : > { %v6491_v37 = vpop.f32.mrf.mxu0  ;;  %v6493_v32 = vpop.f32.mrf.mxu1 }
 0x127   : > { %7383 = vst [vmem:[#allocation21_spill] sm:$0xff] %v6491_v37  ;;  %7384 = vst [vmem:[#allocation22_spill] sm:$0xff] %v6493_v32  ;;  %v936_v16 = vadd.f32 %v6400_v54, %v644_v7  ;;  %v664_v54 = vadd.f32 %v6366_v21, %v6364_v20  ;;  %v674_v20 = vadd.f32 %v6370_v26, %v6368_v25 }
 0x128   : > { %v6495_v35 = vpop.f32.mrf.mxu0  ;;  %v6497_v36 = vpop.f32.mrf.mxu1  ;;  %v1172_v21 = vadd.f32 %v6413_v62, %v6415_v63  ;;  %v694_v62 = vadd.f32 %v6381_v39, %v6379_v38  ;;  %v6607_v38 = vadd.f32 %v6393_v50, %v6391_v49 }
 0x129   : > { %7385 = vst [vmem:[#allocation23_spill] sm:$0xff] %v6495_v35  ;;  %7386 = vst [vmem:[#allocation24_spill] sm:$0xff] %v6497_v36 }
 0x12a   : > { %v6499_v30 = vpop.f32.mrf.mxu0  ;;  %v6501_v27 = vpop.f32.mrf.mxu1  ;;  %v1402_v25 = vadd.f32 %v6475_v2, %v1172_v21  ;;  %v7407_v2 = vld [vmem:[#allocation17_spill] sm:$0xff] }
 0x12b   : > { %7387 = vst [vmem:[#allocation25_spill] sm:$0xff] %v6499_v30  ;;  %7388 = vst [vmem:[#allocation26_spill] sm:$0xff] %v6501_v27 }
 0x12c   : > { %v6503_v28 = vpop.f32.mrf.mxu0  ;;  %v6505_v29 = vpop.f32.mrf.mxu1 }
 0x12d   : > { %7389 = vst [vmem:[#allocation27_spill] sm:$0xff] %v6503_v28  ;;  %7390 = vst [vmem:[#allocation28_spill] sm:$0xff] %v6505_v29 }
 0x12e   : > { %v6507_v31 = vpop.f32.mrf.mxu0  ;;  %v6509_v23 = vpop.f32.mrf.mxu1 }
 0x12f   : > { %7391 = vst [vmem:[#allocation29_spill] sm:$0xff] %v6507_v31  ;;  %7392 = vst [vmem:[#allocation30_spill] sm:$0xff] %v6509_v23 }
 0x130   : > { %v6511_v40 = vpop.f32.mrf.mxu0  ;;  %v6513_v37 = vpop.f32.mrf.mxu1 }
 0x131   : > { %7393 = vst [vmem:[#allocation31_spill] sm:$0xff] %v6511_v40  ;;  %7394 = vst [vmem:[#allocation32_spill] sm:$0xff] %v6513_v37 }
 0x132   : > { %v6515_v32 = vpop.f32.mrf.mxu0  ;;  %v6517_v35 = vpop.f32.mrf.mxu1 }
 0x133   : > { %7395 = vst [vmem:[#allocation33_spill] sm:$0xff] %v6515_v32  ;;  %7396 = vst [vmem:[#allocation34_spill] sm:$0xff] %v6517_v35 }
 0x134   : > { %v6519_v36 = vpop.f32.mrf.mxu0  ;;  %v6521_v30 = vpop.f32.mrf.mxu1 }
 0x135   : > { %7397 = vst [vmem:[#allocation35_spill] sm:$0xff] %v6519_v36  ;;  %7398 = vst [vmem:[#allocation36_spill] sm:$0xff] %v6521_v30 }
 0x136   : > { %v5485_v27 = vpop.f32.mrf.mxu0  ;;  %v5511_v28 = vpop.f32.mrf.mxu1 }
 0x138   : > { %v1779_v18 = vpop.f32.mrf.mxu0  ;;  %v6523_v29 = vpop.f32.mrf.mxu1 }
 0x13a   : > { %v5488_v31 = vpop.f32.mrf.mxu0  ;;  %v6527_v23 = vpop.f32.mrf.mxu1 }
 0x13b   : > { %7399 = vst [vmem:[#allocation37_spill] sm:$0xff] %v6527_v23 }
 0x13c   : > { %v6525_v19 = vpop.f32.mrf.mxu0  ;;  %v6531_v37 = vpop.f32.mrf.mxu1 }
 0x13d   : > { %7401 = vst [vmem:[#allocation39_spill] sm:$0xff] %v6531_v37  ;;  %v654_v37 = vadd.f32 %v6322_v15, %v6320_v14  ;;  %v1170_v14 = vadd.f32 %v6404_v57, %v6407_v58 }
 0x13e   : > { %v6529_v40 = vpop.f32.mrf.mxu0  ;;  %v6537_v36 = vpop.f32.mrf.mxu1 }
 0x13f   : > { %7400 = vst [vmem:[#allocation38_spill] sm:$0xff] %v6529_v40  ;;  %7403 = vst [vmem:[#allocation41_spill] sm:$0xff] %v6537_v36  ;;  %v938_v9 = vadd.f32 %v6409_v59, %v654_v37 }
 0x140   : > { %v6533_v32 = vpop.f32.mrf.mxu0  ;;  %v6546_v23 = vpop.f32.mrf.mxu1 }
 0x142   : > { %v6535_v35 = vpop.f32.mrf.mxu0  ;;  %v6560_v7 = vpop.f32.mrf.mxu1 }
 0x143   : > { %7402 = vst [vmem:[#allocation40_spill] sm:$0xff] %v6535_v35  ;;  %v1168_v35 = vadd.f32 %v6395_v52, %v6398_v53  ;;  %v940_v52 = vadd.f32 %v6417_v0, %v664_v54  ;;  %v7411_v54 = vld [vmem:[#allocation6_spill] sm:$0xff] }
 0x144   : > { %v6539_v30 = vpop.f32.mrf.mxu0 }
 0x145   : > { %7404 = vst [vmem:[#allocation42_spill] sm:$0xff] %v6539_v30  ;;  %v1167_v30 = vadd.f32 %v6402_v55, %v936_v16  ;;  %v1398_v10 = vadd.f32 %v5433_v41, %v1168_v35  ;;  %v1169_v55 = vadd.f32 %v6411_v60, %v938_v9  ;;  %v1400_v16 = vadd.f32 %v5436_v43, %v1170_v14  ;;  %v6575_v35 = vpop.f32.mrf.mxu1 }
 0x146   : > { %v6543_v17 = vpop.f32.mrf.mxu0  ;;  %v684_v60 = vadd.f32 %v6377_v34, %v6375_v33  ;;  %v1171_v37 = vadd.f32 %v6419_v1, %v940_v52  ;;  %v942_v41 = vadd.f32 %v6425_v5, %v674_v20  ;;  %v704_v33 = vadd.f32 %v6389_v45, %v6387_v44  ;;  %v6610_v44 = vld [vmem:[%s279_s9] ss:$0 sm:$0xff] }
 0x147   : > { %7405 = vst [vmem:[#allocation43_spill] sm:$0xff] %v6543_v17  ;;  %v1397_v15 = vadd.f32 %v1318_v46, %v1167_v30  ;;  %v1628_v59 = vadd.f32 %v6465_v42, %v1398_v10  ;;  %v1399_v0 = vadd.f32 %v6471_v56, %v1169_v55  ;;  %v1630_v63 = vadd.f32 %v6469_v51, %v1400_v16  ;;  %v6601_v42 = vpop.f32.mrf.mxu1  ;;  %v7406_v56 = vld [vmem:[#allocation5_spill] sm:$0xff]  ;;  %v7410_v10 = vld [vmem:[#allocation7_spill] sm:$0xff]  ;;  %v7414_v55 = vld [vmem:[#allocation18_spill] sm:$0xff] }
 0x148   : > { %v6548_v40 = vpop.f32.mrf.mxu0  ;;  %v1174_v34 = vadd.f32 %v6421_v3, %v6423_v4  ;;  %v944_v1 = vadd.f32 %v6437_v13, %v684_v60  ;;  %v1401_v5 = vadd.f32 %v6479_v8, %v1171_v37  ;;  %v1173_v45 = vadd.f32 %v6427_v6, %v942_v41  ;;  %v7408_v6 = vld [vmem:[#allocation19_spill] sm:$0xff]  ;;  %v7415_v16 = vld [vmem:[#allocation21_spill] sm:$0xff] }
 0x149   : > { %v1627_v58 = vadd.f32 %v6467_v47, %v1397_v15  ;;  %v1859_v30 = vadd.f32 %v5485_v27, %v1628_v59  ;;  %v1629_v39 = vadd.f32 %v6473_v61, %v1399_v0  ;;  %v1861_v47 = vadd.f32 %v5488_v31, %v1630_v63  ;;  %v7413_v15 = vld [vmem:[#allocation8_spill] sm:$0xff]  ;;  %v7416_v0 = vld [vmem:[#allocation39_spill] sm:$0xff] }
 0x14a   : > { %v6554_v36 = vpop.f32.mrf.mxu0  ;;  %v946_v3 = vadd.f32 %v6445_v22, %v694_v62  ;;  %v1632_v4 = vadd.f32 %v6477_v48, %v1402_v25  ;;  %v1404_v13 = vadd.f32 %v6483_v24, %v1174_v34  ;;  %v1176_v51 = vadd.f32 %v6433_v11, %v6435_v12  ;;  %v7409_v22 = vld [vmem:[#allocation38_spill] sm:$0xff]  ;;  %v6624_v48 = vpop.f32.mrf.mxu1  ;;  %v7412_v11 = vld [vmem:[#allocation37_spill] sm:$0xff]  ;;  %v7417_v25 = vld [vmem:[#allocation11_spill] sm:$0xff] }
 0x14b   : > { %v1858_v27 = vadd.f32 %v1779_v18, %v1627_v58  ;;  %v2089_v18 = vadd.f32 %v5511_v28, %v1859_v30  ;;  %v1860_v50 = vadd.f32 %v6525_v19, %v1629_v39  ;;  %v1175_v61 = vadd.f32 %v7406_v56, %v944_v1  ;;  %v7418_v63 = vld [vmem:[#allocation20_spill] sm:$0xff]  ;;  %v7419_v34 = vld [vmem:[#allocation23_spill] sm:$0xff] }
 0x14c   : > { %v6562_v17 = vpop.f32.mrf.mxu0  ;;  %v1631_v8 = vadd.f32 %v7407_v2, %v1401_v5  ;;  %v1403_v31 = vadd.f32 %v7408_v6, %v1173_v45  ;;  %v1863_v9 = vadd.f32 %v7409_v22, %v1632_v4  ;;  %v1178_v14 = vadd.f32 %v7411_v54, %v7410_v10  ;;  %v7420_v5 = vld [vmem:[#allocation41_spill] sm:$0xff]  ;;  %v7421_v45 = vld [vmem:[#allocation40_spill] sm:$0xff] }
 0x14d   : > { %v2088_v49 = vadd.f32 %v6523_v29, %v1858_v27  ;;  %v2091_v12 = vadd.f32 %v7412_v11, %v1861_v47  ;;  %v1177_v52 = vadd.f32 %v7413_v15, %v946_v3  ;;  %v1634_v59 = vadd.f32 %v7414_v55, %v1404_v13  ;;  %v7428_v54 = vld [vmem:[#allocation24_spill] sm:$0xff] }
 0x14e   : > { %v6567_v53 = vpop.f32.mrf.mxu0  ;;  %v1406_v20 = vadd.f32 %v7415_v16, %v1176_v51  ;;  %v1862_v21 = vadd.f32 %v6533_v32, %v1631_v8  ;;  %v2090_v30 = vadd.f32 %v7416_v0, %v1860_v50  ;;  %v948_v62 = vadd.f32 %v7417_v25, %v704_v33  ;;  %v7423_v51 = vld [vmem:[#allocation9_spill] sm:$0xff]  ;;  %v7426_v8 = vld [vmem:[#allocation42_spill] sm:$0xff] }
 0x14f   : > { %v1633_v27 = vadd.f32 %v7418_v63, %v1403_v31  ;;  %v1405_v1 = vadd.f32 %v7419_v34, %v1175_v61  ;;  %v2093_v39 = vadd.f32 %v7420_v5, %v1863_v9  ;;  %v1865_v32 = vadd.f32 %v7421_v45, %v1634_v59  ;;  %v7432_v0 = vld [vmem:[#allocation26_spill] sm:$0xff]  ;;  %v7435_v34 = vld [vmem:[#allocation13_spill] sm:$0xff]  ;;  %v7436_v5 = vld [vmem:[#allocation28_spill] sm:$0xff] }
 0x150   : > { %v6577_v57 = vpop.f32.mrf.mxu0  ;;  %v2092_v61 = vadd.f32 %v6546_v23, %v1862_v21  ;;  %v7431_v21 = vld [vmem:[#allocation15_spill] sm:$0xff] }
 0x151   : > { %v1864_v6 = vadd.f32 %v7426_v8, %v1633_v27  ;;  %v1635_v11 = vadd.f32 %v7428_v54, %v1405_v1  ;;  %v2095_v55 = vadd.f32 %v6560_v7, %v1865_v32  ;;  %v7434_v27 = vld [vmem:[#allocation14_spill] sm:$0xff]  ;;  %v7442_v54 = vld [vmem:[#allocation35_spill] sm:$0xff] }
 0x152   : > { %v6586_v26 = vpop.f32.mrf.mxu0  ;;  %v1182_v1 = vadd.f32 %v7435_v34, %v7434_v27 }
 0x153   : > { %v2094_v25 = vadd.f32 %v6575_v35, %v1864_v6 }
 0x154   : > { %v6603_v46 = vpop.f32.mrf.mxu0 }
 0x156   : > { %v5537_v43 = vpop.f32.mrf.mxu0 }
 0x157   : > { %v2319_v28 = vadd.f32 %v5537_v43, %v2089_v18  ;;  %v6640_v18 = vpop.f32.mrf.mxu1  ;;  %v7422_v43 = vld [vmem:[#allocation10_spill] sm:$0xff] }
 0x158   : > { %v2239_v24 = vpop.f32.mrf.mxu0  ;;  %v1180_v33 = vadd.f32 %v7423_v51, %v7422_v43  ;;  %v7438_v43 = vld [vmem:[#allocation16_spill] sm:$0xff] }
 0x159   : > { %v2342_v29 = vadd.f32 %v6610_v44, %v2319_v28  ;;  %v2318_v19 = vadd.f32 %v2239_v24, %v2088_v49  ;;  %v7424_v49 = vld [vmem:[#allocation22_spill] sm:$0xff]  ;;  %v7425_v28 = vld [vmem:[#allocation25_spill] sm:$0xff]  ;;  %v7427_v24 = vld [vmem:[#allocation12_spill] sm:$0xff] }
 0x15a   : > { %v5540_v58 = vpop.f32.mrf.mxu0  ;;  %v1636_v50 = vadd.f32 %v7424_v49, %v1406_v20  ;;  %v1408_v56 = vadd.f32 %v7425_v28, %v1178_v14  ;;  %v1179_v10 = vadd.f32 %v7427_v24, %v948_v62  ;;  %v6657_v14 = vpop.f32.mrf.mxu1  ;;  %v6701_v24 = vld [vmem:[%s6309_s6 + $0x28] sm:$0xff] }
 0x15b   : > { %v2358_v60 = vmax.f32 %v2342_v29, 0.0  ;;  %v2341_v37 = vadd.f32 %v6610_v44, %v2318_v19  ;;  %v2321_v41 = vadd.f32 %v5540_v58, %v2091_v12  ;;  %v7429_v12 = vld [vmem:[#allocation27_spill] sm:$0xff]  ;;  %v950_v58 = vadd.f32 %v7431_v21, %v6607_v38 }
 0x15c   : > { %v2249_v47 = vpop.f32.mrf.mxu0  ;;  %v1407_v29 = vadd.f32 %v7429_v12, %v1177_v52  ;;  %v7430_v19 = vld [vmem:[#allocation43_spill] sm:$0xff] }
 0x15d   : > { %2417 = vst.msk [vmem:[#allocation2 + $0x21] sm:$0xff] %vm2373_vm2, %v2358_v60  ;;  %v2357_v3 = vmax.f32 %v2341_v37, 0.0  ;;  %v2344_v4 = vadd.f32 %v6610_v44, %v2321_v41  ;;  %v2320_v13 = vadd.f32 %v2249_v47, %v2090_v30  ;;  %v1867_v15 = vadd.f32 %v7430_v19, %v1636_v50  ;;  %v7433_v60 = vld [vmem:[#allocation29_spill] sm:$0xff] }
 0x15e   : > { %v5543_v2 = vpop.f32.mrf.mxu0  ;;  %v1638_v30 = vadd.f32 %v7432_v0, %v1408_v56  ;;  %v1410_v52 = vadd.f32 %v7433_v60, %v1180_v33  ;;  %v1866_v37 = vadd.f32 %v6548_v40, %v1635_v11  ;;  %v1637_v38 = vadd.f32 %v7436_v5, %v1407_v29  ;;  %v5529_v40 = vpop.f32.mrf.mxu1  ;;  %v7439_v33 = vld [vmem:[#allocation30_spill] sm:$0xff]  ;;  %v7440_v50 = vld [vmem:[#allocation33_spill] sm:$0xff] }
 0x15f   : > { %2416 = vst.msk [vmem:[#allocation2 + $0x11] sm:$0xff] %vm2373_vm2, %v2357_v3  ;;  %v2360_v31 = vmax.f32 %v2344_v4, 0.0  ;;  %v2343_v22 = vadd.f32 %v6610_v44, %v2320_v13  ;;  %v2323_v9 = vadd.f32 %v5543_v2, %v2093_v39  ;;  %v7437_v39 = vld [vmem:[#allocation31_spill] sm:$0xff]  ;;  %v2097_v45 = vadd.f32 %v6601_v42, %v1867_v15 }
 0x160   : > { %v2259_v23 = vpop.f32.mrf.mxu0  ;;  %v1409_v47 = vadd.f32 %v7437_v39, %v1179_v10  ;;  %v1869_v35 = vadd.f32 %v6554_v36, %v1638_v30  ;;  %v1181_v51 = vadd.f32 %v7438_v43, %v950_v58  ;;  %v1640_v49 = vadd.f32 %v7439_v33, %v1410_v52  ;;  %v6687_v36 = vld [vmem:[%s6309_s6 + $0x20] sm:$0xff]  ;;  %v7441_v10 = vld [vmem:[#allocation32_spill] sm:$0xff]  ;;  %v2069_v29 = vpop.f32.mrf.mxu1 }
 0x161   : > { %2419 = vst.msk [vmem:[#allocation2 + $0x41] sm:$0xff] %vm2373_vm2, %v2360_v31  ;;  %v2359_v59 = vmax.f32 %v2343_v22, 0.0  ;;  %v2346_v16 = vadd.f32 %v6610_v44, %v2323_v9  ;;  %v2322_v20 = vadd.f32 %v2259_v23, %v2092_v61  ;;  %v1412_v28 = vadd.f32 %v7440_v50, %v1182_v1 }
 0x162   : > { %v5546_v41 = vpop.f32.mrf.mxu0  ;;  %v2096_v56 = vadd.f32 %v6624_v48, %v1866_v37  ;;  %v1868_v8 = vadd.f32 %v6562_v17, %v1637_v38  ;;  %v1639_v17 = vadd.f32 %v7441_v10, %v1409_v47  ;;  %v1411_v11 = vadd.f32 %v7442_v54, %v1181_v51 }
 0x163   : > { %2418 = vst.msk [vmem:[#allocation2 + $0x31] sm:$0xff] %vm2373_vm2, %v2359_v59  ;;  %v2362_v7 = vmax.f32 %v2346_v16, 0.0  ;;  %v2345_v62 = vadd.f32 %v6610_v44, %v2322_v20  ;;  %v2325_v63 = vadd.f32 %v5546_v41, %v2095_v55  ;;  %v1871_v12 = vadd.f32 %v6567_v53, %v1640_v49  ;;  %v7443_v16 = vld [vmem:[#allocation3_spill] sm:$0xff]  ;;  %v7444_v20 = vld [vmem:[#allocation4_spill] sm:$0xff]  ;;  %v7445_v53 = vld [vmem:[#allocation34_spill] sm:$0xff] }
 0x164   : > { %v2269_v32 = vpop.f32.mrf.mxu0  ;;  %v6696_v48 = vld [vmem:[#allocation2 + $0x21] sm:$0xff]  ;;  %v2099_v15 = vadd.f32 %v6640_v18, %v1869_v35  ;;  %v1642_v21 = vadd.f32 %v7445_v53, %v1412_v28  ;;  %v1870_v58 = vadd.f32 %v6577_v57, %v1639_v17  ;;  %v2098_v18 = vadd.f32 %v6657_v14, %v1868_v8  ;;  %v5532_v14 = vpop.f32.mrf.mxu1 }
 0x165   : > { %2421 = vst.msk [vmem:[#allocation2 + $0x61] sm:$0xff] %vm2373_vm2, %v2362_v7  ;;  %v2361_v3 = vmax.f32 %v2345_v62, 0.0  ;;  %v2348_v4 = vadd.f32 %v6610_v44, %v2325_v63  ;;  %v2324_v13 = vadd.f32 %v2269_v32, %v2094_v25  ;;  %v6698_v9 = vld [vmem:[#allocation2 + $0x20] sm:$0xff]  ;;  %v7446_v7 = vld [vmem:[#allocation36_spill] sm:$0xff]  ;;  %v2101_v63 = vadd.f32 %v5529_v40, %v1871_v12 }
 0x166   : > { %v5549_v42 = vpop.f32.mrf.mxu0  ;;  %v6682_v61 = vld [vmem:[#allocation2 + $0x11] sm:$0xff]  ;;  %v1641_v62 = vadd.f32 %v7446_v7, %v1411_v11  ;;  %v1873_v34 = vadd.f32 %v6586_v26, %v1642_v21  ;;  %v2100_v39 = vadd.f32 %v2069_v29, %v1870_v58  ;;  %v2079_v43 = vpop.f32.mrf.mxu1  ;;  %v2457_v28 = vld [vmem:[#allocation2 + $0xa1] sm:$0xff] }
 0x167   : > { %v6684_v2 = vld [vmem:[#allocation2 + $0x10] sm:$0xff]  ;;  %2420 = vst.msk [vmem:[#allocation2 + $0x51] sm:$0xff] %vm2373_vm2, %v2361_v3  ;;  %v2364_v6 = vmax.f32 %v2348_v4, 0.0  ;;  %v2347_v31 = vadd.f32 %v6610_v44, %v2324_v13  ;;  %v2327_v22 = vadd.f32 %v5549_v42, %v2097_v45  ;;  %5562 = vmatmul.mubr.msk.f32.vlgmr.msra.gmra.mxu1 %vm2373_vm2, %v6682_v61 }
 0x168   : > { %5588 = vmatmul.mubr.msk.f32.vlgmr.msra.gmra.mxu0 %vm2373_vm2, %v6684_v2  ;;  %v2279_v19 = vpop.f32.mrf.mxu0  ;;  %5564 = vmatprep.mubr.msk.f32.mxu1 %vm2373_vm2, %v6696_v48  ;;  %v6730_v57 = vld [vmem:[#allocation2 + $0x41] sm:$0xff]  ;;  %v1872_v32 = vadd.f32 %v6603_v46, %v1641_v62  ;;  %v2103_v46 = vadd.f32 %v5532_v14, %v1873_v34  ;;  %v4981_v34 = vld [vmem:[%s6309_s6 + $0x38] sm:$0xff] }
 0x169   : > { %5590 = vmatprep.mubr.msk.f32.mxu0 %vm2373_vm2, %v6698_v9  ;;  %2423 = vst.msk [vmem:[#allocation2 + $0x81] sm:$0xff] %vm2373_vm2, %v2364_v6  ;;  %v2363_v23 = vmax.f32 %v2347_v31, 0.0  ;;  %v2350_v55 = vadd.f32 %v6610_v44, %v2327_v22  ;;  %v2326_v59 = vadd.f32 %v2279_v19, %v2096_v56  ;;  %5612 = vmatpush3.msra.mxu1 %v7443_v16  ;;  %v6732_v25 = vld [vmem:[#allocation2 + $0x40] sm:$0xff] }
 0x16a   : > { %5638 = vmatpush3.msra.mxu0 %v7444_v20  ;;  %v5552_v0 = vpop.f32.mrf.mxu0  ;;  %v6717_v30 = vld [vmem:[#allocation2 + $0x31] sm:$0xff]  ;;  %5663 = vmatprep.subr.mxu1 %v6687_v36  ;;  %v2440_v56 = vld [vmem:[#allocation2 + $0xa0] sm:$0xff]  ;;  %v2102_v31 = vadd.f32 %v2079_v43, %v1872_v32 }
 0x16b   : > { %v6719_v60 = vld [vmem:[#allocation2 + $0x30] sm:$0xff]  ;;  %5689 = vmatprep.subr.mxu0 %v6701_v24  ;;  %2422 = vst.msk [vmem:[#allocation2 + $0x71] sm:$0xff] %vm2373_vm2, %v2363_v23  ;;  %v2366_v52 = vmax.f32 %v2350_v55, 0.0  ;;  %v2349_v37 = vadd.f32 %v6610_v44, %v2326_v59  ;;  %v2329_v41 = vadd.f32 %v5552_v0, %v2099_v15  ;;  %5565 = vmatmul.mubr.msk.f32.gmra.mxu1 %vm2373_vm2, %v6717_v30  ;;  %v6843_v14 = vld [vmem:[#allocation2 + $0x22] sm:$0xff] }
 0x16c   : > { %5591 = vmatmul.mubr.msk.f32.gmra.mxu0 %vm2373_vm2, %v6719_v60  ;;  %v2289_v27 = vpop.f32.mrf.mxu0  ;;  %5567 = vmatprep.mubr.msk.f32.mxu1 %vm2373_vm2, %v6730_v57  ;;  %v6753_v4 = vld [vmem:[#allocation2 + $0x61] sm:$0xff] }
 0x16d   : > { %5593 = vmatprep.mubr.msk.f32.mxu0 %vm2373_vm2, %v6732_v25  ;;  %2425 = vst.msk [vmem:[#allocation2 + $0xc1] sm:$0xff] %vm2373_vm2, %v2366_v52  ;;  %v2365_v1 = vmax.f32 %v2349_v37, 0.0  ;;  %v2352_v5 = vadd.f32 %v6610_v44, %v2329_v41  ;;  %v2328_v38 = vadd.f32 %v2289_v27, %v2098_v18  ;;  %v6755_v13 = vld [vmem:[#allocation2 + $0x60] sm:$0xff]  ;;  %v4964_v27 = vld [vmem:[%s6309_s6 + $0x30] sm:$0xff] }
 0x16e   : > { %v5555_v47 = vpop.f32.mrf.mxu0  ;;  %v6742_v45 = vld [vmem:[#allocation2 + $0x51] sm:$0xff]  ;;  %v2853_v41 = vld [vmem:[#allocation2 + $0x2] sm:$0xff] }
 0x16f   : > { %v6744_v40 = vld [vmem:[#allocation2 + $0x50] sm:$0xff]  ;;  %2424 = vst.msk [vmem:[#allocation2 + $0xb1] sm:$0xff] %vm2373_vm2, %v2365_v1  ;;  %v2368_v35 = vmax.f32 %v2352_v5, 0.0  ;;  %v2351_v3 = vadd.f32 %v6610_v44, %v2328_v38  ;;  %v2331_v26 = vadd.f32 %v5555_v47, %v2101_v63  ;;  %5568 = vmatmul.mubr.msk.f32.gmra.mxu1 %vm2373_vm2, %v6742_v45  ;;  %v6859_v1 = vld [vmem:[#allocation2 + $0x42] sm:$0xff] }
 0x170   : > { %5594 = vmatmul.mubr.msk.f32.gmra.mxu0 %vm2373_vm2, %v6744_v40  ;;  %v2299_v51 = vpop.f32.mrf.mxu0  ;;  %5570 = vmatprep.mubr.msk.f32.mxu1 %vm2373_vm2, %v6753_v4  ;;  %v2854_v63 = vld [vmem:[#allocation2 + $0x12] sm:$0xff]  ;;  %v2861_v5 = vld [vmem:[#allocation2 + $0xa2] sm:$0xff] }
 0x171   : > { %5596 = vmatprep.mubr.msk.f32.mxu0 %vm2373_vm2, %v6755_v13  ;;  %2427 = vst.msk [vmem:[#allocation2 + $0xe1] sm:$0xff] %vm2373_vm2, %v2368_v35  ;;  %v2367_v33 = vmax.f32 %v2351_v3, 0.0  ;;  %v2354_v49 = vadd.f32 %v6610_v44, %v2331_v26  ;;  %v2330_v50 = vadd.f32 %v2299_v51, %v2100_v39  ;;  %v6879_v39 = vld [vmem:[#allocation2 + $0x80] sm:$0xff] }
 0x172   : > { %v5558_v42 = vpop.f32.mrf.mxu0  ;;  %v6763_v8 = vld [vmem:[#allocation2 + $0x71] sm:$0xff] }
 0x173   : > { %v6765_v6 = vld [vmem:[#allocation2 + $0x70] sm:$0xff]  ;;  %2426 = vst.msk [vmem:[#allocation2 + $0xd1] sm:$0xff] %vm2373_vm2, %v2367_v33  ;;  %v2370_v22 = vmax.f32 %v2354_v49, 0.0  ;;  %v2353_v10 = vadd.f32 %v6610_v44, %v2330_v50  ;;  %v2333_v17 = vadd.f32 %v5558_v42, %v2103_v46  ;;  %5571 = vmatmul.mubr.msk.f32.gmra.mxu1 %vm2373_vm2, %v6763_v8  ;;  %v4998_v33 = vld [vmem:[%s6309_s6 + $0x40] sm:$0xff] }
 0x174   : > { %5597 = vmatmul.mubr.msk.f32.gmra.mxu0 %vm2373_vm2, %v6765_v6  ;;  %v2309_v54 = vpop.f32.mrf.mxu0  ;;  %5573 = vmatprep.mubr.msk.f32.mxu1 %vm2373_vm2, %v2457_v28  ;;  %v6787_v59 = vld [vmem:[#allocation2 + $0xc1] sm:$0xff]  ;;  %v6877_v38 = vld [vmem:[#allocation2 + $0x72] sm:$0xff] }
 0x175   : > { %5599 = vmatprep.mubr.msk.f32.mxu0 %vm2373_vm2, %v2440_v56  ;;  %2429 = vst.msk [vmem:[#allocation2 + $0x101] sm:$0xff] %vm2373_vm2, %v2370_v22  ;;  %v2369_v11 = vmax.f32 %v2353_v10, 0.0  ;;  %v2356_v12 = vadd.f32 %v6610_v44, %v2333_v17  ;;  %v2332_v29 = vadd.f32 %v2309_v54, %v2102_v31  ;;  %v6789_v16 = vld [vmem:[#allocation2 + $0xc0] sm:$0xff] }
 0x176   : > { %v6777_v19 = vld [vmem:[#allocation2 + $0xb1] sm:$0xff]  ;;  %v6891_v32 = vld [vmem:[#allocation2 + $0xc2] sm:$0xff] }
 0x177   : > { %v6779_v15 = vld [vmem:[#allocation2 + $0xb0] sm:$0xff]  ;;  %2428 = vst.msk [vmem:[#allocation2 + $0xf1] sm:$0xff] %vm2373_vm2, %v2369_v11  ;;  %v2372_v23 = vmax.f32 %v2356_v12, 0.0  ;;  %v2355_v55 = vadd.f32 %v6610_v44, %v2332_v29  ;;  %5574 = vmatmul.mubr.msk.f32.gmra.mxu1 %vm2373_vm2, %v6777_v19  ;;  %v6957_v49 = vld [vmem:[#allocation2 + $0x82] sm:$0xff] }
 0x178   : > { %5600 = vmatmul.mubr.msk.f32.gmra.mxu0 %vm2373_vm2, %v6779_v15  ;;  %5576 = vmatprep.mubr.msk.f32.mxu1 %vm2373_vm2, %v6787_v59  ;;  %v6805_v21 = vld [vmem:[#allocation2 + $0xe1] sm:$0xff]  ;;  %v2862_v47 = vld [vmem:[#allocation2 + $0xb2] sm:$0xff] }
 0x179   : > { %5602 = vmatprep.mubr.msk.f32.mxu0 %vm2373_vm2, %v6789_v16  ;;  %2431 = vst.msk [vmem:[#allocation2 + $0x121] sm:$0xff] %vm2373_vm2, %v2372_v23  ;;  %v2371_v20 = vmax.f32 %v2355_v55, 0.0  ;;  %v6807_v58 = vld [vmem:[#allocation2 + $0xe0] sm:$0xff] }
 0x17a   : > { %v6796_v44 = vld [vmem:[#allocation2 + $0xd1] sm:$0xff]  ;;  %v6903_v3 = vld [vmem:[#allocation2 + $0xe2] sm:$0xff] }
 0x17b   : > { %v6798_v53 = vld [vmem:[#allocation2 + $0xd0] sm:$0xff]  ;;  %2430 = vst.msk [vmem:[#allocation2 + $0x111] sm:$0xff] %vm2373_vm2, %v2371_v20  ;;  %5577 = vmatmul.mubr.msk.f32.gmra.mxu1 %vm2373_vm2, %v6796_v44 }
 0x17c   : > { %5603 = vmatmul.mubr.msk.f32.gmra.mxu0 %vm2373_vm2, %v6798_v53  ;;  %5579 = vmatprep.mubr.msk.f32.mxu1 %vm2373_vm2, %v6805_v21  ;;  %v6821_v52 = vld [vmem:[#allocation2 + $0x101] sm:$0xff]  ;;  %v6897_v35 = vld [vmem:[#allocation2 + $0xd2] sm:$0xff] }
 0x17d   : > { %5605 = vmatprep.mubr.msk.f32.mxu0 %vm2373_vm2, %v6807_v58  ;;  %v6823_v37 = vld [vmem:[#allocation2 + $0x100] sm:$0xff] }
 0x17e   : > { %v6813_v0 = vld [vmem:[#allocation2 + $0xf1] sm:$0xff]  ;;  %v6915_v43 = vld [vmem:[#allocation2 + $0x102] sm:$0xff] }
 0x17f   : > { %v6815_v18 = vld [vmem:[#allocation2 + $0xf0] sm:$0xff]  ;;  %5580 = vmatmul.mubr.msk.f32.gmra.mxu1 %vm2373_vm2, %v6813_v0 }
 0x180   : > { %5606 = vmatmul.mubr.msk.f32.gmra.mxu0 %vm2373_vm2, %v6815_v18  ;;  %5582 = vmatprep.mubr.msk.f32.mxu1 %vm2373_vm2, %v6821_v52  ;;  %v6909_v26 = vld [vmem:[#allocation2 + $0xf2] sm:$0xff]  ;;  %v6923_v46 = vld [vmem:[#allocation2 + $0x120] sm:$0xff] }
 0x181   : > { %5608 = vmatprep.mubr.msk.f32.mxu0 %vm2373_vm2, %v6823_v37  ;;  %v3322_v50 = vld [vmem:[#allocation2 + $0x121] sm:$0xff] }
 0x182   : > { %v6829_v7 = vld [vmem:[#allocation2 + $0x111] sm:$0xff]  ;;  %v3549_v28 = vld [vmem:[#allocation2 + $0x122] sm:$0xff] }
 0x183   : > { %v6831_v62 = vld [vmem:[#allocation2 + $0x110] sm:$0xff]  ;;  %5583 = vmatmul.mubr.msk.f32.gmra.mxu1 %vm2373_vm2, %v6829_v7 }
 0x184   : > { %5609 = vmatmul.mubr.msk.f32.gmra.mxu0 %vm2373_vm2, %v6831_v62  ;;  %5613 = vmatprep.mubr.msk.f32.mxu1 %vm2373_vm2, %v2853_v41  ;;  %v6921_v51 = vld [vmem:[#allocation2 + $0x112] sm:$0xff] }
 0x185   : > { %5639 = vmatprep.mubr.msk.f32.mxu0 %vm2373_vm2, %v6684_v2  ;;  %v6853_v2 = vld [vmem:[#allocation2 + $0x32] sm:$0xff] }
 0x187   : > { %5614 = vmatmul.mubr.msk.f32.vlgmr.msra.gmra.mxu1 %vm2373_vm2, %v2854_v63 }
 0x188   : > { %5640 = vmatmul.mubr.msk.f32.vlgmr.msra.gmra.mxu0 %vm2373_vm2, %v6698_v9  ;;  %5616 = vmatprep.mubr.msk.f32.mxu1 %vm2373_vm2, %v6843_v14 }
 0x189   : > { %5642 = vmatprep.mubr.msk.f32.mxu0 %vm2373_vm2, %v6719_v60  ;;  %5664 = vmatpush3.msra.mxu1 %v6687_v36  ;;  %v6865_v36 = vld [vmem:[#allocation2 + $0x52] sm:$0xff] }
 0x18a   : > { %5690 = vmatpush3.msra.mxu0 %v6701_v24  ;;  %5715 = vmatprep.subr.mxu1 %v4964_v27  ;;  %v6871_v24 = vld [vmem:[#allocation2 + $0x62] sm:$0xff] }
 0x18b   : > { %5741 = vmatprep.subr.mxu0 %v4981_v34  ;;  %5617 = vmatmul.mubr.msk.f32.gmra.mxu1 %vm2373_vm2, %v6853_v2 }
 0x18c   : > { %5643 = vmatmul.mubr.msk.f32.gmra.mxu0 %vm2373_vm2, %v6732_v25  ;;  %5619 = vmatprep.mubr.msk.f32.mxu1 %vm2373_vm2, %v6859_v1 }
 0x18d   : > { %5645 = vmatprep.mubr.msk.f32.mxu0 %vm2373_vm2, %v6744_v40 }
 0x18f   : > { %5620 = vmatmul.mubr.msk.f32.gmra.mxu1 %vm2373_vm2, %v6865_v36 }
 0x190   : > { %5646 = vmatmul.mubr.msk.f32.gmra.mxu0 %vm2373_vm2, %v6755_v13  ;;  %5622 = vmatprep.mubr.msk.f32.mxu1 %vm2373_vm2, %v6871_v24 }
 0x191   : > { %5648 = vmatprep.mubr.msk.f32.mxu0 %vm2373_vm2, %v6765_v6 }
 0x193   : > { %5623 = vmatmul.mubr.msk.f32.gmra.mxu1 %vm2373_vm2, %v6877_v38 }
 0x194   : > { %5649 = vmatmul.mubr.msk.f32.gmra.mxu0 %vm2373_vm2, %v6879_v39  ;;  %5625 = vmatprep.mubr.msk.f32.mxu1 %vm2373_vm2, %v2861_v5 }
 0x195   : > { %5651 = vmatprep.mubr.msk.f32.mxu0 %vm2373_vm2, %v6779_v15 }
 0x197   : > { %5626 = vmatmul.mubr.msk.f32.gmra.mxu1 %vm2373_vm2, %v2862_v47 }
 0x198   : > { %5652 = vmatmul.mubr.msk.f32.gmra.mxu0 %vm2373_vm2, %v6789_v16  ;;  %5628 = vmatprep.mubr.msk.f32.mxu1 %vm2373_vm2, %v6891_v32 }
 0x199   : > { %5654 = vmatprep.mubr.msk.f32.mxu0 %vm2373_vm2, %v6798_v53 }
 0x19b   : > { %5629 = vmatmul.mubr.msk.f32.gmra.mxu1 %vm2373_vm2, %v6897_v35 }
 0x19c   : > { %5655 = vmatmul.mubr.msk.f32.gmra.mxu0 %vm2373_vm2, %v6807_v58  ;;  %5631 = vmatprep.mubr.msk.f32.mxu1 %vm2373_vm2, %v6903_v3 }
 0x19d   : > { %5657 = vmatprep.mubr.msk.f32.mxu0 %vm2373_vm2, %v6815_v18 }
 0x19f   : > { %5632 = vmatmul.mubr.msk.f32.gmra.mxu1 %vm2373_vm2, %v6909_v26 }
 0x1a0   : > { %5658 = vmatmul.mubr.msk.f32.gmra.mxu0 %vm2373_vm2, %v6823_v37  ;;  %5634 = vmatprep.mubr.msk.f32.mxu1 %vm2373_vm2, %v6915_v43 }
 0x1a1   : > { %5660 = vmatprep.mubr.msk.f32.mxu0 %vm2373_vm2, %v6831_v62 }
 0x1a3   : > { %5635 = vmatmul.mubr.msk.f32.gmra.mxu1 %vm2373_vm2, %v6921_v51 }
 0x1a4   : > { %5661 = vmatmul.mubr.msk.f32.gmra.mxu0 %vm2373_vm2, %v6923_v46  ;;  %5665 = vmatprep.mubr.msk.f32.mxu1 %vm2373_vm2, %v6682_v61  ;;  %v3314_v61 = vld [vmem:[#allocation2 + $0x81] sm:$0xff] }
 0x1a5   : > { %5691 = vmatprep.mubr.msk.f32.mxu0 %vm2373_vm2, %v2854_v63 }
 0x1a7   : > { %5666 = vmatmul.mubr.msk.f32.vlgmr.msra.gmra.mxu1 %vm2373_vm2, %v6696_v48 }
 0x1a8   : > { %5692 = vmatmul.mubr.msk.f32.vlgmr.msra.gmra.mxu0 %vm2373_vm2, %v6843_v14  ;;  %5668 = vmatprep.mubr.msk.f32.mxu1 %vm2373_vm2, %v6717_v30 }
 0x1a9   : > { %5694 = vmatprep.mubr.msk.f32.mxu0 %vm2373_vm2, %v6853_v2  ;;  %5716 = vmatpush3.msra.mxu1 %v4964_v27 }
 0x1aa   : > { %5742 = vmatpush3.msra.mxu0 %v4981_v34  ;;  %5767 = vmatprep.subr.mxu1 %v4998_v33 }
 0x1ab   : > { %5669 = vmatmul.mubr.msk.f32.gmra.mxu1 %vm2373_vm2, %v6730_v57 }
 0x1ac   : > { %5695 = vmatmul.mubr.msk.f32.gmra.mxu0 %vm2373_vm2, %v6859_v1  ;;  %5671 = vmatprep.mubr.msk.f32.mxu1 %vm2373_vm2, %v6742_v45 }
 0x1ad   : > { %5697 = vmatprep.mubr.msk.f32.mxu0 %vm2373_vm2, %v6865_v36 }
 0x1af   : > { %5672 = vmatmul.mubr.msk.f32.gmra.mxu1 %vm2373_vm2, %v6753_v4 }
 0x1b0   : > { %5698 = vmatmul.mubr.msk.f32.gmra.mxu0 %vm2373_vm2, %v6871_v24  ;;  %5674 = vmatprep.mubr.msk.f32.mxu1 %vm2373_vm2, %v6763_v8 }
 0x1b1   : > { %5700 = vmatprep.mubr.msk.f32.mxu0 %vm2373_vm2, %v6877_v38 }
 0x1b3   : > { %5675 = vmatmul.mubr.msk.f32.gmra.mxu1 %vm2373_vm2, %v3314_v61 }
 0x1b4   : > { %5701 = vmatmul.mubr.msk.f32.gmra.mxu0 %vm2373_vm2, %v6957_v49  ;;  %5677 = vmatprep.mubr.msk.f32.mxu1 %vm2373_vm2, %v6777_v19 }
 0x1b5   : > { %5703 = vmatprep.mubr.msk.f32.mxu0 %vm2373_vm2, %v2862_v47 }
 0x1b7   : > { %5678 = vmatmul.mubr.msk.f32.gmra.mxu1 %vm2373_vm2, %v6787_v59 }
 0x1b8   : > { %5704 = vmatmul.mubr.msk.f32.gmra.mxu0 %vm2373_vm2, %v6891_v32  ;;  %5680 = vmatprep.mubr.msk.f32.mxu1 %vm2373_vm2, %v6796_v44 }
 0x1b9   : > { %5706 = vmatprep.mubr.msk.f32.mxu0 %vm2373_vm2, %v6897_v35 }
 0x1bb   : > { %5681 = vmatmul.mubr.msk.f32.gmra.mxu1 %vm2373_vm2, %v6805_v21 }
 0x1bc   : > { %5707 = vmatmul.mubr.msk.f32.gmra.mxu0 %vm2373_vm2, %v6903_v3  ;;  %5683 = vmatprep.mubr.msk.f32.mxu1 %vm2373_vm2, %v6813_v0 }
 0x1bd   : > { %5709 = vmatprep.mubr.msk.f32.mxu0 %vm2373_vm2, %v6909_v26 }
 0x1bf   : > { %5684 = vmatmul.mubr.msk.f32.gmra.mxu1 %vm2373_vm2, %v6821_v52 }
 0x1c0   : > { %5710 = vmatmul.mubr.msk.f32.gmra.mxu0 %vm2373_vm2, %v6915_v43  ;;  %5686 = vmatprep.mubr.msk.f32.mxu1 %vm2373_vm2, %v6829_v7 }
 0x1c1   : > { %5712 = vmatprep.mubr.msk.f32.mxu0 %vm2373_vm2, %v6921_v51 }
 0x1c3   : > { %5687 = vmatmul.mubr.msk.f32.gmra.mxu1 %vm2373_vm2, %v3322_v50 }
 0x1c4   : > { %5713 = vmatmul.mubr.msk.f32.gmra.mxu0 %vm2373_vm2, %v3549_v28  ;;  %5717 = vmatprep.mubr.msk.f32.mxu1 %vm2373_vm2, %v6698_v9  ;;  %v3996_v9 = vld [vmem:[#allocation2 + $0x91] sm:$0xff] }
 0x1c5   : > { %5743 = vmatprep.mubr.msk.f32.mxu0 %vm2373_vm2, %v6696_v48  ;;  %v3769_v48 = vld [vmem:[#allocation2 + $0x90] sm:$0xff] }
 0x1c7   : > { %5718 = vmatmul.mubr.msk.f32.vlgmr.msra.gmra.mxu1 %vm2373_vm2, %v6719_v60  ;;  %v4004_v60 = vld [vmem:[#allocation2 + $0x131] sm:$0xff] }
 0x1c8   : > { %5744 = vmatmul.mubr.msk.f32.vlgmr.msra.gmra.mxu0 %vm2373_vm2, %v6717_v30  ;;  %5720 = vmatprep.mubr.msk.f32.mxu1 %vm2373_vm2, %v6732_v25  ;;  %v3777_v30 = vld [vmem:[#allocation2 + $0x130] sm:$0xff] }
 0x1c9   : > { %5746 = vmatprep.mubr.msk.f32.mxu0 %vm2373_vm2, %v6730_v57  ;;  %5768 = vmatpush3.msra.mxu1 %v4998_v33  ;;  %v4223_v57 = vld [vmem:[#allocation2 + $0x92] sm:$0xff] }
 0x1ca   : > { %v4231_v25 = vld [vmem:[#allocation2 + $0x132] sm:$0xff] }
 0x1cb   : > { %5721 = vmatmul.mubr.msk.f32.gmra.mxu1 %vm2373_vm2, %v6744_v40 }
 0x1cc   : > { %5747 = vmatmul.mubr.msk.f32.gmra.mxu0 %vm2373_vm2, %v6742_v45  ;;  %5723 = vmatprep.mubr.msk.f32.mxu1 %vm2373_vm2, %v6755_v13 }
 0x1cd   : > { %5749 = vmatprep.mubr.msk.f32.mxu0 %vm2373_vm2, %v6753_v4 }
 0x1cf   : > { %5724 = vmatmul.mubr.msk.f32.gmra.mxu1 %vm2373_vm2, %v6765_v6 }
 0x1d0   : > { %5750 = vmatmul.mubr.msk.f32.gmra.mxu0 %vm2373_vm2, %v6763_v8  ;;  %5726 = vmatprep.mubr.msk.f32.mxu1 %vm2373_vm2, %v6879_v39 }
 0x1d1   : > { %5752 = vmatprep.mubr.msk.f32.mxu0 %vm2373_vm2, %v3314_v61 }
 0x1d3   : > { %5727 = vmatmul.mubr.msk.f32.gmra.mxu1 %vm2373_vm2, %v3769_v48 }
 0x1d4   : > { %5753 = vmatmul.mubr.msk.f32.gmra.mxu0 %vm2373_vm2, %v3996_v9  ;;  %5729 = vmatprep.mubr.msk.f32.mxu1 %vm2373_vm2, %v6789_v16 }
 0x1d5   : > { %5755 = vmatprep.mubr.msk.f32.mxu0 %vm2373_vm2, %v6787_v59 }
 0x1d7   : > { %5730 = vmatmul.mubr.msk.f32.gmra.mxu1 %vm2373_vm2, %v6798_v53 }
 0x1d8   : > { %5756 = vmatmul.mubr.msk.f32.gmra.mxu0 %vm2373_vm2, %v6796_v44  ;;  %5732 = vmatprep.mubr.msk.f32.mxu1 %vm2373_vm2, %v6807_v58 }
 0x1d9   : > { %5758 = vmatprep.mubr.msk.f32.mxu0 %vm2373_vm2, %v6805_v21 }
 0x1db   : > { %5733 = vmatmul.mubr.msk.f32.gmra.mxu1 %vm2373_vm2, %v6815_v18 }
 0x1dc   : > { %5759 = vmatmul.mubr.msk.f32.gmra.mxu0 %vm2373_vm2, %v6813_v0  ;;  %5735 = vmatprep.mubr.msk.f32.mxu1 %vm2373_vm2, %v6823_v37 }
 0x1dd   : > { %5761 = vmatprep.mubr.msk.f32.mxu0 %vm2373_vm2, %v6821_v52 }
 0x1df   : > { %5736 = vmatmul.mubr.msk.f32.gmra.mxu1 %vm2373_vm2, %v6831_v62 }
 0x1e0   : > { %5762 = vmatmul.mubr.msk.f32.gmra.mxu0 %vm2373_vm2, %v6829_v7  ;;  %5738 = vmatprep.mubr.msk.f32.mxu1 %vm2373_vm2, %v6923_v46 }
 0x1e1   : > { %5764 = vmatprep.mubr.msk.f32.mxu0 %vm2373_vm2, %v3322_v50 }
 0x1e3   : > { %5739 = vmatmul.mubr.msk.f32.gmra.mxu1 %vm2373_vm2, %v3777_v30 }
 0x1e4   : > { %5765 = vmatmul.mubr.msk.f32.gmra.mxu0 %vm2373_vm2, %v4004_v60  ;;  %5769 = vmatprep.mubr.msk.f32.mxu1 %vm2373_vm2, %v6843_v14 }
 0x1e7   : > { %5770 = vmatmul.mubr.msk.f32.vlgmr.msra.gmra.mxu1 %vm2373_vm2, %v6853_v2 }
 0x1e8   : > { %5772 = vmatprep.mubr.msk.f32.mxu1 %vm2373_vm2, %v6859_v1 }
 0x1eb   : > { %5773 = vmatmul.mubr.msk.f32.gmra.mxu1 %vm2373_vm2, %v6865_v36 }
 0x1ec   : > { %5775 = vmatprep.mubr.msk.f32.mxu1 %vm2373_vm2, %v6871_v24 }
 0x1ef   : > { %5776 = vmatmul.mubr.msk.f32.gmra.mxu1 %vm2373_vm2, %v6877_v38 }
 0x1f0   : > { %5778 = vmatprep.mubr.msk.f32.mxu1 %vm2373_vm2, %v6957_v49 }
 0x1f3   : > { %5779 = vmatmul.mubr.msk.f32.gmra.mxu1 %vm2373_vm2, %v4223_v57 }
 0x1f4   : > { %5781 = vmatprep.mubr.msk.f32.mxu1 %vm2373_vm2, %v6891_v32 }
 0x1f7   : > { %5782 = vmatmul.mubr.msk.f32.gmra.mxu1 %vm2373_vm2, %v6897_v35 }
 0x1f8   : > { %5784 = vmatprep.mubr.msk.f32.mxu1 %vm2373_vm2, %v6903_v3 }
 0x1fb   : > { %5785 = vmatmul.mubr.msk.f32.gmra.mxu1 %vm2373_vm2, %v6909_v26 }
 0x1fc   : > { %5787 = vmatprep.mubr.msk.f32.mxu1 %vm2373_vm2, %v6915_v43 }
 0x1ff   : > { %5788 = vmatmul.mubr.msk.f32.gmra.mxu1 %vm2373_vm2, %v6921_v51 }
 0x200   : > { %5790 = vmatprep.mubr.msk.f32.mxu1 %vm2373_vm2, %v3549_v28 }
 0x203   : > { %5791 = vmatmul.mubr.msk.f32.gmra.mxu1 %vm2373_vm2, %v4231_v25 }
 0x227   : > { %v5563_v45 = vpop.f32.mrf.mxu1 }
 0x228   : > { %v5589_v40 = vpop.f32.mrf.mxu0 }
 0x229   : > { %v2780_v4 = vadd.f32 %v5589_v40, %v5563_v45  ;;  %v2581_v13 = vpop.f32.mrf.mxu1 }
 0x22a   : > { %v2774_v56 = vpop.f32.mrf.mxu0 }
 0x22b   : > { %v2775_v42 = vadd.f32 %v2774_v56, %v2581_v13  ;;  %v5566_v8 = vpop.f32.mrf.mxu1 }
 0x22c   : > { %v5592_v6 = vpop.f32.mrf.mxu0 }
 0x22d   : > { %v2790_v31 = vadd.f32 %v5592_v6, %v5566_v8  ;;  %v2591_v22 = vpop.f32.mrf.mxu1 }
 0x22e   : > { %v2784_v10 = vpop.f32.mrf.mxu0 }
 0x22f   : > { %v2785_v17 = vadd.f32 %v2784_v10, %v2591_v22  ;;  %v5569_v54 = vpop.f32.mrf.mxu1 }
 0x230   : > { %v5595_v11 = vpop.f32.mrf.mxu0 }
 0x231   : > { %v2800_v12 = vadd.f32 %v5595_v11, %v5569_v54  ;;  %v2601_v29 = vpop.f32.mrf.mxu1 }
 0x232   : > { %v2794_v19 = vpop.f32.mrf.mxu0 }
 0x233   : > { %v2795_v15 = vadd.f32 %v2794_v19, %v2601_v29  ;;  %v5572_v23 = vpop.f32.mrf.mxu1 }
 0x234   : > { %v5598_v55 = vpop.f32.mrf.mxu0 }
 0x235   : > { %v2810_v59 = vadd.f32 %v5598_v55, %v5572_v23  ;;  %v2611_v16 = vpop.f32.mrf.mxu1 }
 0x236   : > { %v2804_v20 = vpop.f32.mrf.mxu0 }
 0x237   : > { %v2805_v44 = vadd.f32 %v2804_v20, %v2611_v16  ;;  %v5575_v53 = vpop.f32.mrf.mxu1 }
 0x238   : > { %v5601_v21 = vpop.f32.mrf.mxu0 }
 0x239   : > { %v2820_v58 = vadd.f32 %v5601_v21, %v5575_v53  ;;  %v2621_v0 = vpop.f32.mrf.mxu1 }
 0x23a   : > { %v2814_v18 = vpop.f32.mrf.mxu0 }
 0x23b   : > { %v2815_v52 = vadd.f32 %v2814_v18, %v2621_v0  ;;  %v5578_v37 = vpop.f32.mrf.mxu1 }
 0x23c   : > { %v5604_v41 = vpop.f32.mrf.mxu0 }
 0x23d   : > { %v2830_v7 = vadd.f32 %v5604_v41, %v5578_v37  ;;  %v2631_v62 = vpop.f32.mrf.mxu1 }
 0x23e   : > { %v2824_v63 = vpop.f32.mrf.mxu0 }
 0x23f   : > { %v2825_v14 = vadd.f32 %v2824_v63, %v2631_v62  ;;  %v5581_v27 = vpop.f32.mrf.mxu1 }
 0x240   : > { %v5607_v34 = vpop.f32.mrf.mxu0 }
 0x241   : > { %v2840_v2 = vadd.f32 %v5607_v34, %v5581_v27  ;;  %v2641_v1 = vpop.f32.mrf.mxu1 }
 0x242   : > { %v2834_v36 = vpop.f32.mrf.mxu0 }
 0x243   : > { %v2835_v24 = vadd.f32 %v2834_v36, %v2641_v1  ;;  %v5584_v5 = vpop.f32.mrf.mxu1 }
 0x244   : > { %v5610_v38 = vpop.f32.mrf.mxu0 }
 0x245   : > { %v2850_v39 = vadd.f32 %v5610_v38, %v5584_v5  ;;  %v2651_v47 = vpop.f32.mrf.mxu1 }
 0x246   : > { %v2844_v32 = vpop.f32.mrf.mxu0 }
 0x247   : > { %v2845_v35 = vadd.f32 %v2844_v32, %v2651_v47  ;;  %v5615_v3 = vpop.f32.mrf.mxu1 }
 0x248   : > { %v7078_v26 = vpop.f32.mrf.mxu0  ;;  %v7080_v43 = vadd.f32 %v5615_v3, %v2780_v4 }
 0x249   : > { %v2985_v51 = vpop.f32.mrf.mxu1 }
 0x24a   : > { %v7082_v46 = vpop.f32.mrf.mxu0  ;;  %v7084_v33 = vadd.f32 %v2985_v51, %v2775_v42 }
 0x24b   : > { %v5618_v61 = vpop.f32.mrf.mxu1 }
 0x24c   : > { %v7086_v49 = vpop.f32.mrf.mxu0  ;;  %v7088_v50 = vadd.f32 %v5618_v61, %v2790_v31 }
 0x24d   : > { %v2995_v28 = vpop.f32.mrf.mxu1 }
 0x24e   : > { %v7090_v48 = vpop.f32.mrf.mxu0  ;;  %v7092_v9 = vadd.f32 %v2995_v28, %v2785_v17 }
 0x24f   : > { %v5621_v30 = vpop.f32.mrf.mxu1 }
 0x250   : > { %v7094_v60 = vpop.f32.mrf.mxu0  ;;  %v7096_v57 = vadd.f32 %v5621_v30, %v2800_v12 }
 0x251   : > { %v3005_v25 = vpop.f32.mrf.mxu1 }
 0x252   : > { %v7098_v45 = vpop.f32.mrf.mxu0  ;;  %v7100_v40 = vadd.f32 %v3005_v25, %v2795_v15 }
 0x253   : > { %v5624_v4 = vpop.f32.mrf.mxu1 }
 0x254   : > { %v7102_v13 = vpop.f32.mrf.mxu0  ;;  %v7104_v56 = vadd.f32 %v5624_v4, %v2810_v59 }
 0x255   : > { %v3015_v42 = vpop.f32.mrf.mxu1 }
 0x256   : > { %v7106_v8 = vpop.f32.mrf.mxu0  ;;  %v7108_v6 = vadd.f32 %v3015_v42, %v2805_v44 }
 0x257   : > { %v5627_v31 = vpop.f32.mrf.mxu1 }
 0x258   : > { %v7110_v22 = vpop.f32.mrf.mxu0  ;;  %v7112_v10 = vadd.f32 %v5627_v31, %v2820_v58 }
 0x259   : > { %v3025_v17 = vpop.f32.mrf.mxu1 }
 0x25a   : > { %v7114_v54 = vpop.f32.mrf.mxu0  ;;  %v7116_v11 = vadd.f32 %v3025_v17, %v2815_v52 }
 0x25b   : > { %v5630_v12 = vpop.f32.mrf.mxu1 }
 0x25c   : > { %v7118_v29 = vpop.f32.mrf.mxu0  ;;  %v7120_v19 = vadd.f32 %v5630_v12, %v2830_v7 }
 0x25d   : > { %v3035_v15 = vpop.f32.mrf.mxu1 }
 0x25e   : > { %v7122_v23 = vpop.f32.mrf.mxu0  ;;  %v7124_v55 = vadd.f32 %v3035_v15, %v2825_v14 }
 0x25f   : > { %v5633_v59 = vpop.f32.mrf.mxu1 }
 0x260   : > { %v7126_v16 = vpop.f32.mrf.mxu0  ;;  %v7128_v20 = vadd.f32 %v5633_v59, %v2840_v2 }
 0x261   : > { %7447 = vst [vmem:[#allocation5_spill] sm:$0xff] %v7126_v16  ;;  %v3045_v44 = vpop.f32.mrf.mxu1  ;;  %v3291_v16 = vadd.f32 %v7082_v46, %v7084_v33  ;;  %v3296_v46 = vadd.f32 %v7094_v60, %v7096_v57  ;;  %v3298_v60 = vadd.f32 %v7102_v13, %v7104_v56 }
 0x262   : > { %7448 = vst [vmem:[#allocation17_spill] sm:$0xff] %v7128_v20  ;;  %v7130_v53 = vpop.f32.mrf.mxu0  ;;  %v7132_v21 = vadd.f32 %v3045_v44, %v2835_v24 }
 0x263   : > { %7449 = vst [vmem:[#allocation19_spill] sm:$0xff] %v7130_v53  ;;  %v5636_v58 = vpop.f32.mrf.mxu1 }
 0x264   : > { %7450 = vst [vmem:[#allocation38_spill] sm:$0xff] %v7132_v21  ;;  %v7134_v0 = vpop.f32.mrf.mxu0  ;;  %v7136_v18 = vadd.f32 %v5636_v58, %v2850_v39 }
 0x265   : > { %7451 = vst [vmem:[#allocation7_spill] sm:$0xff] %v7134_v0  ;;  %v3055_v52 = vpop.f32.mrf.mxu1 }
 0x266   : > { %7452 = vst [vmem:[#allocation6_spill] sm:$0xff] %v7136_v18  ;;  %v7138_v37 = vpop.f32.mrf.mxu0  ;;  %v7140_v41 = vadd.f32 %v3055_v52, %v2845_v35 }
 0x267   : > { %7453 = vst [vmem:[#allocation37_spill] sm:$0xff] %v7138_v37  ;;  %v5667_v7 = vpop.f32.mrf.mxu1 }
 0x268   : > { %7454 = vst [vmem:[#allocation8_spill] sm:$0xff] %v7140_v41  ;;  %v5693_v62 = vpop.f32.mrf.mxu0 }
 0x269   : > { %v3439_v63 = vpop.f32.mrf.mxu1 }
 0x26a   : > { %v3666_v14 = vpop.f32.mrf.mxu0 }
 0x26b   : > { %v5670_v27 = vpop.f32.mrf.mxu1 }
 0x26c   : > { %v7142_v34 = vpop.f32.mrf.mxu0 }
 0x26d   : > { %v3449_v2 = vpop.f32.mrf.mxu1 }
 0x26e   : > { %v7144_v1 = vpop.f32.mrf.mxu0 }
 0x26f   : > { %v5673_v36 = vpop.f32.mrf.mxu1 }
 0x270   : > { %v7146_v24 = vpop.f32.mrf.mxu0 }
 0x271   : > { %v7148_v5 = vpop.f32.mrf.mxu1 }
 0x272   : > { %v7150_v38 = vpop.f32.mrf.mxu0 }
 0x273   : > { %v7152_v39 = vpop.f32.mrf.mxu1 }
 0x274   : > { %v7154_v47 = vpop.f32.mrf.mxu0 }
 0x275   : > { %v7156_v32 = vpop.f32.mrf.mxu1 }
 0x276   : > { %v7158_v35 = vpop.f32.mrf.mxu0 }
 0x277   : > { %v7160_v3 = vpop.f32.mrf.mxu1 }
 0x278   : > { %v7162_v51 = vpop.f32.mrf.mxu0 }
 0x279   : > { %7455 = vst [vmem:[#allocation18_spill] sm:$0xff] %v7162_v51  ;;  %v7164_v61 = vpop.f32.mrf.mxu1 }
 0x27a   : > { %v7166_v28 = vpop.f32.mrf.mxu0 }
 0x27b   : > { %7456 = vst [vmem:[#allocation21_spill] sm:$0xff] %v7166_v28  ;;  %v7168_v30 = vpop.f32.mrf.mxu1 }
 0x27c   : > { %7457 = vst [vmem:[#allocation39_spill] sm:$0xff] %v7168_v30  ;;  %v7170_v25 = vpop.f32.mrf.mxu0 }
 0x27d   : > { %7458 = vst [vmem:[#allocation11_spill] sm:$0xff] %v7170_v25  ;;  %v7172_v4 = vpop.f32.mrf.mxu1 }
 0x27e   : > { %7459 = vst [vmem:[#allocation20_spill] sm:$0xff] %v7172_v4  ;;  %v7174_v42 = vpop.f32.mrf.mxu0 }
 0x27f   : > { %7460 = vst [vmem:[#allocation23_spill] sm:$0xff] %v7174_v42  ;;  %v7176_v31 = vpop.f32.mrf.mxu1 }
 0x280   : > { %7461 = vst [vmem:[#allocation41_spill] sm:$0xff] %v7176_v31  ;;  %v7178_v17 = vpop.f32.mrf.mxu0 }
 0x281   : > { %7462 = vst [vmem:[#allocation40_spill] sm:$0xff] %v7178_v17  ;;  %v7180_v12 = vpop.f32.mrf.mxu1 }
 0x282   : > { %7463 = vst [vmem:[#allocation10_spill] sm:$0xff] %v7180_v12  ;;  %v7182_v15 = vpop.f32.mrf.mxu0 }
 0x283   : > { %7464 = vst [vmem:[#allocation9_spill] sm:$0xff] %v7182_v15  ;;  %v7184_v59 = vpop.f32.mrf.mxu1 }
 0x284   : > { %7465 = vst [vmem:[#allocation22_spill] sm:$0xff] %v7184_v59  ;;  %v7186_v44 = vpop.f32.mrf.mxu0 }
 0x285   : > { %7466 = vst [vmem:[#allocation25_spill] sm:$0xff] %v7186_v44  ;;  %v7188_v58 = vpop.f32.mrf.mxu1 }
 0x286   : > { %7467 = vst [vmem:[#allocation42_spill] sm:$0xff] %v7188_v58  ;;  %v7190_v52 = vpop.f32.mrf.mxu0 }
 0x287   : > { %7468 = vst [vmem:[#allocation12_spill] sm:$0xff] %v7190_v52  ;;  %v5719_v37 = vpop.f32.mrf.mxu1  ;;  %v3292_v52 = vadd.f32 %v7078_v26, %v7080_v43  ;;  %v3293_v26 = vadd.f32 %v7090_v48, %v7092_v9 }
 0x288   : > { %v5745_v41 = vpop.f32.mrf.mxu0 }
 0x289   : > { %v3894_v0 = vpop.f32.mrf.mxu1  ;;  %v3519_v20 = vadd.f32 %v5667_v7, %v3292_v52  ;;  %v3520_v52 = vadd.f32 %v3449_v2, %v3293_v26 }
 0x28a   : > { %v4121_v42 = vpop.f32.mrf.mxu0 }
 0x28b   : > { %v5722_v18 = vpop.f32.mrf.mxu1  ;;  %v3746_v43 = vadd.f32 %v5693_v62, %v3519_v20  ;;  %v7241_v62 = vld [vmem:[%s287_s12] ss:$0 sm:$0xff] }
 0x28c   : > { %v5748_v25 = vpop.f32.mrf.mxu0 }
 0x28d   : > { %v3904_v31 = vpop.f32.mrf.mxu1 }
 0x28e   : > { %v4131_v12 = vpop.f32.mrf.mxu0 }
 0x28f   : > { %v5725_v17 = vpop.f32.mrf.mxu1 }
 0x290   : > { %v7196_v59 = vpop.f32.mrf.mxu0 }
 0x291   : > { %v3914_v53 = vpop.f32.mrf.mxu1 }
 0x292   : > { %v7204_v4 = vpop.f32.mrf.mxu0 }
 0x293   : > { %v7192_v21 = vpop.f32.mrf.mxu1 }
 0x294   : > { %v7214_v51 = vpop.f32.mrf.mxu0 }
 0x295   : > { %v7194_v15 = vpop.f32.mrf.mxu1 }
 0x296   : > { %7469 = vst [vmem:[#allocation24_spill] sm:$0xff] %v7194_v15  ;;  %v3294_v15 = vadd.f32 %v7086_v49, %v7088_v50  ;;  %v3295_v49 = vadd.f32 %v7098_v45, %v7100_v40  ;;  %v3523_v50 = vadd.f32 %v5673_v36, %v3296_v46  ;;  %v3747_v45 = vadd.f32 %v7144_v1, %v3520_v52 }
 0x297   : > { %v7198_v44 = vpop.f32.mrf.mxu1 }
 0x298   : > { %7470 = vst [vmem:[#allocation27_spill] sm:$0xff] %v7198_v44  ;;  %v3518_v44 = vadd.f32 %v3439_v63, %v3291_v16  ;;  %v7226_v16 = vpop.f32.mrf.mxu0  ;;  %v3522_v57 = vadd.f32 %v7148_v5, %v3295_v49  ;;  %v3975_v2 = vadd.f32 %v3904_v31, %v3747_v45  ;;  %v7480_v45 = vld [vmem:[#allocation20_spill] sm:$0xff] }
 0x299   : > { %v7200_v58 = vpop.f32.mrf.mxu1 }
 0x29a   : > { %7471 = vst [vmem:[#allocation43_spill] sm:$0xff] %v7200_v58  ;;  %v3745_v7 = vadd.f32 %v3666_v14, %v3518_v44  ;;  %v3297_v14 = vadd.f32 %v7106_v8, %v7108_v6 }
 0x29b   : > { %v7206_v28 = vpop.f32.mrf.mxu1 }
 0x29c   : > { %7472 = vst [vmem:[#allocation15_spill] sm:$0xff] %v7206_v28  ;;  %v3521_v28 = vadd.f32 %v5670_v27, %v3294_v15  ;;  %v3973_v9 = vadd.f32 %v3894_v0, %v3745_v7  ;;  %v3750_v27 = vadd.f32 %v7146_v24, %v3523_v50  ;;  %v3525_v0 = vadd.f32 %v7152_v39, %v3298_v60  ;;  %v7478_v60 = vld [vmem:[#allocation5_spill] sm:$0xff] }
 0x29d   : > { %v7210_v30 = vpop.f32.mrf.mxu1  ;;  %v3524_v1 = vadd.f32 %v7156_v32, %v3297_v14  ;;  %v3302_v15 = vadd.f32 %v7118_v29, %v7120_v19  ;;  %v7474_v29 = vld [vmem:[#allocation18_spill] sm:$0xff]  ;;  %v7476_v52 = vld [vmem:[#allocation24_spill] sm:$0xff] }
 0x29e   : > { %7473 = vst [vmem:[#allocation26_spill] sm:$0xff] %v7210_v30  ;;  %v3974_v30 = vadd.f32 %v5719_v37, %v3746_v43  ;;  %v3748_v48 = vadd.f32 %v7142_v34, %v3521_v28  ;;  %v7247_v34 = vpop.f32.mrf.mxu0  ;;  %v4200_v56 = vadd.f32 %v4121_v42, %v3973_v9  ;;  %v3978_v5 = vadd.f32 %v5725_v17, %v3750_v27  ;;  %v7477_v9 = vld [vmem:[#allocation17_spill] sm:$0xff] }
 0x29f   : > { %v7216_v58 = vpop.f32.mrf.mxu1  ;;  %v3299_v28 = vadd.f32 %v7114_v54, %v7116_v11  ;;  %v3751_v44 = vadd.f32 %v7158_v35, %v3524_v1  ;;  %v3301_v43 = vadd.f32 %v7122_v23, %v7124_v55  ;;  %v7475_v35 = vld [vmem:[#allocation39_spill] sm:$0xff]  ;;  %v3304_v23 = vadd.f32 %v7478_v60, %v7477_v9  ;;  %v7479_v55 = vld [vmem:[#allocation21_spill] sm:$0xff] }
 0x2a0   : > { %v4201_v40 = vadd.f32 %v5745_v41, %v3974_v30  ;;  %v3976_v37 = vadd.f32 %v5722_v18, %v3748_v48  ;;  %v3300_v41 = vadd.f32 %v7110_v22, %v7112_v10  ;;  %v3749_v18 = vadd.f32 %v7150_v38, %v3522_v57  ;;  %v4161_v32 = vpop.f32.mrf.mxu0  ;;  %v7497_v60 = vld [vmem:[#allocation9_spill] sm:$0xff] }
 0x2a1   : > { %v7222_v33 = vpop.f32.mrf.mxu1  ;;  %v3752_v22 = vadd.f32 %v7154_v47, %v3525_v0  ;;  %v3526_v54 = vadd.f32 %v7164_v61, %v3299_v28  ;;  %v4205_v11 = vadd.f32 %v7196_v59, %v3978_v5  ;;  %v3529_v46 = vadd.f32 %v7475_v35, %v3302_v15  ;;  %v7485_v5 = vld [vmem:[#allocation41_spill] sm:$0xff]  ;;  %v7490_v15 = vld [vmem:[#allocation10_spill] sm:$0xff] }
 0x2a2   : > { %v4203_v6 = vadd.f32 %v5748_v25, %v3976_v37  ;;  %v3527_v10 = vadd.f32 %v7160_v3, %v3300_v41  ;;  %v3977_v38 = vadd.f32 %v3914_v53, %v3749_v18  ;;  %v4202_v25 = vadd.f32 %v4131_v12, %v3975_v2  ;;  %v5760_v59 = vpop.f32.mrf.mxu0  ;;  %v7481_v37 = vld [vmem:[#allocation27_spill] sm:$0xff]  ;;  %v7482_v2 = vld [vmem:[#allocation38_spill] sm:$0xff] }
 0x2a3   : > { %v7228_v63 = vpop.f32.mrf.mxu1  ;;  %v3980_v53 = vadd.f32 %v7192_v21, %v3752_v22  ;;  %v3979_v21 = vadd.f32 %v7476_v52, %v3751_v44  ;;  %v3753_v57 = vadd.f32 %v7479_v55, %v3526_v54  ;;  %v7484_v18 = vld [vmem:[#allocation11_spill] sm:$0xff]  ;;  %v7498_v55 = vld [vmem:[#allocation42_spill] sm:$0xff] }
 0x2a4   : > { %v3754_v19 = vadd.f32 %v7474_v29, %v3527_v10  ;;  %v4204_v61 = vadd.f32 %v7204_v4, %v3977_v38  ;;  %v3756_v1 = vadd.f32 %v7484_v18, %v3529_v46  ;;  %v7495_v46 = vld [vmem:[#allocation22_spill] sm:$0xff]  ;;  %v7500_v18 = vld [vmem:[#allocation12_spill] sm:$0xff] }
 0x2a5   : > { %v7238_v20 = vpop.f32.mrf.mxu1  ;;  %v4207_v27 = vadd.f32 %v7214_v51, %v3980_v53  ;;  %v4206_v51 = vadd.f32 %v7226_v16, %v3979_v21  ;;  %v7496_v21 = vld [vmem:[#allocation26_spill] sm:$0xff] }
 0x2a6   : > { %v3982_v4 = vadd.f32 %v7481_v37, %v3754_v19  ;;  %v7494_v19 = vld [vmem:[#allocation40_spill] sm:$0xff] }
 0x2a7   : > { %v5771_v13 = vpop.f32.mrf.mxu1 }
 0x2a8   : > { %v4428_v36 = vadd.f32 %v5771_v13, %v4201_v40  ;;  %v3528_v40 = vadd.f32 %v7480_v45, %v3301_v43  ;;  %v4209_v54 = vadd.f32 %v7247_v34, %v3982_v4  ;;  %v7493_v43 = vld [vmem:[#allocation37_spill] sm:$0xff] }
 0x2a9   : > { %v4348_v8 = vpop.f32.mrf.mxu1 }
 0x2aa   : > { %v4451_v24 = vadd.f32 %v7241_v62, %v4428_v36  ;;  %v4427_v39 = vadd.f32 %v4348_v8, %v4200_v56  ;;  %v7483_v36 = vld [vmem:[#allocation19_spill] sm:$0xff]  ;;  %v3531_v8 = vadd.f32 %v7485_v5, %v3304_v23 }
 0x2ab   : > { %v5774_v30 = vpop.f32.mrf.mxu1  ;;  %v3303_v41 = vadd.f32 %v7483_v36, %v7482_v2 }
 0x2ac   : > { %v4467_v42 = vmax.f32 %v4451_v24, 0.0  ;;  %v4450_v31 = vadd.f32 %v7241_v62, %v4427_v39  ;;  %v4430_v17 = vadd.f32 %v5774_v30, %v4203_v6  ;;  %v7486_v6 = vld [vmem:[#allocation43_spill] sm:$0xff]  ;;  %v4171_v39 = vpop.f32.mrf.mxu0  ;;  %v7487_v30 = vld [vmem:[#allocation6_spill] sm:$0xff]  ;;  %v3758_v35 = vadd.f32 %v7494_v19, %v3531_v8 }
 0x2ad   : > { %v4358_v47 = vpop.f32.mrf.mxu1  ;;  %v3981_v24 = vadd.f32 %v7486_v6, %v3753_v57  ;;  %v3530_v44 = vadd.f32 %v7490_v15, %v3303_v41 }
 0x2ae   : > { %4483 = vst.msk [vmem:[%s7258_s16 + $0x8] sm:$0xff] %vm2373_vm2, %v4467_v42  ;;  %v4466_v3 = vmax.f32 %v4450_v31, 0.0  ;;  %v4453_v12 = vadd.f32 %v7241_v62, %v4430_v17  ;;  %v4429_v26 = vadd.f32 %v4358_v47, %v4202_v25  ;;  %v7488_v25 = vld [vmem:[#allocation7_spill] sm:$0xff]  ;;  %v5763_v52 = vpop.f32.mrf.mxu0  ;;  %v3986_v45 = vadd.f32 %v7216_v58, %v3758_v35 }
 0x2af   : > { %v5777_v7 = vpop.f32.mrf.mxu1  ;;  %v3306_v42 = vadd.f32 %v7488_v25, %v7487_v30  ;;  %v7489_v31 = vld [vmem:[#allocation23_spill] sm:$0xff]  ;;  %v3757_v23 = vadd.f32 %v7497_v60, %v3530_v44 }
 0x2b0   : > { %4482 = vst.msk [vmem:[%s7258_s16] sm:$0xff] %vm2373_vm2, %v4466_v3  ;;  %v4469_v49 = vmax.f32 %v4453_v12, 0.0  ;;  %v4452_v50 = vadd.f32 %v7241_v62, %v4429_v26  ;;  %v4432_v48 = vadd.f32 %v5777_v7, %v4205_v11  ;;  %v3755_v17 = vadd.f32 %v7489_v31, %v3528_v40  ;;  %v7491_v47 = vld [vmem:[#allocation15_spill] sm:$0xff]  ;;  %v7492_v26 = vld [vmem:[#allocation8_spill] sm:$0xff] }
 0x2b1   : > { %v4368_v14 = vpop.f32.mrf.mxu1  ;;  %v3984_v53 = vadd.f32 %v7491_v47, %v3756_v1  ;;  %v3305_v29 = vadd.f32 %v7493_v43, %v7492_v26  ;;  %v4208_v7 = vadd.f32 %v4161_v32, %v3981_v24  ;;  %v4213_v5 = vadd.f32 %v5763_v52, %v3986_v45 }
 0x2b2   : > { %4485 = vst.msk [vmem:[%s7258_s16 + $0x18] sm:$0xff] %vm2373_vm2, %v4469_v49  ;;  %v4468_v0 = vmax.f32 %v4452_v50, 0.0  ;;  %v4455_v13 = vadd.f32 %v7241_v62, %v4432_v48  ;;  %v4431_v56 = vadd.f32 %v4368_v14, %v4204_v61  ;;  %v3533_v61 = vadd.f32 %v7495_v46, %v3306_v42 }
 0x2b3   : > { %v5780_v28 = vpop.f32.mrf.mxu1  ;;  %v3983_v49 = vadd.f32 %v7496_v21, %v3755_v17  ;;  %v3532_v57 = vadd.f32 %v7498_v55, %v3305_v29  ;;  %v4211_v37 = vadd.f32 %v5760_v59, %v3984_v53 }
 0x2b4   : > { %4484 = vst.msk [vmem:[%s7258_s16 + $0x10] sm:$0xff] %vm2373_vm2, %v4468_v0  ;;  %v4471_v22 = vmax.f32 %v4455_v13, 0.0  ;;  %v4454_v10 = vadd.f32 %v7241_v62, %v4431_v56  ;;  %v4434_v38 = vadd.f32 %v5780_v28, %v4207_v27  ;;  %v7499_v27 = vld [vmem:[#allocation25_spill] sm:$0xff]  ;;  %v3985_v13 = vadd.f32 %v7222_v33, %v3757_v23  ;;  %v4181_v56 = vpop.f32.mrf.mxu0 }
 0x2b5   : > { %v4378_v11 = vpop.f32.mrf.mxu1  ;;  %v3760_v0 = vadd.f32 %v7499_v27, %v3533_v61  ;;  %v4210_v36 = vadd.f32 %v4171_v39, %v3983_v49  ;;  %v3759_v1 = vadd.f32 %v7500_v18, %v3532_v57 }
 0x2b6   : > { %4487 = vst.msk [vmem:[%s7258_s16 + $0x28] sm:$0xff] %vm2373_vm2, %v4471_v22  ;;  %v4470_v16 = vmax.f32 %v4454_v10, 0.0  ;;  %v4457_v3 = vadd.f32 %v7241_v62, %v4434_v38  ;;  %v4433_v12 = vadd.f32 %v4378_v11, %v4206_v51  ;;  %v5766_v8 = vpop.f32.mrf.mxu0  ;;  %v4212_v51 = vadd.f32 %v4181_v56, %v3985_v13 }
 0x2b7   : > { %v5783_v34 = vpop.f32.mrf.mxu1  ;;  %v3988_v24 = vadd.f32 %v7228_v63, %v3760_v0  ;;  %v3987_v10 = vadd.f32 %v7238_v20, %v3759_v1 }
 0x2b8   : > { %4486 = vst.msk [vmem:[%s7258_s16 + $0x20] sm:$0xff] %vm2373_vm2, %v4470_v16  ;;  %v4473_v50 = vmax.f32 %v4457_v3, 0.0  ;;  %v4456_v48 = vadd.f32 %v7241_v62, %v4433_v12  ;;  %v4436_v9 = vadd.f32 %v5783_v34, %v4209_v54  ;;  %v4191_v42 = vpop.f32.mrf.mxu0 }
 0x2b9   : > { %v4388_v40 = vpop.f32.mrf.mxu1  ;;  %v4215_v31 = vadd.f32 %v5766_v8, %v3988_v24  ;;  %v4214_v20 = vadd.f32 %v4191_v42, %v3987_v10 }
 0x2ba   : > { %4489 = vst.msk [vmem:[%s7258_s16 + $0x38] sm:$0xff] %vm2373_vm2, %v4473_v50  ;;  %v4472_v32 = vmax.f32 %v4456_v48, 0.0  ;;  %v4459_v4 = vadd.f32 %v7241_v62, %v4436_v9  ;;  %v4435_v14 = vadd.f32 %v4388_v40, %v4208_v7 }
 0x2bb   : > { %v5786_v2 = vpop.f32.mrf.mxu1 }
 0x2bc   : > { %4488 = vst.msk [vmem:[%s7258_s16 + $0x30] sm:$0xff] %vm2373_vm2, %v4472_v32  ;;  %v4475_v58 = vmax.f32 %v4459_v4, 0.0  ;;  %v4458_v59 = vadd.f32 %v7241_v62, %v4435_v14  ;;  %v4438_v41 = vadd.f32 %v5786_v2, %v4211_v37 }
 0x2bd   : > { %v4398_v6 = vpop.f32.mrf.mxu1 }
 0x2be   : > { %4491 = vst.msk [vmem:[%s7258_s16 + $0x48] sm:$0xff] %vm2373_vm2, %v4475_v58  ;;  %v4474_v33 = vmax.f32 %v4458_v59, 0.0  ;;  %v4461_v39 = vadd.f32 %v7241_v62, %v4438_v41  ;;  %v4437_v28 = vadd.f32 %v4398_v6, %v4210_v36 }
 0x2bf   : > { %v5789_v22 = vpop.f32.mrf.mxu1 }
 0x2c0   : > { %4490 = vst.msk [vmem:[%s7258_s16 + $0x40] sm:$0xff] %vm2373_vm2, %v4474_v33  ;;  %v4477_v38 = vmax.f32 %v4461_v39, 0.0  ;;  %v4460_v30 = vadd.f32 %v7241_v62, %v4437_v28  ;;  %v4440_v25 = vadd.f32 %v5789_v22, %v4213_v5 }
 0x2c1   : > { %v4408_v63 = vpop.f32.mrf.mxu1 }
 0x2c2   : > { %4493 = vst.msk [vmem:[%s7258_s16 + $0x58] sm:$0xff] %vm2373_vm2, %v4477_v38  ;;  %v4476_v17 = vmax.f32 %v4460_v30, 0.0  ;;  %v4463_v15 = vadd.f32 %v7241_v62, %v4440_v25  ;;  %v4439_v44 = vadd.f32 %v4408_v63, %v4212_v51 }
 0x2c3   : > { %v5792_v54 = vpop.f32.mrf.mxu1 }
 0x2c4   : > { %4492 = vst.msk [vmem:[%s7258_s16 + $0x50] sm:$0xff] %vm2373_vm2, %v4476_v17  ;;  %v4479_v11 = vmax.f32 %v4463_v15, 0.0  ;;  %v4462_v47 = vadd.f32 %v7241_v62, %v4439_v44  ;;  %v4442_v53 = vadd.f32 %v5792_v54, %v4215_v31 }
 0x2c5   : > { %v4418_v16 = vpop.f32.mrf.mxu1 }
 0x2c6   : > { %4495 = vst.msk [vmem:[%s7258_s16 + $0x68] sm:$0xff] %vm2373_vm2, %v4479_v11  ;;  %v4478_v3 = vmax.f32 %v4462_v47, 0.0  ;;  %v4465_v12 = vadd.f32 %v7241_v62, %v4442_v53  ;;  %v4441_v26 = vadd.f32 %v4418_v16, %v4214_v20 }
 0x2c8   : > { %4494 = vst.msk [vmem:[%s7258_s16 + $0x60] sm:$0xff] %vm2373_vm2, %v4478_v3  ;;  %v4481_v43 = vmax.f32 %v4465_v12, 0.0  ;;  %v4464_v29 = vadd.f32 %v7241_v62, %v4441_v26 }
 0x2ca   : > { %4497 = vst.msk [vmem:[%s7258_s16 + $0x78] sm:$0xff] %vm2373_vm2, %v4481_v43  ;;  %v4480_v19 = vmax.f32 %v4464_v29, 0.0 }
 0x2cc   : > { %4496 = vst.msk [vmem:[%s7258_s16 + $0x70] sm:$0xff] %vm2373_vm2, %v4480_v19 }
 0x2cd PF: > { %s15_s18 = sadd.s32 1, %s5811_s18  }
 0x2ce   : > { %p12_p4 = scmp.ge.s32.totalorder %s15_s18, 4  }
 0x2d0   :  { %14 = sbr.rel (!%p12_p4) target bundleno = 1 (0x1), region = 102 }

</bundles_post_ra>
